<compile_context>
chip_gen: v6e
topology: v6e:2x2x1
jax: 0.10.0
libtpu: 0.0.40
codegen_flags: <defaults>
</compile_context>

<pallas_src>
import functools

import numpy as np
import jax
import jax.numpy as jnp
from jax import lax
from jax.experimental import pallas as pl
from jax.experimental.pallas import tpu as pltpu


def _spatial_attention_kernel(w_ref, x_ref, o_ref,
                              sum_ref, max_ref, avg_pad_ref, max_pad_ref,
                              *, K, H, W, C):
    # w_ref       : SMEM (2*K*K,) f32 conv weights, ordering [in_ch, kh, kw]
    # x_ref       : VMEM (1, c_tile, H*W) input chunk (one batch element, c_tile channels)
    # o_ref       : VMEM (1, 1, H, W) output (written on the last channel step only)
    # sum_ref     : VMEM (1, H*W) f32 running channel sum
    # max_ref     : VMEM (1, H*W) f32 running channel max
    # avg/max_pad : VMEM (H+2p, W+2p) f32 zero-padded reduced maps for the conv
    c_idx = pl.program_id(1)
    n_c = pl.num_programs(1)
    P = K // 2
    Hp, Wp = H + 2 * P, W + 2 * P

    # Lane-dense reduction over the channel chunk (this is where all the bytes are).
    x = x_ref[0].astype(jnp.float32)                  # (c_tile, H*W)
    part_sum = jnp.sum(x, axis=0, keepdims=True)      # (1, H*W)
    part_max = jnp.max(x, axis=0, keepdims=True)      # (1, H*W)

    @pl.when(c_idx == 0)
    def _init():
        sum_ref[...] = part_sum
        max_ref[...] = part_max

    @pl.when(c_idx != 0)
    def _accumulate():
        sum_ref[...] = sum_ref[...] + part_sum
        max_ref[...] = jnp.maximum(max_ref[...], part_max)

    @pl.when(c_idx == n_c - 1)
    def _finalize():
        inv_c = 1.0 / C

        # Zero-padded (Hp, Wp) maps in VMEM == the conv's zero padding on [avg, max].
        avg_pad_ref[...] = jnp.zeros((Hp, Wp), jnp.float32)
        max_pad_ref[...] = jnp.zeros((Hp, Wp), jnp.float32)
        # Unflatten the lane-dense (1, H*W) accumulators into the padded interiors via
        # small ref slice copies (tiny: 2*H copies, once per batch element).
        for i in range(H):
            avg_pad_ref[pl.ds(P + i, 1), pl.ds(P, W)] = (
                sum_ref[:, pl.ds(i * W, W)] * inv_c)
            max_pad_ref[pl.ds(P + i, 1), pl.ds(P, W)] = max_ref[:, pl.ds(i * W, W)]

        ap = avg_pad_ref[...]
        mp = max_pad_ref[...]
        acc = jnp.zeros((H, W), jnp.float32)
        # 7x7 conv over the 2 "channels" (avg, max), fully unrolled shift-and-accumulate.
        # Negligible compute relative to the C reduction -> stays on the VPU.
        for kh in range(K):
            for kw in range(K):
                w_avg = w_ref[kh * K + kw]
                w_max = w_ref[K * K + kh * K + kw]
                acc = acc + w_avg * ap[kh:kh + H, kw:kw + W] \
                          + w_max * mp[kh:kh + H, kw:kw + W]

        o_ref[...] = jax.nn.sigmoid(acc).reshape(1, 1, H, W).astype(o_ref.dtype)


def _pick_c_tile(C, HW, itemsize, budget_bytes=8 * 1024 * 1024):
    """Largest channel tile that (a) divides C, (b) satisfies the (8,128) block rule
    (== C or a multiple of 8), and (c) keeps one input block under ~budget_bytes
    (so a double-buffered pipeline fits comfortably even in v7x's 64 MiB VMEM)."""
    if C * HW * itemsize <= budget_bytes:
        return C
    max_tile = max(8, (budget_bytes // (HW * itemsize)) // 8 * 8)
    t = min((C // 8) * 8, max_tile)
    while t >= 8:
        if C % t == 0:
            return t
        t -= 8
    return C  # no suitable multiple-of-8 divisor; fall back to the full channel dim


def spatial_attention_forward(x, weight, kernel_size=7):
    """x: (N, C, H, W); weight: (1, 2, K, K) float32 (PyTorch OIHW, bias-free conv)."""
    N, C, H, W = x.shape
    K = kernel_size
    P = K // 2
    HW = H * W
    Hp, Wp = H + 2 * P, W + 2 * P

    # Free, contiguous reshape: lane-dense last dim for both the DMAs and the reduction.
    # Keep the source dtype over HBM (cast to f32 inside the kernel).
    x_flat = x.reshape(N, C, HW)
    w_flat = weight.reshape(-1).astype(jnp.float32)     # (2*K*K,)

    c_tile = _pick_c_tile(C, HW, x.dtype.itemsize)
    n_c = C // c_tile

    kernel = functools.partial(_spatial_attention_kernel, K=K, H=H, W=W, C=C)

    return pl.pallas_call(
        kernel,
        out_shape=jax.ShapeDtypeStruct((N, 1, H, W), x.dtype),
        grid=(N, n_c),
        in_specs=[
            pl.BlockSpec(memory_space=pltpu.MemorySpace.SMEM),        # conv weights
            pl.BlockSpec((1, c_tile, HW), lambda n, c: (n, c, 0)),    # input chunk
        ],
        out_specs=pl.BlockSpec((1, 1, H, W), lambda n, c: (n, 0, 0, 0)),
        scratch_shapes=[
            pltpu.VMEM((1, HW), jnp.float32),      # running channel sum
            pltpu.VMEM((1, HW), jnp.float32),      # running channel max
            pltpu.VMEM((Hp, Wp), jnp.float32),     # zero-padded avg map
            pltpu.VMEM((Hp, Wp), jnp.float32),     # zero-padded max map
        ],
        compiler_params=pltpu.CompilerParams(
            dimension_semantics=("parallel", "arbitrary")),
    )(w_flat, x_flat)


def _reference_forward(x, weight):
    avg_map = jnp.mean(x, axis=1, keepdims=True)
    max_map = jnp.max(x, axis=1, keepdims=True)
    cat = jnp.concatenate([avg_map, max_map], axis=1)
    K = weight.shape[-1]
    p = K // 2
    y = lax.conv_general_dilated(
        cat, weight, window_strides=(1, 1), padding=((p, p), (p, p)),
        dimension_numbers=("NCHW", "OIHW", "NCHW"))
    return jax.nn.sigmoid(y)


if __name__ == "__main__":
    key = jax.random.PRNGKey(0)
    kx, kw = jax.random.split(key)

    N, C, H, W = 2, 4, 16, 16
    K = 7

    x = jax.random.normal(kx, (N, C, H, W), dtype=jnp.float32)

    # Deterministic init mimicking PyTorch Conv2d default (kaiming-uniform bound).
    fan_in = 2 * K * K
    bound = 1.0 / np.sqrt(fan_in)
    weight = jax.random.uniform(kw, (1, 2, K, K), dtype=jnp.float32,
                                minval=-bound, maxval=bound)

    out = spatial_attention_forward(x, weight, kernel_size=K)
    out = jax.block_until_ready(out)

    ref = jax.block_until_ready(_reference_forward(x, weight))
    assert out.shape == (N, 1, H, W)
    assert np.allclose(np.asarray(out), np.asarray(ref), atol=1e-5, rtol=1e-5)

    print("KERNEL_OK")
</pallas_src>

<mosaic_0001>
module attributes {stable_mosaic.version = 11 : i64} {
  func.func @_spatial_attention_kernel(%arg0: i32, %arg1: i32, %arg2: memref<98xf32, #tpu.memory_space<smem>>, %arg3: memref<1x4x256xf32, #tpu.memory_space<vmem>>, %arg4: memref<1x1x16x16xf32, #tpu.memory_space<vmem>>, %arg5: memref<1x256xf32, #tpu.memory_space<vmem>>, %arg6: memref<1x256xf32, #tpu.memory_space<vmem>>, %arg7: memref<22x22xf32, #tpu.memory_space<vmem>>, %arg8: memref<22x22xf32, #tpu.memory_space<vmem>>) attributes {dimension_semantics = [#tpu.dimension_semantics<parallel>, #tpu.dimension_semantics<arbitrary>], iteration_bounds = array<i64: 2, 1>, scalar_prefetch = 0 : i64, scratch_operands = 4 : i64, tpu.core_type = #tpu.core_type<tc>, window_params = [{transform_indices = @transform_0, window_bounds = array<i64: 98>}, {transform_indices = @transform_1, window_bounds = array<i64: 1, 4, 256>}, {transform_indices = @transform_2, window_bounds = array<i64: 1, 1, 16, 16>}]} {
    %c0 = arith.constant 0 : index
    %c0_0 = arith.constant 0 : index
    %c0_1 = arith.constant 0 : index
    %0 = vector.load %arg3[%c0, %c0_0, %c0_1] : memref<1x4x256xf32, #tpu.memory_space<vmem>>, vector<1x4x256xf32>
    %1 = vector.shape_cast %0 : vector<1x4x256xf32> to vector<4x256xf32>
    %cst = arith.constant dense<0.000000e+00> : vector<256xf32>
    %2 = vector.multi_reduction <add>, %1, %cst [0] : vector<4x256xf32> to vector<256xf32>
    %3 = vector.shape_cast %2 : vector<256xf32> to vector<1x256xf32>
    %cst_2 = arith.constant dense<0xFF800000> : vector<256xf32>
    %4 = vector.multi_reduction <maximumf>, %1, %cst_2 [0] : vector<4x256xf32> to vector<256xf32>
    %5 = vector.shape_cast %4 : vector<256xf32> to vector<1x256xf32>
    %c0_i32 = arith.constant 0 : i32
    %6 = arith.cmpi eq, %arg1, %c0_i32 : i32
    %7 = arith.extui %6 : i1 to i32
    %c0_i32_3 = arith.constant 0 : i32
    %8 = arith.cmpi ne, %7, %c0_i32_3 : i32
    scf.if %8 {
      %c0_8 = arith.constant 0 : index
      %c0_9 = arith.constant 0 : index
      %15 = vector.load %arg5[%c0_8, %c0_9] : memref<1x256xf32, #tpu.memory_space<vmem>>, vector<1x256xf32>
      tpu.vector_store %arg5[%c0_8, %c0_9], %3 {strides = array<i32>} : memref<1x256xf32, #tpu.memory_space<vmem>>, vector<1x256xf32>,
      %c0_10 = arith.constant 0 : index
      %c0_11 = arith.constant 0 : index
      %16 = vector.load %arg6[%c0_10, %c0_11] : memref<1x256xf32, #tpu.memory_space<vmem>>, vector<1x256xf32>
      tpu.vector_store %arg6[%c0_10, %c0_11], %5 {strides = array<i32>} : memref<1x256xf32, #tpu.memory_space<vmem>>, vector<1x256xf32>,
    } else {
    }
    %c0_i32_4 = arith.constant 0 : i32
    %9 = arith.cmpi ne, %arg1, %c0_i32_4 : i32
    %10 = arith.extui %9 : i1 to i32
    %c0_i32_5 = arith.constant 0 : i32
    %11 = arith.cmpi ne, %10, %c0_i32_5 : i32
    scf.if %11 {
      %c0_8 = arith.constant 0 : index
      %c0_9 = arith.constant 0 : index
      %15 = vector.load %arg5[%c0_8, %c0_9] : memref<1x256xf32, #tpu.memory_space<vmem>>, vector<1x256xf32>
      %16 = arith.addf %15, %3 : vector<1x256xf32>
      %c0_10 = arith.constant 0 : index
      %c0_11 = arith.constant 0 : index
      %17 = vector.load %arg5[%c0_10, %c0_11] : memref<1x256xf32, #tpu.memory_space<vmem>>, vector<1x256xf32>
      tpu.vector_store %arg5[%c0_10, %c0_11], %16 {strides = array<i32>} : memref<1x256xf32, #tpu.memory_space<vmem>>, vector<1x256xf32>,
      %c0_12 = arith.constant 0 : index
      %c0_13 = arith.constant 0 : index
      %18 = vector.load %arg6[%c0_12, %c0_13] : memref<1x256xf32, #tpu.memory_space<vmem>>, vector<1x256xf32>
      %19 = arith.maximumf %18, %5 : vector<1x256xf32>
      %c0_14 = arith.constant 0 : index
      %c0_15 = arith.constant 0 : index
      %20 = vector.load %arg6[%c0_14, %c0_15] : memref<1x256xf32, #tpu.memory_space<vmem>>, vector<1x256xf32>
      tpu.vector_store %arg6[%c0_14, %c0_15], %19 {strides = array<i32>} : memref<1x256xf32, #tpu.memory_space<vmem>>, vector<1x256xf32>,
    } else {
    }
    %c0_i32_6 = arith.constant 0 : i32
    %12 = arith.cmpi eq, %arg1, %c0_i32_6 : i32
    %13 = arith.extui %12 : i1 to i32
    %c0_i32_7 = arith.constant 0 : i32
    %14 = arith.cmpi ne, %13, %c0_i32_7 : i32
    scf.if %14 {
      %cst_8 = arith.constant 0.000000e+00 : f32
      %15 = vector.broadcast %cst_8 : f32 to vector<22x22xf32>
      %c0_9 = arith.constant 0 : index
      %c0_10 = arith.constant 0 : index
      %16 = vector.load %arg7[%c0_9, %c0_10] : memref<22x22xf32, #tpu.memory_space<vmem>>, vector<22x22xf32>
      tpu.vector_store %arg7[%c0_9, %c0_10], %15 {strides = array<i32>} : memref<22x22xf32, #tpu.memory_space<vmem>>, vector<22x22xf32>,
      %cst_11 = arith.constant 0.000000e+00 : f32
      %17 = vector.broadcast %cst_11 : f32 to vector<22x22xf32>
      %c0_12 = arith.constant 0 : index
      %c0_13 = arith.constant 0 : index
      %18 = vector.load %arg8[%c0_12, %c0_13] : memref<22x22xf32, #tpu.memory_space<vmem>>, vector<22x22xf32>
      tpu.vector_store %arg8[%c0_12, %c0_13], %17 {strides = array<i32>} : memref<22x22xf32, #tpu.memory_space<vmem>>, vector<22x22xf32>,
      %c0_14 = arith.constant 0 : index
      %c0_15 = arith.constant 0 : index
      %19 = vector.load %arg5[%c0_14, %c0_15] : memref<1x256xf32, #tpu.memory_space<vmem>>, vector<1x16xf32>
      %cst_16 = arith.constant 2.500000e-01 : f32
      %20 = vector.broadcast %cst_16 : f32 to vector<1x16xf32>
      %21 = arith.mulf %19, %20 : vector<1x16xf32>
      %c3 = arith.constant 3 : index
      %c3_17 = arith.constant 3 : index
      %22 = vector.load %arg7[%c3, %c3_17] : memref<22x22xf32, #tpu.memory_space<vmem>>, vector<1x16xf32>
      tpu.vector_store %arg7[%c3, %c3_17], %21 {strides = array<i32>} : memref<22x22xf32, #tpu.memory_space<vmem>>, vector<1x16xf32>,
      %c0_18 = arith.constant 0 : index
      %c0_19 = arith.constant 0 : index
      %23 = vector.load %arg6[%c0_18, %c0_19] : memref<1x256xf32, #tpu.memory_space<vmem>>, vector<1x16xf32>
      %c3_20 = arith.constant 3 : index
      %c3_21 = arith.constant 3 : index
      %24 = vector.load %arg8[%c3_20, %c3_21] : memref<22x22xf32, #tpu.memory_space<vmem>>, vector<1x16xf32>
      tpu.vector_store %arg8[%c3_20, %c3_21], %23 {strides = array<i32>} : memref<22x22xf32, #tpu.memory_space<vmem>>, vector<1x16xf32>,
      %c0_22 = arith.constant 0 : index
      %c16 = arith.constant 16 : index
      %25 = vector.load %arg5[%c0_22, %c16] : memref<1x256xf32, #tpu.memory_space<vmem>>, vector<1x16xf32>
      %cst_23 = arith.constant 2.500000e-01 : f32
      %26 = vector.broadcast %cst_23 : f32 to vector<1x16xf32>
      %27 = arith.mulf %25, %26 : vector<1x16xf32>
      %c4 = arith.constant 4 : index
      %c3_24 = arith.constant 3 : index
      %28 = vector.load %arg7[%c4, %c3_24] : memref<22x22xf32, #tpu.memory_space<vmem>>, vector<1x16xf32>
      tpu.vector_store %arg7[%c4, %c3_24], %27 {strides = array<i32>} : memref<22x22xf32, #tpu.memory_space<vmem>>, vector<1x16xf32>,
      %c0_25 = arith.constant 0 : index
      %c16_26 = arith.constant 16 : index
      %29 = vector.load %arg6[%c0_25, %c16_26] : memref<1x256xf32, #tpu.memory_space<vmem>>, vector<1x16xf32>
      %c4_27 = arith.constant 4 : index
      %c3_28 = arith.constant 3 : index
      %30 = vector.load %arg8[%c4_27, %c3_28] : memref<22x22xf32, #tpu.memory_space<vmem>>, vector<1x16xf32>
      tpu.vector_store %arg8[%c4_27, %c3_28], %29 {strides = array<i32>} : memref<22x22xf32, #tpu.memory_space<vmem>>, vector<1x16xf32>,
      %c0_29 = arith.constant 0 : index
      %c32 = arith.constant 32 : index
      %31 = vector.load %arg5[%c0_29, %c32] : memref<1x256xf32, #tpu.memory_space<vmem>>, vector<1x16xf32>
      %cst_30 = arith.constant 2.500000e-01 : f32
      %32 = vector.broadcast %cst_30 : f32 to vector<1x16xf32>
      %33 = arith.mulf %31, %32 : vector<1x16xf32>
      %c5 = arith.constant 5 : index
      %c3_31 = arith.constant 3 : index
      %34 = vector.load %arg7[%c5, %c3_31] : memref<22x22xf32, #tpu.memory_space<vmem>>, vector<1x16xf32>
      tpu.vector_store %arg7[%c5, %c3_31], %33 {strides = array<i32>} : memref<22x22xf32, #tpu.memory_space<vmem>>, vector<1x16xf32>,
      %c0_32 = arith.constant 0 : index
      %c32_33 = arith.constant 32 : index
      %35 = vector.load %arg6[%c0_32, %c32_33] : memref<1x256xf32, #tpu.memory_space<vmem>>, vector<1x16xf32>
      %c5_34 = arith.constant 5 : index
      %c3_35 = arith.constant 3 : index
      %36 = vector.load %arg8[%c5_34, %c3_35] : memref<22x22xf32, #tpu.memory_space<vmem>>, vector<1x16xf32>
      tpu.vector_store %arg8[%c5_34, %c3_35], %35 {strides = array<i32>} : memref<22x22xf32, #tpu.memory_space<vmem>>, vector<1x16xf32>,
      %c0_36 = arith.constant 0 : index
      %c48 = arith.constant 48 : index
      %37 = vector.load %arg5[%c0_36, %c48] : memref<1x256xf32, #tpu.memory_space<vmem>>, vector<1x16xf32>
      %cst_37 = arith.constant 2.500000e-01 : f32
      %38 = vector.broadcast %cst_37 : f32 to vector<1x16xf32>
      %39 = arith.mulf %37, %38 : vector<1x16xf32>
      %c6 = arith.constant 6 : index
      %c3_38 = arith.constant 3 : index
      %40 = vector.load %arg7[%c6, %c3_38] : memref<22x22xf32, #tpu.memory_space<vmem>>, vector<1x16xf32>
      tpu.vector_store %arg7[%c6, %c3_38], %39 {strides = array<i32>} : memref<22x22xf32, #tpu.memory_space<vmem>>, vector<1x16xf32>,
      %c0_39 = arith.constant 0 : index
      %c48_40 = arith.constant 48 : index
      %41 = vector.load %arg6[%c0_39, %c48_40] : memref<1x256xf32, #tpu.memory_space<vmem>>, vector<1x16xf32>
      %c6_41 = arith.constant 6 : index
      %c3_42 = arith.constant 3 : index
      %42 = vector.load %arg8[%c6_41, %c3_42] : memref<22x22xf32, #tpu.memory_space<vmem>>, vector<1x16xf32>
      tpu.vector_store %arg8[%c6_41, %c3_42], %41 {strides = array<i32>} : memref<22x22xf32, #tpu.memory_space<vmem>>, vector<1x16xf32>,
      %c0_43 = arith.constant 0 : index
      %c64 = arith.constant 64 : index
      %43 = vector.load %arg5[%c0_43, %c64] : memref<1x256xf32, #tpu.memory_space<vmem>>, vector<1x16xf32>
      %cst_44 = arith.constant 2.500000e-01 : f32
      %44 = vector.broadcast %cst_44 : f32 to vector<1x16xf32>
      %45 = arith.mulf %43, %44 : vector<1x16xf32>
      %c7 = arith.constant 7 : index
      %c3_45 = arith.constant 3 : index
      %46 = vector.load %arg7[%c7, %c3_45] : memref<22x22xf32, #tpu.memory_space<vmem>>, vector<1x16xf32>
      tpu.vector_store %arg7[%c7, %c3_45], %45 {strides = array<i32>} : memref<22x22xf32, #tpu.memory_space<vmem>>, vector<1x16xf32>,
      %c0_46 = arith.constant 0 : index
      %c64_47 = arith.constant 64 : index
      %47 = vector.load %arg6[%c0_46, %c64_47] : memref<1x256xf32, #tpu.memory_space<vmem>>, vector<1x16xf32>
      %c7_48 = arith.constant 7 : index
      %c3_49 = arith.constant 3 : index
      %48 = vector.load %arg8[%c7_48, %c3_49] : memref<22x22xf32, #tpu.memory_space<vmem>>, vector<1x16xf32>
      tpu.vector_store %arg8[%c7_48, %c3_49], %47 {strides = array<i32>} : memref<22x22xf32, #tpu.memory_space<vmem>>, vector<1x16xf32>,
      %c0_50 = arith.constant 0 : index
      %c80 = arith.constant 80 : index
      %49 = vector.load %arg5[%c0_50, %c80] : memref<1x256xf32, #tpu.memory_space<vmem>>, vector<1x16xf32>
      %cst_51 = arith.constant 2.500000e-01 : f32
      %50 = vector.broadcast %cst_51 : f32 to vector<1x16xf32>
      %51 = arith.mulf %49, %50 : vector<1x16xf32>
      %c8 = arith.constant 8 : index
      %c3_52 = arith.constant 3 : index
      %52 = vector.load %arg7[%c8, %c3_52] : memref<22x22xf32, #tpu.memory_space<vmem>>, vector<1x16xf32>
      tpu.vector_store %arg7[%c8, %c3_52], %51 {strides = array<i32>} : memref<22x22xf32, #tpu.memory_space<vmem>>, vector<1x16xf32>,
      %c0_53 = arith.constant 0 : index
      %c80_54 = arith.constant 80 : index
      %53 = vector.load %arg6[%c0_53, %c80_54] : memref<1x256xf32, #tpu.memory_space<vmem>>, vector<1x16xf32>
      %c8_55 = arith.constant 8 : index
      %c3_56 = arith.constant 3 : index
      %54 = vector.load %arg8[%c8_55, %c3_56] : memref<22x22xf32, #tpu.memory_space<vmem>>, vector<1x16xf32>
      tpu.vector_store %arg8[%c8_55, %c3_56], %53 {strides = array<i32>} : memref<22x22xf32, #tpu.memory_space<vmem>>, vector<1x16xf32>,
      %c0_57 = arith.constant 0 : index
      %c96 = arith.constant 96 : index
      %55 = vector.load %arg5[%c0_57, %c96] : memref<1x256xf32, #tpu.memory_space<vmem>>, vector<1x16xf32>
      %cst_58 = arith.constant 2.500000e-01 : f32
      %56 = vector.broadcast %cst_58 : f32 to vector<1x16xf32>
      %57 = arith.mulf %55, %56 : vector<1x16xf32>
      %c9 = arith.constant 9 : index
      %c3_59 = arith.constant 3 : index
      %58 = vector.load %arg7[%c9, %c3_59] : memref<22x22xf32, #tpu.memory_space<vmem>>, vector<1x16xf32>
      tpu.vector_store %arg7[%c9, %c3_59], %57 {strides = array<i32>} : memref<22x22xf32, #tpu.memory_space<vmem>>, vector<1x16xf32>,
      %c0_60 = arith.constant 0 : index
      %c96_61 = arith.constant 96 : index
      %59 = vector.load %arg6[%c0_60, %c96_61] : memref<1x256xf32, #tpu.memory_space<vmem>>, vector<1x16xf32>
      %c9_62 = arith.constant 9 : index
      %c3_63 = arith.constant 3 : index
      %60 = vector.load %arg8[%c9_62, %c3_63] : memref<22x22xf32, #tpu.memory_space<vmem>>, vector<1x16xf32>
      tpu.vector_store %arg8[%c9_62, %c3_63], %59 {strides = array<i32>} : memref<22x22xf32, #tpu.memory_space<vmem>>, vector<1x16xf32>,
      %c0_64 = arith.constant 0 : index
      %c112 = arith.constant 112 : index
      %61 = vector.load %arg5[%c0_64, %c112] : memref<1x256xf32, #tpu.memory_space<vmem>>, vector<1x16xf32>
      %cst_65 = arith.constant 2.500000e-01 : f32
      %62 = vector.broadcast %cst_65 : f32 to vector<1x16xf32>
      %63 = arith.mulf %61, %62 : vector<1x16xf32>
      %c10 = arith.constant 10 : index
      %c3_66 = arith.constant 3 : index
      %64 = vector.load %arg7[%c10, %c3_66] : memref<22x22xf32, #tpu.memory_space<vmem>>, vector<1x16xf32>
      tpu.vector_store %arg7[%c10, %c3_66], %63 {strides = array<i32>} : memref<22x22xf32, #tpu.memory_space<vmem>>, vector<1x16xf32>,
      %c0_67 = arith.constant 0 : index
      %c112_68 = arith.constant 112 : index
      %65 = vector.load %arg6[%c0_67, %c112_68] : memref<1x256xf32, #tpu.memory_space<vmem>>, vector<1x16xf32>
      %c10_69 = arith.constant 10 : index
      %c3_70 = arith.constant 3 : index
      %66 = vector.load %arg8[%c10_69, %c3_70] : memref<22x22xf32, #tpu.memory_space<vmem>>, vector<1x16xf32>
      tpu.vector_store %arg8[%c10_69, %c3_70], %65 {strides = array<i32>} : memref<22x22xf32, #tpu.memory_space<vmem>>, vector<1x16xf32>,
      %c0_71 = arith.constant 0 : index
      %c128 = arith.constant 128 : index
      %67 = vector.load %arg5[%c0_71, %c128] : memref<1x256xf32, #tpu.memory_space<vmem>>, vector<1x16xf32>
      %cst_72 = arith.constant 2.500000e-01 : f32
      %68 = vector.broadcast %cst_72 : f32 to vector<1x16xf32>
      %69 = arith.mulf %67, %68 : vector<1x16xf32>
      %c11 = arith.constant 11 : index
      %c3_73 = arith.constant 3 : index
      %70 = vector.load %arg7[%c11, %c3_73] : memref<22x22xf32, #tpu.memory_space<vmem>>, vector<1x16xf32>
      tpu.vector_store %arg7[%c11, %c3_73], %69 {strides = array<i32>} : memref<22x22xf32, #tpu.memory_space<vmem>>, vector<1x16xf32>,
      %c0_74 = arith.constant 0 : index
      %c128_75 = arith.constant 128 : index
      %71 = vector.load %arg6[%c0_74, %c128_75] : memref<1x256xf32, #tpu.memory_space<vmem>>, vector<1x16xf32>
      %c11_76 = arith.constant 11 : index
      %c3_77 = arith.constant 3 : index
      %72 = vector.load %arg8[%c11_76, %c3_77] : memref<22x22xf32, #tpu.memory_space<vmem>>, vector<1x16xf32>
      tpu.vector_store %arg8[%c11_76, %c3_77], %71 {strides = array<i32>} : memref<22x22xf32, #tpu.memory_space<vmem>>, vector<1x16xf32>,
      %c0_78 = arith.constant 0 : index
      %c144 = arith.constant 144 : index
      %73 = vector.load %arg5[%c0_78, %c144] : memref<1x256xf32, #tpu.memory_space<vmem>>, vector<1x16xf32>
      %cst_79 = arith.constant 2.500000e-01 : f32
      %74 = vector.broadcast %cst_79 : f32 to vector<1x16xf32>
      %75 = arith.mulf %73, %74 : vector<1x16xf32>
      %c12 = arith.constant 12 : index
      %c3_80 = arith.constant 3 : index
      %76 = vector.load %arg7[%c12, %c3_80] : memref<22x22xf32, #tpu.memory_space<vmem>>, vector<1x16xf32>
      tpu.vector_store %arg7[%c12, %c3_80], %75 {strides = array<i32>} : memref<22x22xf32, #tpu.memory_space<vmem>>, vector<1x16xf32>,
      %c0_81 = arith.constant 0 : index
      %c144_82 = arith.constant 144 : index
      %77 = vector.load %arg6[%c0_81, %c144_82] : memref<1x256xf32, #tpu.memory_space<vmem>>, vector<1x16xf32>
      %c12_83 = arith.constant 12 : index
      %c3_84 = arith.constant 3 : index
      %78 = vector.load %arg8[%c12_83, %c3_84] : memref<22x22xf32, #tpu.memory_space<vmem>>, vector<1x16xf32>
      tpu.vector_store %arg8[%c12_83, %c3_84], %77 {strides = array<i32>} : memref<22x22xf32, #tpu.memory_space<vmem>>, vector<1x16xf32>,
      %c0_85 = arith.constant 0 : index
      %c160 = arith.constant 160 : index
      %79 = vector.load %arg5[%c0_85, %c160] : memref<1x256xf32, #tpu.memory_space<vmem>>, vector<1x16xf32>
      %cst_86 = arith.constant 2.500000e-01 : f32
      %80 = vector.broadcast %cst_86 : f32 to vector<1x16xf32>
      %81 = arith.mulf %79, %80 : vector<1x16xf32>
      %c13 = arith.constant 13 : index
      %c3_87 = arith.constant 3 : index
      %82 = vector.load %arg7[%c13, %c3_87] : memref<22x22xf32, #tpu.memory_space<vmem>>, vector<1x16xf32>
      tpu.vector_store %arg7[%c13, %c3_87], %81 {strides = array<i32>} : memref<22x22xf32, #tpu.memory_space<vmem>>, vector<1x16xf32>,
      %c0_88 = arith.constant 0 : index
      %c160_89 = arith.constant 160 : index
      %83 = vector.load %arg6[%c0_88, %c160_89] : memref<1x256xf32, #tpu.memory_space<vmem>>, vector<1x16xf32>
      %c13_90 = arith.constant 13 : index
      %c3_91 = arith.constant 3 : index
      %84 = vector.load %arg8[%c13_90, %c3_91] : memref<22x22xf32, #tpu.memory_space<vmem>>, vector<1x16xf32>
      tpu.vector_store %arg8[%c13_90, %c3_91], %83 {strides = array<i32>} : memref<22x22xf32, #tpu.memory_space<vmem>>, vector<1x16xf32>,
      %c0_92 = arith.constant 0 : index
      %c176 = arith.constant 176 : index
      %85 = vector.load %arg5[%c0_92, %c176] : memref<1x256xf32, #tpu.memory_space<vmem>>, vector<1x16xf32>
      %cst_93 = arith.constant 2.500000e-01 : f32
      %86 = vector.broadcast %cst_93 : f32 to vector<1x16xf32>
      %87 = arith.mulf %85, %86 : vector<1x16xf32>
      %c14 = arith.constant 14 : index
      %c3_94 = arith.constant 3 : index
      %88 = vector.load %arg7[%c14, %c3_94] : memref<22x22xf32, #tpu.memory_space<vmem>>, vector<1x16xf32>
      tpu.vector_store %arg7[%c14, %c3_94], %87 {strides = array<i32>} : memref<22x22xf32, #tpu.memory_space<vmem>>, vector<1x16xf32>,
      %c0_95 = arith.constant 0 : index
      %c176_96 = arith.constant 176 : index
      %89 = vector.load %arg6[%c0_95, %c176_96] : memref<1x256xf32, #tpu.memory_space<vmem>>, vector<1x16xf32>
      %c14_97 = arith.constant 14 : index
      %c3_98 = arith.constant 3 : index
      %90 = vector.load %arg8[%c14_97, %c3_98] : memref<22x22xf32, #tpu.memory_space<vmem>>, vector<1x16xf32>
      tpu.vector_store %arg8[%c14_97, %c3_98], %89 {strides = array<i32>} : memref<22x22xf32, #tpu.memory_space<vmem>>, vector<1x16xf32>,
      %c0_99 = arith.constant 0 : index
      %c192 = arith.constant 192 : index
      %91 = vector.load %arg5[%c0_99, %c192] : memref<1x256xf32, #tpu.memory_space<vmem>>, vector<1x16xf32>
      %cst_100 = arith.constant 2.500000e-01 : f32
      %92 = vector.broadcast %cst_100 : f32 to vector<1x16xf32>
      %93 = arith.mulf %91, %92 : vector<1x16xf32>
      %c15 = arith.constant 15 : index
      %c3_101 = arith.constant 3 : index
      %94 = vector.load %arg7[%c15, %c3_101] : memref<22x22xf32, #tpu.memory_space<vmem>>, vector<1x16xf32>
      tpu.vector_store %arg7[%c15, %c3_101], %93 {strides = array<i32>} : memref<22x22xf32, #tpu.memory_space<vmem>>, vector<1x16xf32>,
      %c0_102 = arith.constant 0 : index
      %c192_103 = arith.constant 192 : index
      %95 = vector.load %arg6[%c0_102, %c192_103] : memref<1x256xf32, #tpu.memory_space<vmem>>, vector<1x16xf32>
      %c15_104 = arith.constant 15 : index
      %c3_105 = arith.constant 3 : index
      %96 = vector.load %arg8[%c15_104, %c3_105] : memref<22x22xf32, #tpu.memory_space<vmem>>, vector<1x16xf32>
      tpu.vector_store %arg8[%c15_104, %c3_105], %95 {strides = array<i32>} : memref<22x22xf32, #tpu.memory_space<vmem>>, vector<1x16xf32>,
      %c0_106 = arith.constant 0 : index
      %c208 = arith.constant 208 : index
      %97 = vector.load %arg5[%c0_106, %c208] : memref<1x256xf32, #tpu.memory_space<vmem>>, vector<1x16xf32>
      %cst_107 = arith.constant 2.500000e-01 : f32
      %98 = vector.broadcast %cst_107 : f32 to vector<1x16xf32>
      %99 = arith.mulf %97, %98 : vector<1x16xf32>
      %c16_108 = arith.constant 16 : index
      %c3_109 = arith.constant 3 : index
      %100 = vector.load %arg7[%c16_108, %c3_109] : memref<22x22xf32, #tpu.memory_space<vmem>>, vector<1x16xf32>
      tpu.vector_store %arg7[%c16_108, %c3_109], %99 {strides = array<i32>} : memref<22x22xf32, #tpu.memory_space<vmem>>, vector<1x16xf32>,
      %c0_110 = arith.constant 0 : index
      %c208_111 = arith.constant 208 : index
      %101 = vector.load %arg6[%c0_110, %c208_111] : memref<1x256xf32, #tpu.memory_space<vmem>>, vector<1x16xf32>
      %c16_112 = arith.constant 16 : index
      %c3_113 = arith.constant 3 : index
      %102 = vector.load %arg8[%c16_112, %c3_113] : memref<22x22xf32, #tpu.memory_space<vmem>>, vector<1x16xf32>
      tpu.vector_store %arg8[%c16_112, %c3_113], %101 {strides = array<i32>} : memref<22x22xf32, #tpu.memory_space<vmem>>, vector<1x16xf32>,
      %c0_114 = arith.constant 0 : index
      %c224 = arith.constant 224 : index
      %103 = vector.load %arg5[%c0_114, %c224] : memref<1x256xf32, #tpu.memory_space<vmem>>, vector<1x16xf32>
      %cst_115 = arith.constant 2.500000e-01 : f32
      %104 = vector.broadcast %cst_115 : f32 to vector<1x16xf32>
      %105 = arith.mulf %103, %104 : vector<1x16xf32>
      %c17 = arith.constant 17 : index
      %c3_116 = arith.constant 3 : index
      %106 = vector.load %arg7[%c17, %c3_116] : memref<22x22xf32, #tpu.memory_space<vmem>>, vector<1x16xf32>
      tpu.vector_store %arg7[%c17, %c3_116], %105 {strides = array<i32>} : memref<22x22xf32, #tpu.memory_space<vmem>>, vector<1x16xf32>,
      %c0_117 = arith.constant 0 : index
      %c224_118 = arith.constant 224 : index
      %107 = vector.load %arg6[%c0_117, %c224_118] : memref<1x256xf32, #tpu.memory_space<vmem>>, vector<1x16xf32>
      %c17_119 = arith.constant 17 : index
      %c3_120 = arith.constant 3 : index
      %108 = vector.load %arg8[%c17_119, %c3_120] : memref<22x22xf32, #tpu.memory_space<vmem>>, vector<1x16xf32>
      tpu.vector_store %arg8[%c17_119, %c3_120], %107 {strides = array<i32>} : memref<22x22xf32, #tpu.memory_space<vmem>>, vector<1x16xf32>,
      %c0_121 = arith.constant 0 : index
      %c240 = arith.constant 240 : index
      %109 = vector.load %arg5[%c0_121, %c240] : memref<1x256xf32, #tpu.memory_space<vmem>>, vector<1x16xf32>
      %cst_122 = arith.constant 2.500000e-01 : f32
      %110 = vector.broadcast %cst_122 : f32 to vector<1x16xf32>
      %111 = arith.mulf %109, %110 : vector<1x16xf32>
      %c18 = arith.constant 18 : index
      %c3_123 = arith.constant 3 : index
      %112 = vector.load %arg7[%c18, %c3_123] : memref<22x22xf32, #tpu.memory_space<vmem>>, vector<1x16xf32>
      tpu.vector_store %arg7[%c18, %c3_123], %111 {strides = array<i32>} : memref<22x22xf32, #tpu.memory_space<vmem>>, vector<1x16xf32>,
      %c0_124 = arith.constant 0 : index
      %c240_125 = arith.constant 240 : index
      %113 = vector.load %arg6[%c0_124, %c240_125] : memref<1x256xf32, #tpu.memory_space<vmem>>, vector<1x16xf32>
      %c18_126 = arith.constant 18 : index
      %c3_127 = arith.constant 3 : index
      %114 = vector.load %arg8[%c18_126, %c3_127] : memref<22x22xf32, #tpu.memory_space<vmem>>, vector<1x16xf32>
      tpu.vector_store %arg8[%c18_126, %c3_127], %113 {strides = array<i32>} : memref<22x22xf32, #tpu.memory_space<vmem>>, vector<1x16xf32>,
      %c0_128 = arith.constant 0 : index
      %c0_129 = arith.constant 0 : index
      %115 = vector.load %arg7[%c0_128, %c0_129] : memref<22x22xf32, #tpu.memory_space<vmem>>, vector<22x22xf32>
      %c0_130 = arith.constant 0 : index
      %c0_131 = arith.constant 0 : index
      %116 = vector.load %arg8[%c0_130, %c0_131] : memref<22x22xf32, #tpu.memory_space<vmem>>, vector<22x22xf32>
      %cst_132 = arith.constant 0.000000e+00 : f32
      %117 = vector.broadcast %cst_132 : f32 to vector<16x16xf32>
      %c0_133 = arith.constant 0 : index
      %118 = memref.load %arg2[%c0_133] : memref<98xf32, #tpu.memory_space<smem>>
      %c49 = arith.constant 49 : index
      %119 = memref.load %arg2[%c49] : memref<98xf32, #tpu.memory_space<smem>>
      %120 = vector.extract_strided_slice %115 {offsets = [0, 0], sizes = [16, 16], strides = [1, 1]} : vector<22x22xf32> to vector<16x16xf32>
      %121 = vector.broadcast %118 : f32 to vector<16x16xf32>
      %122 = arith.mulf %121, %120 : vector<16x16xf32>
      %123 = arith.addf %117, %122 : vector<16x16xf32>
      %124 = vector.extract_strided_slice %116 {offsets = [0, 0], sizes = [16, 16], strides = [1, 1]} : vector<22x22xf32> to vector<16x16xf32>
      %125 = vector.broadcast %119 : f32 to vector<16x16xf32>
      %126 = arith.mulf %125, %124 : vector<16x16xf32>
      %127 = arith.addf %123, %126 : vector<16x16xf32>
      %c1 = arith.constant 1 : index
      %128 = memref.load %arg2[%c1] : memref<98xf32, #tpu.memory_space<smem>>
      %c50 = arith.constant 50 : index
      %129 = memref.load %arg2[%c50] : memref<98xf32, #tpu.memory_space<smem>>
      %130 = vector.extract_strided_slice %115 {offsets = [0, 1], sizes = [16, 16], strides = [1, 1]} : vector<22x22xf32> to vector<16x16xf32>
      %131 = vector.broadcast %128 : f32 to vector<16x16xf32>
      %132 = arith.mulf %131, %130 : vector<16x16xf32>
      %133 = arith.addf %127, %132 : vector<16x16xf32>
      %134 = vector.extract_strided_slice %116 {offsets = [0, 1], sizes = [16, 16], strides = [1, 1]} : vector<22x22xf32> to vector<16x16xf32>
      %135 = vector.broadcast %129 : f32 to vector<16x16xf32>
      %136 = arith.mulf %135, %134 : vector<16x16xf32>
      %137 = arith.addf %133, %136 : vector<16x16xf32>
      %c2 = arith.constant 2 : index
      %138 = memref.load %arg2[%c2] : memref<98xf32, #tpu.memory_space<smem>>
      %c51 = arith.constant 51 : index
      %139 = memref.load %arg2[%c51] : memref<98xf32, #tpu.memory_space<smem>>
      %140 = vector.extract_strided_slice %115 {offsets = [0, 2], sizes = [16, 16], strides = [1, 1]} : vector<22x22xf32> to vector<16x16xf32>
      %141 = vector.broadcast %138 : f32 to vector<16x16xf32>
      %142 = arith.mulf %141, %140 : vector<16x16xf32>
      %143 = arith.addf %137, %142 : vector<16x16xf32>
      %144 = vector.extract_strided_slice %116 {offsets = [0, 2], sizes = [16, 16], strides = [1, 1]} : vector<22x22xf32> to vector<16x16xf32>
      %145 = vector.broadcast %139 : f32 to vector<16x16xf32>
      %146 = arith.mulf %145, %144 : vector<16x16xf32>
      %147 = arith.addf %143, %146 : vector<16x16xf32>
      %c3_134 = arith.constant 3 : index
      %148 = memref.load %arg2[%c3_134] : memref<98xf32, #tpu.memory_space<smem>>
      %c52 = arith.constant 52 : index
      %149 = memref.load %arg2[%c52] : memref<98xf32, #tpu.memory_space<smem>>
      %150 = vector.extract_strided_slice %115 {offsets = [0, 3], sizes = [16, 16], strides = [1, 1]} : vector<22x22xf32> to vector<16x16xf32>
      %151 = vector.broadcast %148 : f32 to vector<16x16xf32>
      %152 = arith.mulf %151, %150 : vector<16x16xf32>
      %153 = arith.addf %147, %152 : vector<16x16xf32>
      %154 = vector.extract_strided_slice %116 {offsets = [0, 3], sizes = [16, 16], strides = [1, 1]} : vector<22x22xf32> to vector<16x16xf32>
      %155 = vector.broadcast %149 : f32 to vector<16x16xf32>
      %156 = arith.mulf %155, %154 : vector<16x16xf32>
      %157 = arith.addf %153, %156 : vector<16x16xf32>
      %c4_135 = arith.constant 4 : index
      %158 = memref.load %arg2[%c4_135] : memref<98xf32, #tpu.memory_space<smem>>
      %c53 = arith.constant 53 : index
      %159 = memref.load %arg2[%c53] : memref<98xf32, #tpu.memory_space<smem>>
      %160 = vector.extract_strided_slice %115 {offsets = [0, 4], sizes = [16, 16], strides = [1, 1]} : vector<22x22xf32> to vector<16x16xf32>
      %161 = vector.broadcast %158 : f32 to vector<16x16xf32>
      %162 = arith.mulf %161, %160 : vector<16x16xf32>
      %163 = arith.addf %157, %162 : vector<16x16xf32>
      %164 = vector.extract_strided_slice %116 {offsets = [0, 4], sizes = [16, 16], strides = [1, 1]} : vector<22x22xf32> to vector<16x16xf32>
      %165 = vector.broadcast %159 : f32 to vector<16x16xf32>
      %166 = arith.mulf %165, %164 : vector<16x16xf32>
      %167 = arith.addf %163, %166 : vector<16x16xf32>
      %c5_136 = arith.constant 5 : index
      %168 = memref.load %arg2[%c5_136] : memref<98xf32, #tpu.memory_space<smem>>
      %c54 = arith.constant 54 : index
      %169 = memref.load %arg2[%c54] : memref<98xf32, #tpu.memory_space<smem>>
      %170 = vector.extract_strided_slice %115 {offsets = [0, 5], sizes = [16, 16], strides = [1, 1]} : vector<22x22xf32> to vector<16x16xf32>
      %171 = vector.broadcast %168 : f32 to vector<16x16xf32>
      %172 = arith.mulf %171, %170 : vector<16x16xf32>
      %173 = arith.addf %167, %172 : vector<16x16xf32>
      %174 = vector.extract_strided_slice %116 {offsets = [0, 5], sizes = [16, 16], strides = [1, 1]} : vector<22x22xf32> to vector<16x16xf32>
      %175 = vector.broadcast %169 : f32 to vector<16x16xf32>
      %176 = arith.mulf %175, %174 : vector<16x16xf32>
      %177 = arith.addf %173, %176 : vector<16x16xf32>
      %c6_137 = arith.constant 6 : index
      %178 = memref.load %arg2[%c6_137] : memref<98xf32, #tpu.memory_space<smem>>
      %c55 = arith.constant 55 : index
      %179 = memref.load %arg2[%c55] : memref<98xf32, #tpu.memory_space<smem>>
      %180 = vector.extract_strided_slice %115 {offsets = [0, 6], sizes = [16, 16], strides = [1, 1]} : vector<22x22xf32> to vector<16x16xf32>
      %181 = vector.broadcast %178 : f32 to vector<16x16xf32>
      %182 = arith.mulf %181, %180 : vector<16x16xf32>
      %183 = arith.addf %177, %182 : vector<16x16xf32>
      %184 = vector.extract_strided_slice %116 {offsets = [0, 6], sizes = [16, 16], strides = [1, 1]} : vector<22x22xf32> to vector<16x16xf32>
      %185 = vector.broadcast %179 : f32 to vector<16x16xf32>
      %186 = arith.mulf %185, %184 : vector<16x16xf32>
      %187 = arith.addf %183, %186 : vector<16x16xf32>
      %c7_138 = arith.constant 7 : index
      %188 = memref.load %arg2[%c7_138] : memref<98xf32, #tpu.memory_space<smem>>
      %c56 = arith.constant 56 : index
      %189 = memref.load %arg2[%c56] : memref<98xf32, #tpu.memory_space<smem>>
      %190 = vector.extract_strided_slice %115 {offsets = [1, 0], sizes = [16, 16], strides = [1, 1]} : vector<22x22xf32> to vector<16x16xf32>
      %191 = vector.broadcast %188 : f32 to vector<16x16xf32>
      %192 = arith.mulf %191, %190 : vector<16x16xf32>
      %193 = arith.addf %187, %192 : vector<16x16xf32>
      %194 = vector.extract_strided_slice %116 {offsets = [1, 0], sizes = [16, 16], strides = [1, 1]} : vector<22x22xf32> to vector<16x16xf32>
      %195 = vector.broadcast %189 : f32 to vector<16x16xf32>
      %196 = arith.mulf %195, %194 : vector<16x16xf32>
      %197 = arith.addf %193, %196 : vector<16x16xf32>
      %c8_139 = arith.constant 8 : index
      %198 = memref.load %arg2[%c8_139] : memref<98xf32, #tpu.memory_space<smem>>
      %c57 = arith.constant 57 : index
      %199 = memref.load %arg2[%c57] : memref<98xf32, #tpu.memory_space<smem>>
      %200 = vector.extract_strided_slice %115 {offsets = [1, 1], sizes = [16, 16], strides = [1, 1]} : vector<22x22xf32> to vector<16x16xf32>
      %201 = vector.broadcast %198 : f32 to vector<16x16xf32>
      %202 = arith.mulf %201, %200 : vector<16x16xf32>
      %203 = arith.addf %197, %202 : vector<16x16xf32>
      %204 = vector.extract_strided_slice %116 {offsets = [1, 1], sizes = [16, 16], strides = [1, 1]} : vector<22x22xf32> to vector<16x16xf32>
      %205 = vector.broadcast %199 : f32 to vector<16x16xf32>
      %206 = arith.mulf %205, %204 : vector<16x16xf32>
      %207 = arith.addf %203, %206 : vector<16x16xf32>
      %c9_140 = arith.constant 9 : index
      %208 = memref.load %arg2[%c9_140] : memref<98xf32, #tpu.memory_space<smem>>
      %c58 = arith.constant 58 : index
      %209 = memref.load %arg2[%c58] : memref<98xf32, #tpu.memory_space<smem>>
      %210 = vector.extract_strided_slice %115 {offsets = [1, 2], sizes = [16, 16], strides = [1, 1]} : vector<22x22xf32> to vector<16x16xf32>
      %211 = vector.broadcast %208 : f32 to vector<16x16xf32>
      %212 = arith.mulf %211, %210 : vector<16x16xf32>
      %213 = arith.addf %207, %212 : vector<16x16xf32>
      %214 = vector.extract_strided_slice %116 {offsets = [1, 2], sizes = [16, 16], strides = [1, 1]} : vector<22x22xf32> to vector<16x16xf32>
      %215 = vector.broadcast %209 : f32 to vector<16x16xf32>
      %216 = arith.mulf %215, %214 : vector<16x16xf32>
      %217 = arith.addf %213, %216 : vector<16x16xf32>
      %c10_141 = arith.constant 10 : index
      %218 = memref.load %arg2[%c10_141] : memref<98xf32, #tpu.memory_space<smem>>
      %c59 = arith.constant 59 : index
      %219 = memref.load %arg2[%c59] : memref<98xf32, #tpu.memory_space<smem>>
      %220 = vector.extract_strided_slice %115 {offsets = [1, 3], sizes = [16, 16], strides = [1, 1]} : vector<22x22xf32> to vector<16x16xf32>
      %221 = vector.broadcast %218 : f32 to vector<16x16xf32>
      %222 = arith.mulf %221, %220 : vector<16x16xf32>
      %223 = arith.addf %217, %222 : vector<16x16xf32>
      %224 = vector.extract_strided_slice %116 {offsets = [1, 3], sizes = [16, 16], strides = [1, 1]} : vector<22x22xf32> to vector<16x16xf32>
      %225 = vector.broadcast %219 : f32 to vector<16x16xf32>
      %226 = arith.mulf %225, %224 : vector<16x16xf32>
      %227 = arith.addf %223, %226 : vector<16x16xf32>
      %c11_142 = arith.constant 11 : index
      %228 = memref.load %arg2[%c11_142] : memref<98xf32, #tpu.memory_space<smem>>
      %c60 = arith.constant 60 : index
      %229 = memref.load %arg2[%c60] : memref<98xf32, #tpu.memory_space<smem>>
      %230 = vector.extract_strided_slice %115 {offsets = [1, 4], sizes = [16, 16], strides = [1, 1]} : vector<22x22xf32> to vector<16x16xf32>
      %231 = vector.broadcast %228 : f32 to vector<16x16xf32>
      %232 = arith.mulf %231, %230 : vector<16x16xf32>
      %233 = arith.addf %227, %232 : vector<16x16xf32>
      %234 = vector.extract_strided_slice %116 {offsets = [1, 4], sizes = [16, 16], strides = [1, 1]} : vector<22x22xf32> to vector<16x16xf32>
      %235 = vector.broadcast %229 : f32 to vector<16x16xf32>
      %236 = arith.mulf %235, %234 : vector<16x16xf32>
      %237 = arith.addf %233, %236 : vector<16x16xf32>
      %c12_143 = arith.constant 12 : index
      %238 = memref.load %arg2[%c12_143] : memref<98xf32, #tpu.memory_space<smem>>
      %c61 = arith.constant 61 : index
      %239 = memref.load %arg2[%c61] : memref<98xf32, #tpu.memory_space<smem>>
      %240 = vector.extract_strided_slice %115 {offsets = [1, 5], sizes = [16, 16], strides = [1, 1]} : vector<22x22xf32> to vector<16x16xf32>
      %241 = vector.broadcast %238 : f32 to vector<16x16xf32>
      %242 = arith.mulf %241, %240 : vector<16x16xf32>
      %243 = arith.addf %237, %242 : vector<16x16xf32>
      %244 = vector.extract_strided_slice %116 {offsets = [1, 5], sizes = [16, 16], strides = [1, 1]} : vector<22x22xf32> to vector<16x16xf32>
      %245 = vector.broadcast %239 : f32 to vector<16x16xf32>
      %246 = arith.mulf %245, %244 : vector<16x16xf32>
      %247 = arith.addf %243, %246 : vector<16x16xf32>
      %c13_144 = arith.constant 13 : index
      %248 = memref.load %arg2[%c13_144] : memref<98xf32, #tpu.memory_space<smem>>
      %c62 = arith.constant 62 : index
      %249 = memref.load %arg2[%c62] : memref<98xf32, #tpu.memory_space<smem>>
      %250 = vector.extract_strided_slice %115 {offsets = [1, 6], sizes = [16, 16], strides = [1, 1]} : vector<22x22xf32> to vector<16x16xf32>
      %251 = vector.broadcast %248 : f32 to vector<16x16xf32>
      %252 = arith.mulf %251, %250 : vector<16x16xf32>
      %253 = arith.addf %247, %252 : vector<16x16xf32>
      %254 = vector.extract_strided_slice %116 {offsets = [1, 6], sizes = [16, 16], strides = [1, 1]} : vector<22x22xf32> to vector<16x16xf32>
      %255 = vector.broadcast %249 : f32 to vector<16x16xf32>
      %256 = arith.mulf %255, %254 : vector<16x16xf32>
      %257 = arith.addf %253, %256 : vector<16x16xf32>
      %c14_145 = arith.constant 14 : index
      %258 = memref.load %arg2[%c14_145] : memref<98xf32, #tpu.memory_space<smem>>
      %c63 = arith.constant 63 : index
      %259 = memref.load %arg2[%c63] : memref<98xf32, #tpu.memory_space<smem>>
      %260 = vector.extract_strided_slice %115 {offsets = [2, 0], sizes = [16, 16], strides = [1, 1]} : vector<22x22xf32> to vector<16x16xf32>
      %261 = vector.broadcast %258 : f32 to vector<16x16xf32>
      %262 = arith.mulf %261, %260 : vector<16x16xf32>
      %263 = arith.addf %257, %262 : vector<16x16xf32>
      %264 = vector.extract_strided_slice %116 {offsets = [2, 0], sizes = [16, 16], strides = [1, 1]} : vector<22x22xf32> to vector<16x16xf32>
      %265 = vector.broadcast %259 : f32 to vector<16x16xf32>
      %266 = arith.mulf %265, %264 : vector<16x16xf32>
      %267 = arith.addf %263, %266 : vector<16x16xf32>
      %c15_146 = arith.constant 15 : index
      %268 = memref.load %arg2[%c15_146] : memref<98xf32, #tpu.memory_space<smem>>
      %c64_147 = arith.constant 64 : index
      %269 = memref.load %arg2[%c64_147] : memref<98xf32, #tpu.memory_space<smem>>
      %270 = vector.extract_strided_slice %115 {offsets = [2, 1], sizes = [16, 16], strides = [1, 1]} : vector<22x22xf32> to vector<16x16xf32>
      %271 = vector.broadcast %268 : f32 to vector<16x16xf32>
      %272 = arith.mulf %271, %270 : vector<16x16xf32>
      %273 = arith.addf %267, %272 : vector<16x16xf32>
      %274 = vector.extract_strided_slice %116 {offsets = [2, 1], sizes = [16, 16], strides = [1, 1]} : vector<22x22xf32> to vector<16x16xf32>
      %275 = vector.broadcast %269 : f32 to vector<16x16xf32>
      %276 = arith.mulf %275, %274 : vector<16x16xf32>
      %277 = arith.addf %273, %276 : vector<16x16xf32>
      %c16_148 = arith.constant 16 : index
      %278 = memref.load %arg2[%c16_148] : memref<98xf32, #tpu.memory_space<smem>>
      %c65 = arith.constant 65 : index
      %279 = memref.load %arg2[%c65] : memref<98xf32, #tpu.memory_space<smem>>
      %280 = vector.extract_strided_slice %115 {offsets = [2, 2], sizes = [16, 16], strides = [1, 1]} : vector<22x22xf32> to vector<16x16xf32>
      %281 = vector.broadcast %278 : f32 to vector<16x16xf32>
      %282 = arith.mulf %281, %280 : vector<16x16xf32>
      %283 = arith.addf %277, %282 : vector<16x16xf32>
      %284 = vector.extract_strided_slice %116 {offsets = [2, 2], sizes = [16, 16], strides = [1, 1]} : vector<22x22xf32> to vector<16x16xf32>
      %285 = vector.broadcast %279 : f32 to vector<16x16xf32>
      %286 = arith.mulf %285, %284 : vector<16x16xf32>
      %287 = arith.addf %283, %286 : vector<16x16xf32>
      %c17_149 = arith.constant 17 : index
      %288 = memref.load %arg2[%c17_149] : memref<98xf32, #tpu.memory_space<smem>>
      %c66 = arith.constant 66 : index
      %289 = memref.load %arg2[%c66] : memref<98xf32, #tpu.memory_space<smem>>
      %290 = vector.extract_strided_slice %115 {offsets = [2, 3], sizes = [16, 16], strides = [1, 1]} : vector<22x22xf32> to vector<16x16xf32>
      %291 = vector.broadcast %288 : f32 to vector<16x16xf32>
      %292 = arith.mulf %291, %290 : vector<16x16xf32>
      %293 = arith.addf %287, %292 : vector<16x16xf32>
      %294 = vector.extract_strided_slice %116 {offsets = [2, 3], sizes = [16, 16], strides = [1, 1]} : vector<22x22xf32> to vector<16x16xf32>
      %295 = vector.broadcast %289 : f32 to vector<16x16xf32>
      %296 = arith.mulf %295, %294 : vector<16x16xf32>
      %297 = arith.addf %293, %296 : vector<16x16xf32>
      %c18_150 = arith.constant 18 : index
      %298 = memref.load %arg2[%c18_150] : memref<98xf32, #tpu.memory_space<smem>>
      %c67 = arith.constant 67 : index
      %299 = memref.load %arg2[%c67] : memref<98xf32, #tpu.memory_space<smem>>
      %300 = vector.extract_strided_slice %115 {offsets = [2, 4], sizes = [16, 16], strides = [1, 1]} : vector<22x22xf32> to vector<16x16xf32>
      %301 = vector.broadcast %298 : f32 to vector<16x16xf32>
      %302 = arith.mulf %301, %300 : vector<16x16xf32>
      %303 = arith.addf %297, %302 : vector<16x16xf32>
      %304 = vector.extract_strided_slice %116 {offsets = [2, 4], sizes = [16, 16], strides = [1, 1]} : vector<22x22xf32> to vector<16x16xf32>
      %305 = vector.broadcast %299 : f32 to vector<16x16xf32>
      %306 = arith.mulf %305, %304 : vector<16x16xf32>
      %307 = arith.addf %303, %306 : vector<16x16xf32>
      %c19 = arith.constant 19 : index
      %308 = memref.load %arg2[%c19] : memref<98xf32, #tpu.memory_space<smem>>
      %c68 = arith.constant 68 : index
      %309 = memref.load %arg2[%c68] : memref<98xf32, #tpu.memory_space<smem>>
      %310 = vector.extract_strided_slice %115 {offsets = [2, 5], sizes = [16, 16], strides = [1, 1]} : vector<22x22xf32> to vector<16x16xf32>
      %311 = vector.broadcast %308 : f32 to vector<16x16xf32>
      %312 = arith.mulf %311, %310 : vector<16x16xf32>
      %313 = arith.addf %307, %312 : vector<16x16xf32>
      %314 = vector.extract_strided_slice %116 {offsets = [2, 5], sizes = [16, 16], strides = [1, 1]} : vector<22x22xf32> to vector<16x16xf32>
      %315 = vector.broadcast %309 : f32 to vector<16x16xf32>
      %316 = arith.mulf %315, %314 : vector<16x16xf32>
      %317 = arith.addf %313, %316 : vector<16x16xf32>
      %c20 = arith.constant 20 : index
      %318 = memref.load %arg2[%c20] : memref<98xf32, #tpu.memory_space<smem>>
      %c69 = arith.constant 69 : index
      %319 = memref.load %arg2[%c69] : memref<98xf32, #tpu.memory_space<smem>>
      %320 = vector.extract_strided_slice %115 {offsets = [2, 6], sizes = [16, 16], strides = [1, 1]} : vector<22x22xf32> to vector<16x16xf32>
      %321 = vector.broadcast %318 : f32 to vector<16x16xf32>
      %322 = arith.mulf %321, %320 : vector<16x16xf32>
      %323 = arith.addf %317, %322 : vector<16x16xf32>
      %324 = vector.extract_strided_slice %116 {offsets = [2, 6], sizes = [16, 16], strides = [1, 1]} : vector<22x22xf32> to vector<16x16xf32>
      %325 = vector.broadcast %319 : f32 to vector<16x16xf32>
      %326 = arith.mulf %325, %324 : vector<16x16xf32>
      %327 = arith.addf %323, %326 : vector<16x16xf32>
      %c21 = arith.constant 21 : index
      %328 = memref.load %arg2[%c21] : memref<98xf32, #tpu.memory_space<smem>>
      %c70 = arith.constant 70 : index
      %329 = memref.load %arg2[%c70] : memref<98xf32, #tpu.memory_space<smem>>
      %330 = vector.extract_strided_slice %115 {offsets = [3, 0], sizes = [16, 16], strides = [1, 1]} : vector<22x22xf32> to vector<16x16xf32>
      %331 = vector.broadcast %328 : f32 to vector<16x16xf32>
      %332 = arith.mulf %331, %330 : vector<16x16xf32>
      %333 = arith.addf %327, %332 : vector<16x16xf32>
      %334 = vector.extract_strided_slice %116 {offsets = [3, 0], sizes = [16, 16], strides = [1, 1]} : vector<22x22xf32> to vector<16x16xf32>
      %335 = vector.broadcast %329 : f32 to vector<16x16xf32>
      %336 = arith.mulf %335, %334 : vector<16x16xf32>
      %337 = arith.addf %333, %336 : vector<16x16xf32>
      %c22 = arith.constant 22 : index
      %338 = memref.load %arg2[%c22] : memref<98xf32, #tpu.memory_space<smem>>
      %c71 = arith.constant 71 : index
      %339 = memref.load %arg2[%c71] : memref<98xf32, #tpu.memory_space<smem>>
      %340 = vector.extract_strided_slice %115 {offsets = [3, 1], sizes = [16, 16], strides = [1, 1]} : vector<22x22xf32> to vector<16x16xf32>
      %341 = vector.broadcast %338 : f32 to vector<16x16xf32>
      %342 = arith.mulf %341, %340 : vector<16x16xf32>
      %343 = arith.addf %337, %342 : vector<16x16xf32>
      %344 = vector.extract_strided_slice %116 {offsets = [3, 1], sizes = [16, 16], strides = [1, 1]} : vector<22x22xf32> to vector<16x16xf32>
      %345 = vector.broadcast %339 : f32 to vector<16x16xf32>
      %346 = arith.mulf %345, %344 : vector<16x16xf32>
      %347 = arith.addf %343, %346 : vector<16x16xf32>
      %c23 = arith.constant 23 : index
      %348 = memref.load %arg2[%c23] : memref<98xf32, #tpu.memory_space<smem>>
      %c72 = arith.constant 72 : index
      %349 = memref.load %arg2[%c72] : memref<98xf32, #tpu.memory_space<smem>>
      %350 = vector.extract_strided_slice %115 {offsets = [3, 2], sizes = [16, 16], strides = [1, 1]} : vector<22x22xf32> to vector<16x16xf32>
      %351 = vector.broadcast %348 : f32 to vector<16x16xf32>
      %352 = arith.mulf %351, %350 : vector<16x16xf32>
      %353 = arith.addf %347, %352 : vector<16x16xf32>
      %354 = vector.extract_strided_slice %116 {offsets = [3, 2], sizes = [16, 16], strides = [1, 1]} : vector<22x22xf32> to vector<16x16xf32>
      %355 = vector.broadcast %349 : f32 to vector<16x16xf32>
      %356 = arith.mulf %355, %354 : vector<16x16xf32>
      %357 = arith.addf %353, %356 : vector<16x16xf32>
      %c24 = arith.constant 24 : index
      %358 = memref.load %arg2[%c24] : memref<98xf32, #tpu.memory_space<smem>>
      %c73 = arith.constant 73 : index
      %359 = memref.load %arg2[%c73] : memref<98xf32, #tpu.memory_space<smem>>
      %360 = vector.extract_strided_slice %115 {offsets = [3, 3], sizes = [16, 16], strides = [1, 1]} : vector<22x22xf32> to vector<16x16xf32>
      %361 = vector.broadcast %358 : f32 to vector<16x16xf32>
      %362 = arith.mulf %361, %360 : vector<16x16xf32>
      %363 = arith.addf %357, %362 : vector<16x16xf32>
      %364 = vector.extract_strided_slice %116 {offsets = [3, 3], sizes = [16, 16], strides = [1, 1]} : vector<22x22xf32> to vector<16x16xf32>
      %365 = vector.broadcast %359 : f32 to vector<16x16xf32>
      %366 = arith.mulf %365, %364 : vector<16x16xf32>
      %367 = arith.addf %363, %366 : vector<16x16xf32>
      %c25 = arith.constant 25 : index
      %368 = memref.load %arg2[%c25] : memref<98xf32, #tpu.memory_space<smem>>
      %c74 = arith.constant 74 : index
      %369 = memref.load %arg2[%c74] : memref<98xf32, #tpu.memory_space<smem>>
      %370 = vector.extract_strided_slice %115 {offsets = [3, 4], sizes = [16, 16], strides = [1, 1]} : vector<22x22xf32> to vector<16x16xf32>
      %371 = vector.broadcast %368 : f32 to vector<16x16xf32>
      %372 = arith.mulf %371, %370 : vector<16x16xf32>
      %373 = arith.addf %367, %372 : vector<16x16xf32>
      %374 = vector.extract_strided_slice %116 {offsets = [3, 4], sizes = [16, 16], strides = [1, 1]} : vector<22x22xf32> to vector<16x16xf32>
      %375 = vector.broadcast %369 : f32 to vector<16x16xf32>
      %376 = arith.mulf %375, %374 : vector<16x16xf32>
      %377 = arith.addf %373, %376 : vector<16x16xf32>
      %c26 = arith.constant 26 : index
      %378 = memref.load %arg2[%c26] : memref<98xf32, #tpu.memory_space<smem>>
      %c75 = arith.constant 75 : index
      %379 = memref.load %arg2[%c75] : memref<98xf32, #tpu.memory_space<smem>>
      %380 = vector.extract_strided_slice %115 {offsets = [3, 5], sizes = [16, 16], strides = [1, 1]} : vector<22x22xf32> to vector<16x16xf32>
      %381 = vector.broadcast %378 : f32 to vector<16x16xf32>
      %382 = arith.mulf %381, %380 : vector<16x16xf32>
      %383 = arith.addf %377, %382 : vector<16x16xf32>
      %384 = vector.extract_strided_slice %116 {offsets = [3, 5], sizes = [16, 16], strides = [1, 1]} : vector<22x22xf32> to vector<16x16xf32>
      %385 = vector.broadcast %379 : f32 to vector<16x16xf32>
      %386 = arith.mulf %385, %384 : vector<16x16xf32>
      %387 = arith.addf %383, %386 : vector<16x16xf32>
      %c27 = arith.constant 27 : index
      %388 = memref.load %arg2[%c27] : memref<98xf32, #tpu.memory_space<smem>>
      %c76 = arith.constant 76 : index
      %389 = memref.load %arg2[%c76] : memref<98xf32, #tpu.memory_space<smem>>
      %390 = vector.extract_strided_slice %115 {offsets = [3, 6], sizes = [16, 16], strides = [1, 1]} : vector<22x22xf32> to vector<16x16xf32>
      %391 = vector.broadcast %388 : f32 to vector<16x16xf32>
      %392 = arith.mulf %391, %390 : vector<16x16xf32>
      %393 = arith.addf %387, %392 : vector<16x16xf32>
      %394 = vector.extract_strided_slice %116 {offsets = [3, 6], sizes = [16, 16], strides = [1, 1]} : vector<22x22xf32> to vector<16x16xf32>
      %395 = vector.broadcast %389 : f32 to vector<16x16xf32>
      %396 = arith.mulf %395, %394 : vector<16x16xf32>
      %397 = arith.addf %393, %396 : vector<16x16xf32>
      %c28 = arith.constant 28 : index
      %398 = memref.load %arg2[%c28] : memref<98xf32, #tpu.memory_space<smem>>
      %c77 = arith.constant 77 : index
      %399 = memref.load %arg2[%c77] : memref<98xf32, #tpu.memory_space<smem>>
      %400 = vector.extract_strided_slice %115 {offsets = [4, 0], sizes = [16, 16], strides = [1, 1]} : vector<22x22xf32> to vector<16x16xf32>
      %401 = vector.broadcast %398 : f32 to vector<16x16xf32>
      %402 = arith.mulf %401, %400 : vector<16x16xf32>
      %403 = arith.addf %397, %402 : vector<16x16xf32>
      %404 = vector.extract_strided_slice %116 {offsets = [4, 0], sizes = [16, 16], strides = [1, 1]} : vector<22x22xf32> to vector<16x16xf32>
      %405 = vector.broadcast %399 : f32 to vector<16x16xf32>
      %406 = arith.mulf %405, %404 : vector<16x16xf32>
      %407 = arith.addf %403, %406 : vector<16x16xf32>
      %c29 = arith.constant 29 : index
      %408 = memref.load %arg2[%c29] : memref<98xf32, #tpu.memory_space<smem>>
      %c78 = arith.constant 78 : index
      %409 = memref.load %arg2[%c78] : memref<98xf32, #tpu.memory_space<smem>>
      %410 = vector.extract_strided_slice %115 {offsets = [4, 1], sizes = [16, 16], strides = [1, 1]} : vector<22x22xf32> to vector<16x16xf32>
      %411 = vector.broadcast %408 : f32 to vector<16x16xf32>
      %412 = arith.mulf %411, %410 : vector<16x16xf32>
      %413 = arith.addf %407, %412 : vector<16x16xf32>
      %414 = vector.extract_strided_slice %116 {offsets = [4, 1], sizes = [16, 16], strides = [1, 1]} : vector<22x22xf32> to vector<16x16xf32>
      %415 = vector.broadcast %409 : f32 to vector<16x16xf32>
      %416 = arith.mulf %415, %414 : vector<16x16xf32>
      %417 = arith.addf %413, %416 : vector<16x16xf32>
      %c30 = arith.constant 30 : index
      %418 = memref.load %arg2[%c30] : memref<98xf32, #tpu.memory_space<smem>>
      %c79 = arith.constant 79 : index
      %419 = memref.load %arg2[%c79] : memref<98xf32, #tpu.memory_space<smem>>
      %420 = vector.extract_strided_slice %115 {offsets = [4, 2], sizes = [16, 16], strides = [1, 1]} : vector<22x22xf32> to vector<16x16xf32>
      %421 = vector.broadcast %418 : f32 to vector<16x16xf32>
      %422 = arith.mulf %421, %420 : vector<16x16xf32>
      %423 = arith.addf %417, %422 : vector<16x16xf32>
      %424 = vector.extract_strided_slice %116 {offsets = [4, 2], sizes = [16, 16], strides = [1, 1]} : vector<22x22xf32> to vector<16x16xf32>
      %425 = vector.broadcast %419 : f32 to vector<16x16xf32>
      %426 = arith.mulf %425, %424 : vector<16x16xf32>
      %427 = arith.addf %423, %426 : vector<16x16xf32>
      %c31 = arith.constant 31 : index
      %428 = memref.load %arg2[%c31] : memref<98xf32, #tpu.memory_space<smem>>
      %c80_151 = arith.constant 80 : index
      %429 = memref.load %arg2[%c80_151] : memref<98xf32, #tpu.memory_space<smem>>
      %430 = vector.extract_strided_slice %115 {offsets = [4, 3], sizes = [16, 16], strides = [1, 1]} : vector<22x22xf32> to vector<16x16xf32>
      %431 = vector.broadcast %428 : f32 to vector<16x16xf32>
      %432 = arith.mulf %431, %430 : vector<16x16xf32>
      %433 = arith.addf %427, %432 : vector<16x16xf32>
      %434 = vector.extract_strided_slice %116 {offsets = [4, 3], sizes = [16, 16], strides = [1, 1]} : vector<22x22xf32> to vector<16x16xf32>
      %435 = vector.broadcast %429 : f32 to vector<16x16xf32>
      %436 = arith.mulf %435, %434 : vector<16x16xf32>
      %437 = arith.addf %433, %436 : vector<16x16xf32>
      %c32_152 = arith.constant 32 : index
      %438 = memref.load %arg2[%c32_152] : memref<98xf32, #tpu.memory_space<smem>>
      %c81 = arith.constant 81 : index
      %439 = memref.load %arg2[%c81] : memref<98xf32, #tpu.memory_space<smem>>
      %440 = vector.extract_strided_slice %115 {offsets = [4, 4], sizes = [16, 16], strides = [1, 1]} : vector<22x22xf32> to vector<16x16xf32>
      %441 = vector.broadcast %438 : f32 to vector<16x16xf32>
      %442 = arith.mulf %441, %440 : vector<16x16xf32>
      %443 = arith.addf %437, %442 : vector<16x16xf32>
      %444 = vector.extract_strided_slice %116 {offsets = [4, 4], sizes = [16, 16], strides = [1, 1]} : vector<22x22xf32> to vector<16x16xf32>
      %445 = vector.broadcast %439 : f32 to vector<16x16xf32>
      %446 = arith.mulf %445, %444 : vector<16x16xf32>
      %447 = arith.addf %443, %446 : vector<16x16xf32>
      %c33 = arith.constant 33 : index
      %448 = memref.load %arg2[%c33] : memref<98xf32, #tpu.memory_space<smem>>
      %c82 = arith.constant 82 : index
      %449 = memref.load %arg2[%c82] : memref<98xf32, #tpu.memory_space<smem>>
      %450 = vector.extract_strided_slice %115 {offsets = [4, 5], sizes = [16, 16], strides = [1, 1]} : vector<22x22xf32> to vector<16x16xf32>
      %451 = vector.broadcast %448 : f32 to vector<16x16xf32>
      %452 = arith.mulf %451, %450 : vector<16x16xf32>
      %453 = arith.addf %447, %452 : vector<16x16xf32>
      %454 = vector.extract_strided_slice %116 {offsets = [4, 5], sizes = [16, 16], strides = [1, 1]} : vector<22x22xf32> to vector<16x16xf32>
      %455 = vector.broadcast %449 : f32 to vector<16x16xf32>
      %456 = arith.mulf %455, %454 : vector<16x16xf32>
      %457 = arith.addf %453, %456 : vector<16x16xf32>
      %c34 = arith.constant 34 : index
      %458 = memref.load %arg2[%c34] : memref<98xf32, #tpu.memory_space<smem>>
      %c83 = arith.constant 83 : index
      %459 = memref.load %arg2[%c83] : memref<98xf32, #tpu.memory_space<smem>>
      %460 = vector.extract_strided_slice %115 {offsets = [4, 6], sizes = [16, 16], strides = [1, 1]} : vector<22x22xf32> to vector<16x16xf32>
      %461 = vector.broadcast %458 : f32 to vector<16x16xf32>
      %462 = arith.mulf %461, %460 : vector<16x16xf32>
      %463 = arith.addf %457, %462 : vector<16x16xf32>
      %464 = vector.extract_strided_slice %116 {offsets = [4, 6], sizes = [16, 16], strides = [1, 1]} : vector<22x22xf32> to vector<16x16xf32>
      %465 = vector.broadcast %459 : f32 to vector<16x16xf32>
      %466 = arith.mulf %465, %464 : vector<16x16xf32>
      %467 = arith.addf %463, %466 : vector<16x16xf32>
      %c35 = arith.constant 35 : index
      %468 = memref.load %arg2[%c35] : memref<98xf32, #tpu.memory_space<smem>>
      %c84 = arith.constant 84 : index
      %469 = memref.load %arg2[%c84] : memref<98xf32, #tpu.memory_space<smem>>
      %470 = vector.extract_strided_slice %115 {offsets = [5, 0], sizes = [16, 16], strides = [1, 1]} : vector<22x22xf32> to vector<16x16xf32>
      %471 = vector.broadcast %468 : f32 to vector<16x16xf32>
      %472 = arith.mulf %471, %470 : vector<16x16xf32>
      %473 = arith.addf %467, %472 : vector<16x16xf32>
      %474 = vector.extract_strided_slice %116 {offsets = [5, 0], sizes = [16, 16], strides = [1, 1]} : vector<22x22xf32> to vector<16x16xf32>
      %475 = vector.broadcast %469 : f32 to vector<16x16xf32>
      %476 = arith.mulf %475, %474 : vector<16x16xf32>
      %477 = arith.addf %473, %476 : vector<16x16xf32>
      %c36 = arith.constant 36 : index
      %478 = memref.load %arg2[%c36] : memref<98xf32, #tpu.memory_space<smem>>
      %c85 = arith.constant 85 : index
      %479 = memref.load %arg2[%c85] : memref<98xf32, #tpu.memory_space<smem>>
      %480 = vector.extract_strided_slice %115 {offsets = [5, 1], sizes = [16, 16], strides = [1, 1]} : vector<22x22xf32> to vector<16x16xf32>
      %481 = vector.broadcast %478 : f32 to vector<16x16xf32>
      %482 = arith.mulf %481, %480 : vector<16x16xf32>
      %483 = arith.addf %477, %482 : vector<16x16xf32>
      %484 = vector.extract_strided_slice %116 {offsets = [5, 1], sizes = [16, 16], strides = [1, 1]} : vector<22x22xf32> to vector<16x16xf32>
      %485 = vector.broadcast %479 : f32 to vector<16x16xf32>
      %486 = arith.mulf %485, %484 : vector<16x16xf32>
      %487 = arith.addf %483, %486 : vector<16x16xf32>
      %c37 = arith.constant 37 : index
      %488 = memref.load %arg2[%c37] : memref<98xf32, #tpu.memory_space<smem>>
      %c86 = arith.constant 86 : index
      %489 = memref.load %arg2[%c86] : memref<98xf32, #tpu.memory_space<smem>>
      %490 = vector.extract_strided_slice %115 {offsets = [5, 2], sizes = [16, 16], strides = [1, 1]} : vector<22x22xf32> to vector<16x16xf32>
      %491 = vector.broadcast %488 : f32 to vector<16x16xf32>
      %492 = arith.mulf %491, %490 : vector<16x16xf32>
      %493 = arith.addf %487, %492 : vector<16x16xf32>
      %494 = vector.extract_strided_slice %116 {offsets = [5, 2], sizes = [16, 16], strides = [1, 1]} : vector<22x22xf32> to vector<16x16xf32>
      %495 = vector.broadcast %489 : f32 to vector<16x16xf32>
      %496 = arith.mulf %495, %494 : vector<16x16xf32>
      %497 = arith.addf %493, %496 : vector<16x16xf32>
      %c38 = arith.constant 38 : index
      %498 = memref.load %arg2[%c38] : memref<98xf32, #tpu.memory_space<smem>>
      %c87 = arith.constant 87 : index
      %499 = memref.load %arg2[%c87] : memref<98xf32, #tpu.memory_space<smem>>
      %500 = vector.extract_strided_slice %115 {offsets = [5, 3], sizes = [16, 16], strides = [1, 1]} : vector<22x22xf32> to vector<16x16xf32>
      %501 = vector.broadcast %498 : f32 to vector<16x16xf32>
      %502 = arith.mulf %501, %500 : vector<16x16xf32>
      %503 = arith.addf %497, %502 : vector<16x16xf32>
      %504 = vector.extract_strided_slice %116 {offsets = [5, 3], sizes = [16, 16], strides = [1, 1]} : vector<22x22xf32> to vector<16x16xf32>
      %505 = vector.broadcast %499 : f32 to vector<16x16xf32>
      %506 = arith.mulf %505, %504 : vector<16x16xf32>
      %507 = arith.addf %503, %506 : vector<16x16xf32>
      %c39 = arith.constant 39 : index
      %508 = memref.load %arg2[%c39] : memref<98xf32, #tpu.memory_space<smem>>
      %c88 = arith.constant 88 : index
      %509 = memref.load %arg2[%c88] : memref<98xf32, #tpu.memory_space<smem>>
      %510 = vector.extract_strided_slice %115 {offsets = [5, 4], sizes = [16, 16], strides = [1, 1]} : vector<22x22xf32> to vector<16x16xf32>
      %511 = vector.broadcast %508 : f32 to vector<16x16xf32>
      %512 = arith.mulf %511, %510 : vector<16x16xf32>
      %513 = arith.addf %507, %512 : vector<16x16xf32>
      %514 = vector.extract_strided_slice %116 {offsets = [5, 4], sizes = [16, 16], strides = [1, 1]} : vector<22x22xf32> to vector<16x16xf32>
      %515 = vector.broadcast %509 : f32 to vector<16x16xf32>
      %516 = arith.mulf %515, %514 : vector<16x16xf32>
      %517 = arith.addf %513, %516 : vector<16x16xf32>
      %c40 = arith.constant 40 : index
      %518 = memref.load %arg2[%c40] : memref<98xf32, #tpu.memory_space<smem>>
      %c89 = arith.constant 89 : index
      %519 = memref.load %arg2[%c89] : memref<98xf32, #tpu.memory_space<smem>>
      %520 = vector.extract_strided_slice %115 {offsets = [5, 5], sizes = [16, 16], strides = [1, 1]} : vector<22x22xf32> to vector<16x16xf32>
      %521 = vector.broadcast %518 : f32 to vector<16x16xf32>
      %522 = arith.mulf %521, %520 : vector<16x16xf32>
      %523 = arith.addf %517, %522 : vector<16x16xf32>
      %524 = vector.extract_strided_slice %116 {offsets = [5, 5], sizes = [16, 16], strides = [1, 1]} : vector<22x22xf32> to vector<16x16xf32>
      %525 = vector.broadcast %519 : f32 to vector<16x16xf32>
      %526 = arith.mulf %525, %524 : vector<16x16xf32>
      %527 = arith.addf %523, %526 : vector<16x16xf32>
      %c41 = arith.constant 41 : index
      %528 = memref.load %arg2[%c41] : memref<98xf32, #tpu.memory_space<smem>>
      %c90 = arith.constant 90 : index
      %529 = memref.load %arg2[%c90] : memref<98xf32, #tpu.memory_space<smem>>
      %530 = vector.extract_strided_slice %115 {offsets = [5, 6], sizes = [16, 16], strides = [1, 1]} : vector<22x22xf32> to vector<16x16xf32>
      %531 = vector.broadcast %528 : f32 to vector<16x16xf32>
      %532 = arith.mulf %531, %530 : vector<16x16xf32>
      %533 = arith.addf %527, %532 : vector<16x16xf32>
      %534 = vector.extract_strided_slice %116 {offsets = [5, 6], sizes = [16, 16], strides = [1, 1]} : vector<22x22xf32> to vector<16x16xf32>
      %535 = vector.broadcast %529 : f32 to vector<16x16xf32>
      %536 = arith.mulf %535, %534 : vector<16x16xf32>
      %537 = arith.addf %533, %536 : vector<16x16xf32>
      %c42 = arith.constant 42 : index
      %538 = memref.load %arg2[%c42] : memref<98xf32, #tpu.memory_space<smem>>
      %c91 = arith.constant 91 : index
      %539 = memref.load %arg2[%c91] : memref<98xf32, #tpu.memory_space<smem>>
      %540 = vector.extract_strided_slice %115 {offsets = [6, 0], sizes = [16, 16], strides = [1, 1]} : vector<22x22xf32> to vector<16x16xf32>
      %541 = vector.broadcast %538 : f32 to vector<16x16xf32>
      %542 = arith.mulf %541, %540 : vector<16x16xf32>
      %543 = arith.addf %537, %542 : vector<16x16xf32>
      %544 = vector.extract_strided_slice %116 {offsets = [6, 0], sizes = [16, 16], strides = [1, 1]} : vector<22x22xf32> to vector<16x16xf32>
      %545 = vector.broadcast %539 : f32 to vector<16x16xf32>
      %546 = arith.mulf %545, %544 : vector<16x16xf32>
      %547 = arith.addf %543, %546 : vector<16x16xf32>
      %c43 = arith.constant 43 : index
      %548 = memref.load %arg2[%c43] : memref<98xf32, #tpu.memory_space<smem>>
      %c92 = arith.constant 92 : index
      %549 = memref.load %arg2[%c92] : memref<98xf32, #tpu.memory_space<smem>>
      %550 = vector.extract_strided_slice %115 {offsets = [6, 1], sizes = [16, 16], strides = [1, 1]} : vector<22x22xf32> to vector<16x16xf32>
      %551 = vector.broadcast %548 : f32 to vector<16x16xf32>
      %552 = arith.mulf %551, %550 : vector<16x16xf32>
      %553 = arith.addf %547, %552 : vector<16x16xf32>
      %554 = vector.extract_strided_slice %116 {offsets = [6, 1], sizes = [16, 16], strides = [1, 1]} : vector<22x22xf32> to vector<16x16xf32>
      %555 = vector.broadcast %549 : f32 to vector<16x16xf32>
      %556 = arith.mulf %555, %554 : vector<16x16xf32>
      %557 = arith.addf %553, %556 : vector<16x16xf32>
      %c44 = arith.constant 44 : index
      %558 = memref.load %arg2[%c44] : memref<98xf32, #tpu.memory_space<smem>>
      %c93 = arith.constant 93 : index
      %559 = memref.load %arg2[%c93] : memref<98xf32, #tpu.memory_space<smem>>
      %560 = vector.extract_strided_slice %115 {offsets = [6, 2], sizes = [16, 16], strides = [1, 1]} : vector<22x22xf32> to vector<16x16xf32>
      %561 = vector.broadcast %558 : f32 to vector<16x16xf32>
      %562 = arith.mulf %561, %560 : vector<16x16xf32>
      %563 = arith.addf %557, %562 : vector<16x16xf32>
      %564 = vector.extract_strided_slice %116 {offsets = [6, 2], sizes = [16, 16], strides = [1, 1]} : vector<22x22xf32> to vector<16x16xf32>
      %565 = vector.broadcast %559 : f32 to vector<16x16xf32>
      %566 = arith.mulf %565, %564 : vector<16x16xf32>
      %567 = arith.addf %563, %566 : vector<16x16xf32>
      %c45 = arith.constant 45 : index
      %568 = memref.load %arg2[%c45] : memref<98xf32, #tpu.memory_space<smem>>
      %c94 = arith.constant 94 : index
      %569 = memref.load %arg2[%c94] : memref<98xf32, #tpu.memory_space<smem>>
      %570 = vector.extract_strided_slice %115 {offsets = [6, 3], sizes = [16, 16], strides = [1, 1]} : vector<22x22xf32> to vector<16x16xf32>
      %571 = vector.broadcast %568 : f32 to vector<16x16xf32>
      %572 = arith.mulf %571, %570 : vector<16x16xf32>
      %573 = arith.addf %567, %572 : vector<16x16xf32>
      %574 = vector.extract_strided_slice %116 {offsets = [6, 3], sizes = [16, 16], strides = [1, 1]} : vector<22x22xf32> to vector<16x16xf32>
      %575 = vector.broadcast %569 : f32 to vector<16x16xf32>
      %576 = arith.mulf %575, %574 : vector<16x16xf32>
      %577 = arith.addf %573, %576 : vector<16x16xf32>
      %c46 = arith.constant 46 : index
      %578 = memref.load %arg2[%c46] : memref<98xf32, #tpu.memory_space<smem>>
      %c95 = arith.constant 95 : index
      %579 = memref.load %arg2[%c95] : memref<98xf32, #tpu.memory_space<smem>>
      %580 = vector.extract_strided_slice %115 {offsets = [6, 4], sizes = [16, 16], strides = [1, 1]} : vector<22x22xf32> to vector<16x16xf32>
      %581 = vector.broadcast %578 : f32 to vector<16x16xf32>
      %582 = arith.mulf %581, %580 : vector<16x16xf32>
      %583 = arith.addf %577, %582 : vector<16x16xf32>
      %584 = vector.extract_strided_slice %116 {offsets = [6, 4], sizes = [16, 16], strides = [1, 1]} : vector<22x22xf32> to vector<16x16xf32>
      %585 = vector.broadcast %579 : f32 to vector<16x16xf32>
      %586 = arith.mulf %585, %584 : vector<16x16xf32>
      %587 = arith.addf %583, %586 : vector<16x16xf32>
      %c47 = arith.constant 47 : index
      %588 = memref.load %arg2[%c47] : memref<98xf32, #tpu.memory_space<smem>>
      %c96_153 = arith.constant 96 : index
      %589 = memref.load %arg2[%c96_153] : memref<98xf32, #tpu.memory_space<smem>>
      %590 = vector.extract_strided_slice %115 {offsets = [6, 5], sizes = [16, 16], strides = [1, 1]} : vector<22x22xf32> to vector<16x16xf32>
      %591 = vector.broadcast %588 : f32 to vector<16x16xf32>
      %592 = arith.mulf %591, %590 : vector<16x16xf32>
      %593 = arith.addf %587, %592 : vector<16x16xf32>
      %594 = vector.extract_strided_slice %116 {offsets = [6, 5], sizes = [16, 16], strides = [1, 1]} : vector<22x22xf32> to vector<16x16xf32>
      %595 = vector.broadcast %589 : f32 to vector<16x16xf32>
      %596 = arith.mulf %595, %594 : vector<16x16xf32>
      %597 = arith.addf %593, %596 : vector<16x16xf32>
      %c48_154 = arith.constant 48 : index
      %598 = memref.load %arg2[%c48_154] : memref<98xf32, #tpu.memory_space<smem>>
      %c97 = arith.constant 97 : index
      %599 = memref.load %arg2[%c97] : memref<98xf32, #tpu.memory_space<smem>>
      %600 = vector.extract_strided_slice %115 {offsets = [6, 6], sizes = [16, 16], strides = [1, 1]} : vector<22x22xf32> to vector<16x16xf32>
      %601 = vector.broadcast %598 : f32 to vector<16x16xf32>
      %602 = arith.mulf %601, %600 : vector<16x16xf32>
      %603 = arith.addf %597, %602 : vector<16x16xf32>
      %604 = vector.extract_strided_slice %116 {offsets = [6, 6], sizes = [16, 16], strides = [1, 1]} : vector<22x22xf32> to vector<16x16xf32>
      %605 = vector.broadcast %599 : f32 to vector<16x16xf32>
      %606 = arith.mulf %605, %604 : vector<16x16xf32>
      %607 = arith.addf %603, %606 : vector<16x16xf32>
      %608 = arith.negf %607 : vector<16x16xf32>
      %609 = math.exp %608 : vector<16x16xf32>
      %cst_155 = arith.constant 1.000000e+00 : f32
      %610 = vector.broadcast %cst_155 : f32 to vector<16x16xf32>
      %611 = arith.addf %610, %609 : vector<16x16xf32>
      %612 = arith.divf %610, %611 : vector<16x16xf32>
      %613 = vector.shape_cast %612 : vector<16x16xf32> to vector<1x1x16x16xf32>
      %c0_156 = arith.constant 0 : index
      %c0_157 = arith.constant 0 : index
      %c0_158 = arith.constant 0 : index
      %c0_159 = arith.constant 0 : index
      %614 = vector.load %arg4[%c0_156, %c0_157, %c0_158, %c0_159] : memref<1x1x16x16xf32, #tpu.memory_space<vmem>>, vector<1x1x16x16xf32>
      tpu.vector_store %arg4[%c0_156, %c0_157, %c0_158, %c0_159], %613 {strides = array<i32>} : memref<1x1x16x16xf32, #tpu.memory_space<vmem>>, vector<1x1x16x16xf32>,
    } else {
    }
    return
  }
  func.func @transform_0(%arg0: i32, %arg1: i32) -> i32 {
    %c0_i32 = arith.constant 0 : i32
    %c0_i32_0 = arith.constant 0 : i32
    return %c0_i32 : i32
  }
  func.func @transform_1(%arg0: i32, %arg1: i32) -> (i32, i32, i32) {
    %c0_i32 = arith.constant 0 : i32
    %c0_i32_0 = arith.constant 0 : i32
    return %arg0, %arg1, %c0_i32 : i32, i32, i32
  }
  func.func @transform_2(%arg0: i32, %arg1: i32) -> (i32, i32, i32, i32) {
    %c0_i32 = arith.constant 0 : i32
    %c0_i32_0 = arith.constant 0 : i32
    %c0_i32_1 = arith.constant 0 : i32
    %c0_i32_2 = arith.constant 0 : i32
    return %arg0, %c0_i32, %c0_i32_0, %c0_i32_1 : i32, i32, i32, i32
  }
}

</mosaic_0001>

<bundles_post_ra>
// kernel: tpu_custom_call.1
= control target key start
LH: loop header
LB: loop body
LE: loop exit
PB: predicated region body
PF: predicated region fallthrough
CT: control target
= control target key end

     0   :  { %7 = vsyncpa [#allocation9], 0  ;;  %s5276_s0 = inlined_call_operand.hbm [shape: f32[98], index: 0, kind: input, shape index: {}]   ;;  %s5277_s1 = inlined_call_operand.hbm [shape: f32[2,4,256], index: 1, kind: input, shape index: {}]   ;;  %s5278_s2 = inlined_call_operand.hbm [shape: f32[2,1,16,16], index: 2, kind: output, shape index: {}]  }
   0x1   :  { %8 = vsyncpa [#allocation7], 0 }
   0x2   :  { %10 = vsyncpa [#allocation7 + $0x1], 0 }
   0x3   :  { %11 = vsyncpa [#allocation8], 0 }
   0x4   :  { %13 = vsyncpa [#allocation8 + $0x1], 0  ;;  %s3104_s9 = smov 0   ;;  %s3106_s10 = smov 0  }
   0x5   :  { %s3108_s11 = smov 0   ;;  %s3110_s12 = smov 0  }
   0x6   :  { %s3112_s13 = smov 0   ;;  %s3114_s14 = smov 0  }
   0x7 LB: > { %s2697_s15 = sadd.s32 4294967295, %s3066_s14   ;;  %s2698_s16 = sadd.s32 4294967294, %s3066_s14   ;;  %s3066_s14 = sphi %s3114_s14, %s19_s14   ;;  %s3062_s13 = sphi %s3112_s13, %s5305_s13   ;;  %s3058_s12 = sphi %s3110_s12, %s5304_s12   ;;  %s3054_s11 = sphi %s3108_s11, %s5303_s11   ;;  %s3050_s10 = sphi %s3106_s10, %s5302_s10   ;;  %s3046_s9 = sphi %s3104_s9, %s5301_s9  }
   0x8   : > { %p74_p0 = scmp.ne.s32.totalorder %s3050_s10, %s3046_s9  ;;  %p3138_p1 = scmp.eq.s32.totalorder %s2697_s15, 0 }
   0x9   : > { %p3142_p2 = scmp.eq.s32.totalorder %s2697_s15, 1  ;;  %p104_p3 = scmp.eq.s32.totalorder %s2698_s16, 1 }
   0xa   : > { %p3148_p4 = por %p3138_p1, %p74_p0  ;;  %p2699_p5 = scmp.ge.s32.totalorder %s3066_s14, 1 }
   0xb   : > { %p3153_p6 = por %p104_p3, %p74_p0  ;;  %p111_p7 = scmp.lt.s32.totalorder %s3066_s14, 3 }
   0xc   : > { %s31_s22 = sadd.s32 1, %s3062_s13  ;;  %s61_s23 = sadd.s32 1, %s3054_s11 }
   0xd   : > { %s5288_s20 = scalar_select %p3153_p6, 1, 0 }
   0xe   : > { %p3158_p8 = pnand %p2699_p5, %p111_p7  ;;  %p33_p12 = scmp.ge.s32.totalorder %s31_s22, 2 }
   0xf   : > { %p68_p13 = scmp.ne.s32.totalorder %s3054_s11, %s3050_s10  ;;  %p69_p0 = scmp.eq.s32.totalorder %s3066_s14, 0 }
  0x10   : > { %p2839_p10 = pneg %p3158_p8  ;;  %s3068_s24 = smov [#allocation6]  }
  0x11   : > { %s5307_s22 = smov (%p33_p12, %s31_s22), 0  ;;  %p3177_p3 = por %p69_p0, %p68_p13 }
  0x12   : > { %p2840_p11 = pnand %p2839_p10, %p3138_p1  ;;  %p3183_p5 = por %p3142_p2, %p68_p13 }
  0x13   : > { %s56_s29 = ssub.s32 %s3062_s13, %s5307_s22  ;;  %p2852_p7 = scmp.lt.s32.totalorder %s3066_s14, 2 }
  0x14   : > { %2842 = dma.hbm_to_smem (!%p2840_p11), %s5276_s0, 16, %s3068_s24, [#allocation9]  }
  0x15   : > { %s5291_s28 = scalar_select %p3183_p5, 1, 0 }
  0x16   : > { %p59_p10 = scmp.eq.s32.totalorder %s56_s29, 0  ;;  %s133_s30 = sand.u32 1, %s3054_s11  }
  0x17   : > { %s2702_s3 = sshll.u32 %s133_s30, 3  ;;  %s2829_s5 = sshll.u32 %s3062_s13, 7 }
  0x18   : > { %s3192_s4 = scalar_select %p59_p10, %s3054_s11, %s61_s23  }
  0x19   : > { %s145_s8 = scalar_lea.hbm %s5277_s1, %s2829_s5  ;;  %s137_s15 = scalar_lea.vmem [#allocation10], %s2702_s3 }
  0x1a   : > { %s147_s16 = sshll.u32 %s137_s15, 4  ;;  %p3200_p2 = pnand %p2852_p7, %p3177_p3  ;;  %s148_s16 = int_to_ptr.vmem [resolvable:$true] %s147_s16 }
  0x1b   : > { %s134_s24 = scalar_lea.sflag [#allocation7], %s133_s30  ;;  %s2967_s25 = scalar_lea.vmem %s148_s16, 128 }
  0x1c   : > { %p2956_p11 = pneg %p3200_p2  ;;  %p2968_p12 = scmp.ne.s32.totalorder %s148_s16, %s2967_s25 }
  0x1d   : > { %s3069_s23 = smov [#allocation10]  }
  0x1e   : > { %p2970_p13 = pnand %p2968_p12, %p2956_p11  ;;  %s2972_s26 = sshll.u32 %s3069_s23, 4  ;;  %s2973_s26 = int_to_ptr.vmem [resolvable:$false] %s2972_s26 }
  0x1f   : > { %s2974_s29 = scalar_lea.vmem %s2973_s26, 256  ;;  %p2975_p10 = scmp.lt.s32.totalorder %s148_s16, %s2973_s26 }
  0x20   : > { %p2971_p0 = pneg %p2970_p13  ;;  %p2976_p9 = scmp.lt.s32.totalorder %s2974_s29, %s2967_s25 }
  0x22   : > { %p2977_p6 = por %p2976_p9, %p2975_p10 }
  0x24   : > { %p2978_p5 = pnand %p2977_p6, %p2971_p0 }
  0x26   : > { %2981 = shalt.err (!%p2978_p5)
}
  0x27   : > { %2846 = dma.hbm_to_vmem [thread:$0]  (!%p3200_p2), %s145_s8, 128, %s148_s16, %s134_s24  }
  0x28   : > { %156 = sbr.rel (%p3158_p8) target bundleno = 750 (0x2ee), region = 28 }
  0x2d   : > { %3033 = dma.done.wait (%p3138_p1), [#allocation9], 16  }
  0x2e   : > { %3035 = vsyncadd (%p3138_p1), [#allocation9], 4294967280  ;;  %s3215_s27 = sand.u32 1, %s3050_s10  }
  0x2f   : > { %s2707_s30 = sshll.u32 %s3215_s27, 3  ;;  %s163_s3 = scalar_lea.sflag [#allocation7], %s3215_s27 }
  0x30   : > { %s166_s5 = scalar_lea.vmem [#allocation10], %s2707_s30 }
  0x31   : > { %3037 = dma.done.wait (%p3148_p4), %s163_s3, 128  }
  0x32   : > { %3039 = vsyncadd (%p3148_p4), %s163_s3, 4294967168 }
  0x33   : > { %171 = sfence }
  0x34   : > { %v188_v0 = vld [vmem:[%s166_s5] sm:$0xff]  ;;  %vm192_vm0 = vcmask 1043456   ;;  %vm320_vm1 = vcmask 179200   ;;  %v231_v11 = vlaneseq  ;;  %v3070_v16 = vmov 1966171168   ;;  %s3072_s17 = smov 115  }
  0x35   : > { %v190_v1 = vcombine.high %v188_v0, %v188_v0  ;;  %v193_v2 = vsel %vm192_vm0, %v188_v0, 0.0  ;;  %v207_v3 = vsel %vm192_vm0, %v188_v0, -inf  ;;  %v229_v17 = vunpack.c.l.s4 %v3070_v16  ;;  %s3073_s19 = smov 3   ;;  %s3074_s21 = smov 99  }
  0x36   : > { %v194_v4 = vrot.slane %v193_v2, 4  ;;  %v208_v5 = vrot.slane %v207_v3, 4  ;;  %v3071_v18 = vmov 0.0   ;;  %v232_v23 = vshrl.u32 %v231_v11, 7  ;;  %s3075_s6 = smov 83   ;;  %s3076_s7 = smov 67  }
  0x37   : > { %v214_v6 = vsel %vm192_vm0, %v190_v1, -inf  ;;  %v200_v7 = vsel %vm192_vm0, %v190_v1, 0.0  ;;  %325 = vst.msk [vmem:[#allocation5] sm:$0xff] %vm320_vm1, %v3071_v18  ;;  %321 = vst.msk [vmem:[#allocation4] sm:$0xff] %vm320_vm1, %v3071_v18  ;;  %v230_v28 = vunpack.c.0.s8 %v229_v17  ;;  %vm245_vm2 = vcmp.lt.s32.totalorder %v231_v11, 256  ;;  %s3077_s8 = smov 51  }
  0x38   : > { %v195_v8 = vadd.f32 %v194_v4, %v193_v2  ;;  %v209_v9 = vmax.f32 %v207_v3, %v208_v5  ;;  %v215_v10 = vrot.slane %v214_v6, 4  ;;  %v201_v12 = vrot.slane %v200_v7, 4  ;;  %322 = vst.msk [vmem:[#allocation4 + $0x8] sm:$0xff] %vm320_vm1, %v3071_v18  ;;  %326 = vst.msk [vmem:[#allocation5 + $0x8] sm:$0xff] %vm320_vm1, %v3071_v18  ;;  %s3078_s15 = smov 35   ;;  %s3079_s16 = smov 19  }
  0x39   : > { %v233_v35 = vsub.s32 %v230_v28, %v232_v23  ;;  %v3231_v43 = vsub.s32 0, %v232_v23  ;;  %vm323_vm3 = vcmask 177152   ;;  %vm338_vm4 = vcmask 147480   ;;  %s3289_s18 = sld [smem:[#allocation6 + $0x32]]  ;;  %s3080_s26 = smov 127  }
  0x3a   : > { %v196_v13 = vrot.slane %v195_v8, 2  ;;  %v210_v14 = vrot.slane %v209_v9, 2  ;;  %v216_v15 = vmax.f32 %v214_v6, %v215_v10  ;;  %v202_v19 = vadd.f32 %v201_v12, %v200_v7  ;;  %327 = vst.msk [vmem:[#allocation5 + $0x10] sm:$0x3f] %vm323_vm3, %v3071_v18  ;;  %324 = vst.msk [vmem:[#allocation4 + $0x10] sm:$0x3f] %vm323_vm3, %v3071_v18 }
  0x3b   : > { %s3293_s24 = sld [smem:[#allocation6 + $0x33]]  ;;  %s3081_s30 = smov 126   ;;  %vm860_vm5 = vcmask 1046528   ;;  %vm1147_vm6 = vcmask 1045504   ;;  %vm1434_vm7 = vcmask 1044480   ;;  %vm2007_vm8 = vcmask 1042432  }
  0x3c   : > { %v197_v20 = vadd.f32 %v196_v13, %v195_v8  ;;  %v211_v21 = vmax.f32 %v209_v9, %v210_v14  ;;  %v217_v22 = vrot.slane %v216_v15, 2  ;;  %v203_v24 = vrot.slane %v202_v19, 2  ;;  %s3298_s25 = sld [smem:[#allocation6 + $0x34]]  ;;  %s3082_s5 = smov 125  }
  0x3d   : > { %s3308_s23 = sld [smem:[#allocation6 + $0x35]]  ;;  %vm2294_vm9 = vcmask 1041408   ;;  %vm2584_vm10 = vcmask 130048   ;;  %p5298_p4 = scmp.ne.s32.totalorder %s5291_s28, 0 }
  0x3e   : > { %v198_v25 = vrot.slane %v197_v20, 1  ;;  %v212_v26 = vrot.slane %v211_v21, 1  ;;  %v218_v27 = vmax.f32 %v216_v15, %v217_v22  ;;  %v204_v29 = vadd.f32 %v203_v24, %v202_v19  ;;  %s3317_s29 = sld [smem:[#allocation6 + $0x36]] }
  0x3f   : > { %s3326_s3 = sld [smem:[#allocation6 + $0x37]] }
  0x40   : > { %v213_v30 = vmax.f32 %v211_v21, %v212_v26  ;;  %v219_v31 = vrot.slane %v218_v27, 1  ;;  %v199_v32 = vadd.f32 %v198_v25, %v197_v20  ;;  %v205_v33 = vrot.slane %v204_v29, 1 }
  0x42   : > { %v220_v34 = vmax.f32 %v218_v27, %v219_v31  ;;  %v206_v36 = vadd.f32 %v205_v33, %v204_v29 }
  0x44   : > { %v250_v37 = vcombine.low %v213_v30, %v220_v34  ;;  %v227_v38 = vcombine.low %v199_v32, %v206_v36 }
  0x46   : > { %v257_v39 = vrot.slane %v250_v37, %v233_v35  ;;  %v234_v40 = vrot.slane %v227_v38, %v233_v35 }
  0x48   : > { %v264_v41 = vrot.slane %v257_v39, %v233_v35  ;;  %v241_v42 = vrot.slane %v234_v40, %v233_v35  ;;  %v698_v40 = vstv %s3289_s18  ;;  %s2751_s18 = sld [smem:[#allocation6 + $0x3e]] }
  0x4a   : > { %266 = vst.msk [vmem:[#allocation3] sm:$0x3] %vm245_vm2, %v264_v41  ;;  %247 = vst.msk [vmem:[#allocation2] sm:$0x3] %vm245_vm2, %v241_v42 }
  0x51   : > { %v2710_v44 = vld [vmem:[#allocation3] ss:$0 sm:$0xff]  ;;  %v328_v45 = vld [vmem:[#allocation2] sm:$0x1]  ;;  %v497_v2 = vld [vmem:[#allocation2 + $0x1] sm:$0x1] }
  0x52   : > { %367 = vrot.lane.b32.xlu1 %v2710_v44, %s3072_s17  ;;  %346 = vrot.lane.b32.xlu0 %v2710_v44, %s3073_s19  ;;  %v371_v46 = vld [vmem:[#allocation2] sm:$0x1]  ;;  %v329_v47 = vmul.f32 0.25, %v328_v45  ;;  %v2717_v4 = vld [vmem:[#allocation3 + $0x1] ss:$0 sm:$0xff]  ;;  %v498_v6 = vmul.f32 0.25, %v497_v2  ;;  %v726_v45 = vstv %s3293_s24 }
  0x53   : > { %v372_v48 = vmul.f32 0.25, %v371_v46  ;;  %v392_v49 = vld [vmem:[#allocation2] sm:$0x1]  ;;  %v518_v7 = vld [vmem:[#allocation2 + $0x1] sm:$0x1]  ;;  %s3421_s24 = sld [smem:[#allocation6 + $0x1]] }
  0x54   : > { %v334_v50 = vrot.slane %v329_v47, %v3231_v43  ;;  %v393_v52 = vmul.f32 0.25, %v392_v49  ;;  %v413_v53 = vld [vmem:[#allocation2] sm:$0x1]  ;;  %v503_v9 = vrot.slane %v498_v6, %v3231_v43  ;;  %v519_v10 = vmul.f32 0.25, %v518_v7  ;;  %v539_v11 = vld [vmem:[#allocation2 + $0x1] sm:$0x1] }
  0x55   : > { %v377_v51 = vrot.slane %v372_v48, %v3231_v43  ;;  %v414_v55 = vmul.f32 0.25, %v413_v53  ;;  %v434_v56 = vld [vmem:[#allocation2] sm:$0x1]  ;;  %v540_v13 = vmul.f32 0.25, %v539_v11  ;;  %v560_v14 = vld [vmem:[#allocation2 + $0x1] sm:$0x1]  ;;  %v754_v49 = vstv %s3298_s25 }
  0x56   : > { %388 = vrot.lane.b32.xlu1 %v2710_v44, %s3074_s21  ;;  %335 = vrot.lane.b32.xlu0 %v334_v50, %s3073_s19  ;;  %v398_v54 = vrot.slane %v393_v52, %v3231_v43  ;;  %v435_v58 = vmul.f32 0.25, %v434_v56  ;;  %v455_v59 = vld [vmem:[#allocation2] sm:$0x1]  ;;  %v524_v12 = vrot.slane %v519_v10, %v3231_v43  ;;  %v561_v16 = vmul.f32 0.25, %v560_v14  ;;  %v581_v17 = vld [vmem:[#allocation2 + $0x1] sm:$0x1] }
  0x57   : > { %v419_v57 = vrot.slane %v414_v55, %v3231_v43  ;;  %v456_v61 = vmul.f32 0.25, %v455_v59  ;;  %v476_v62 = vld [vmem:[#allocation2] sm:$0x1]  ;;  %v545_v15 = vrot.slane %v540_v13, %v3231_v43  ;;  %v582_v20 = vmul.f32 0.25, %v581_v17  ;;  %v602_v21 = vld [vmem:[#allocation2 + $0x1] sm:$0x1] }
  0x58   : > { %v440_v60 = vrot.slane %v435_v58, %v3231_v43  ;;  %v477_v0 = vmul.f32 0.25, %v476_v62  ;;  %v350_v1 = vld [vmem:[#allocation2] sm:$0x1]  ;;  %v566_v19 = vrot.slane %v561_v16, %v3231_v43  ;;  %v603_v23 = vmul.f32 0.25, %v602_v21  ;;  %v623_v24 = vld [vmem:[#allocation2 + $0x1] sm:$0x1] }
  0x59   : > { %v461_v63 = vrot.slane %v456_v61, %v3231_v43  ;;  %v351_v3 = vmul.f32 0.25, %v350_v1  ;;  %v587_v22 = vrot.slane %v582_v20, %v3231_v43  ;;  %v624_v26 = vmul.f32 0.25, %v623_v24  ;;  %v644_v27 = vld [vmem:[#allocation2 + $0x1] sm:$0x1]  ;;  %s3432_s25 = sld [smem:[#allocation6 + $0x2]] }
  0x5a   : > { %409 = vrot.lane.b32.xlu1 %v2710_v44, %s3075_s6  ;;  %378 = vrot.lane.b32.xlu0 %v377_v51, %s3074_s21  ;;  %v482_v5 = vrot.slane %v477_v0, %v3231_v43  ;;  %v608_v25 = vrot.slane %v603_v23, %v3231_v43  ;;  %v645_v28 = vmul.f32 0.25, %v644_v27  ;;  %v782_v53 = vstv %s3308_s23  ;;  %s3442_s23 = sld [smem:[#allocation6 + $0x3]] }
  0x5b   : > { %v356_v8 = vrot.slane %v351_v3, %v3231_v43  ;;  %v629_v18 = vrot.slane %v624_v26, %v3231_v43  ;;  %v838_v61 = vstv %s3326_s3  ;;  %s3458_s3 = sld [smem:[#allocation6 + $0x5]] }
  0x5c   : > { %v650_v29 = vrot.slane %v645_v28, %v3231_v43 }
  0x5e   : > { %430 = vrot.lane.b32.xlu1 %v2710_v44, %s3076_s7  ;;  %399 = vrot.lane.b32.xlu0 %v398_v54, %s3075_s6 }
  0x62   : > { %451 = vrot.lane.b32.xlu1 %v2710_v44, %s3077_s8  ;;  %420 = vrot.lane.b32.xlu0 %v419_v57, %s3076_s7  ;;  %v810_v57 = vstv %s3317_s29  ;;  %s3450_s29 = sld [smem:[#allocation6 + $0x4]] }
  0x66   : > { %472 = vrot.lane.b32.xlu1 %v2710_v44, %s3078_s15  ;;  %441 = vrot.lane.b32.xlu0 %v440_v60, %s3077_s8 }
  0x6a   : > { %493 = vrot.lane.b32.xlu1 %v2710_v44, %s3079_s16  ;;  %462 = vrot.lane.b32.xlu0 %v461_v63, %s3078_s15 }
  0x6e   : > { %514 = vrot.lane.b32.xlu1 %v2717_v4, %s3073_s19  ;;  %483 = vrot.lane.b32.xlu0 %v482_v5, %s3079_s16 }
  0x72   : > { %357 = vrot.lane.b32.xlu1 %v356_v8, %s3072_s17  ;;  %504 = vrot.lane.b32.xlu0 %v503_v9, %s3073_s19  ;;  %s3084_s19 = smov 123  }
  0x76   : > { %535 = vrot.lane.b32.xlu1 %v2717_v4, %s3072_s17  ;;  %525 = vrot.lane.b32.xlu0 %v524_v12, %s3072_s17  ;;  %s3083_s17 = smov 124  }
  0x7a   : > { %556 = vrot.lane.b32.xlu1 %v2717_v4, %s3074_s21  ;;  %546 = vrot.lane.b32.xlu0 %v545_v15, %s3074_s21  ;;  %s3085_s21 = smov 122  }
  0x7e   : > { %577 = vrot.lane.b32.xlu1 %v2717_v4, %s3075_s6  ;;  %567 = vrot.lane.b32.xlu0 %v566_v19, %s3075_s6  ;;  %s2741_s6 = sld [smem:[#allocation6 + $0x39]] }
  0x82   : > { %598 = vrot.lane.b32.xlu1 %v2717_v4, %s3076_s7  ;;  %588 = vrot.lane.b32.xlu0 %v587_v22, %s3076_s7  ;;  %s2743_s7 = sld [smem:[#allocation6 + $0x3a]] }
  0x84   : > { %v908_v6 = vstv %s2741_s6  ;;  %s2740_s6 = sld [smem:[#allocation6 + $0x8]] }
  0x86   : > { %619 = vrot.lane.b32.xlu1 %v2717_v4, %s3077_s8  ;;  %609 = vrot.lane.b32.xlu0 %v608_v25, %s3077_s8  ;;  %s2745_s8 = sld [smem:[#allocation6 + $0x3b]] }
  0x88   : > { %v3358_v11 = vstv %s2743_s7  ;;  %s3466_s7 = sld [smem:[#allocation6 + $0x6]] }
  0x8a   : > { %640 = vrot.lane.b32.xlu1 %v2717_v4, %s3078_s15  ;;  %630 = vrot.lane.b32.xlu0 %v629_v18, %s3078_s15  ;;  %s2747_s15 = sld [smem:[#allocation6 + $0x3c]] }
  0x8c   : > { %v992_v21 = vstv %s2745_s8  ;;  %s2742_s8 = sld [smem:[#allocation6 + $0x9]] }
  0x8e   : > { %661 = vrot.lane.b32.xlu1 %v2717_v4, %s3079_s16  ;;  %651 = vrot.lane.b32.xlu0 %v650_v29, %s3079_s16  ;;  %s2749_s16 = sld [smem:[#allocation6 + $0x3d]] }
  0x90   : > { %v1034_v28 = vstv %s2747_s15  ;;  %s2744_s15 = sld [smem:[#allocation6 + $0xa]] }
  0xc4   : > { %v368_v30 = vpop.permute.xlu1 %367  ;;  %v347_v31 = vpop.permute.xlu0 %346 }
  0xc5   : > { %370 = vst.msk [vmem:[#allocation5 + $0x4] sm:$0x1] %vm338_vm4, %v368_v30  ;;  %349 = vst.msk [vmem:[#allocation5 + $0x3] sm:$0x1] %vm338_vm4, %v347_v31 }
  0xc8   : > { %v389_v32 = vpop.permute.xlu1 %388  ;;  %v336_v33 = vpop.permute.xlu0 %335 }
  0xc9   : > { %391 = vst.msk [vmem:[#allocation5 + $0x5] sm:$0x1] %vm338_vm4, %v389_v32  ;;  %339 = vst.msk [vmem:[#allocation4 + $0x3] sm:$0x1] %vm338_vm4, %v336_v33 }
  0xcc   : > { %v410_v34 = vpop.permute.xlu1 %409  ;;  %v379_v35 = vpop.permute.xlu0 %378 }
  0xcd   : > { %412 = vst.msk [vmem:[#allocation5 + $0x6] sm:$0x1] %vm338_vm4, %v410_v34  ;;  %381 = vst.msk [vmem:[#allocation4 + $0x5] sm:$0x1] %vm338_vm4, %v379_v35  ;;  %v1076_v35 = vstv %s2749_s16  ;;  %s2746_s16 = sld [smem:[#allocation6 + $0xb]] }
  0xd0   : > { %v431_v36 = vpop.permute.xlu1 %430  ;;  %v400_v37 = vpop.permute.xlu0 %399 }
  0xd1   : > { %433 = vst.msk [vmem:[#allocation5 + $0x7] sm:$0x1] %vm338_vm4, %v431_v36  ;;  %402 = vst.msk [vmem:[#allocation4 + $0x6] sm:$0x1] %vm338_vm4, %v400_v37 }
  0xd4   : > { %v452_v38 = vpop.permute.xlu1 %451  ;;  %v421_v39 = vpop.permute.xlu0 %420 }
  0xd5   : > { %454 = vst.msk [vmem:[#allocation5 + $0x8] sm:$0x1] %vm338_vm4, %v452_v38  ;;  %423 = vst.msk [vmem:[#allocation4 + $0x7] sm:$0x1] %vm338_vm4, %v421_v39 }
  0xd8   : > { %v3300_v41 = vld [vmem:[#allocation5] sm:$0xff]  ;;  %v473_v42 = vpop.permute.xlu1 %472  ;;  %v442_v43 = vpop.permute.xlu0 %441 }
  0xd9   : > { %475 = vst.msk [vmem:[#allocation5 + $0x9] sm:$0x1] %vm338_vm4, %v473_v42  ;;  %v699_v44 = vmul.f32 %v698_v40, %v3300_v41  ;;  %444 = vst.msk [vmem:[#allocation4 + $0x8] sm:$0x1] %vm338_vm4, %v442_v43  ;;  %v727_v48 = vmul.f32 %v726_v45, %v3300_v41  ;;  %v755_v52 = vmul.f32 %v754_v49, %v3300_v41 }
  0xda   : > { %v783_v56 = vmul.f32 %v782_v53, %v3300_v41  ;;  %v811_v60 = vmul.f32 %v810_v57, %v3300_v41  ;;  %v839_v0 = vmul.f32 %v838_v61, %v3300_v41  ;;  %v909_v8 = vmul.f32 %v908_v6, %v3300_v41 }
  0xdb   : > { %703 = vrot.lane.b32.xlu0 %v699_v44, %s3080_s26  ;;  %v951_v19 = vmul.f32 %v3358_v11, %v3300_v41  ;;  %v993_v18 = vmul.f32 %v992_v21, %v3300_v41  ;;  %v1035_v34 = vmul.f32 %v1034_v28, %v3300_v41  ;;  %v1077_v43 = vmul.f32 %v1076_v35, %v3300_v41 }
  0xdc   : > { %v494_v46 = vpop.permute.xlu1 %493  ;;  %v463_v47 = vpop.permute.xlu0 %462  ;;  %v915_v16 = vrot.slane %v909_v8, 1  ;;  %v1118_v44 = vstv %s2751_s18  ;;  %s2748_s18 = sld [smem:[#allocation6 + $0xc]] }
  0xdd   : > { %496 = vst.msk [vmem:[#allocation5 + $0xa] sm:$0x1] %vm338_vm4, %v494_v46  ;;  %465 = vst.msk [vmem:[#allocation4 + $0x9] sm:$0x1] %vm338_vm4, %v463_v47  ;;  %v957_v27 = vrot.slane %v951_v19, 1  ;;  %v999_v33 = vrot.slane %v993_v18, 1 }
  0xde   : > { %v1041_v42 = vrot.slane %v1035_v34, 1  ;;  %v3497_v34 = vstv %s2744_s15  ;;  %s2761_s15 = sld [smem:[#allocation6 + $0x43]] }
  0xdf   : > { %731 = vrot.lane.b32.xlu0 %v727_v48, %s3081_s30 }
  0xe0   : > { %v515_v50 = vpop.permute.xlu1 %514  ;;  %v484_v51 = vpop.permute.xlu0 %483 }
  0xe1   : > { %517 = vst.msk [vmem:[#allocation5 + $0xb] sm:$0x1] %vm338_vm4, %v515_v50  ;;  %486 = vst.msk [vmem:[#allocation4 + $0xa] sm:$0x1] %vm338_vm4, %v484_v51  ;;  %v1083_v50 = vrot.slane %v1077_v43, 1  ;;  %v1119_v51 = vmul.f32 %v1118_v44, %v3300_v41  ;;  %v3512_v43 = vstv %s2746_s16  ;;  %s2762_s16 = sld [smem:[#allocation6 + $0x13]] }
  0xe3   : > { %759 = vrot.lane.b32.xlu0 %v755_v52, %s3082_s5 }
  0xe4   : > { %v358_v54 = vpop.permute.xlu1 %357  ;;  %v505_v55 = vpop.permute.xlu0 %504 }
  0xe5   : > { %360 = vst.msk [vmem:[#allocation4 + $0x4] sm:$0x1] %vm338_vm4, %v358_v54  ;;  %507 = vst.msk [vmem:[#allocation4 + $0xb] sm:$0x1] %vm338_vm4, %v505_v55 }
  0xe7   : > { %787 = vrot.lane.b32.xlu0 %v783_v56, %s3083_s17 }
  0xe8   : > { %v536_v58 = vpop.permute.xlu1 %535  ;;  %v526_v59 = vpop.permute.xlu0 %525 }
  0xe9   : > { %538 = vst.msk [vmem:[#allocation5 + $0xc] sm:$0x1] %vm338_vm4, %v536_v58  ;;  %528 = vst.msk [vmem:[#allocation4 + $0xc] sm:$0x1] %vm338_vm4, %v526_v59 }
  0xeb   : > { %815 = vrot.lane.b32.xlu0 %v811_v60, %s3084_s19  ;;  %v685_v60 = vstv %s3421_s24  ;;  %s2750_s24 = sld [smem:[#allocation6 + $0xd]] }
  0xec   : > { %v557_v62 = vpop.permute.xlu1 %556  ;;  %v547_v63 = vpop.permute.xlu0 %546  ;;  %v3438_v58 = vld [vmem:[#allocation4] sm:$0xff] }
  0xed   : > { %559 = vst.msk [vmem:[#allocation5 + $0xd] sm:$0x1] %vm338_vm4, %v557_v62  ;;  %549 = vst.msk [vmem:[#allocation4 + $0xd] sm:$0x1] %vm338_vm4, %v547_v63 }
  0xef   : > { %843 = vrot.lane.b32.xlu0 %v839_v0, %s3085_s21  ;;  %v686_v0 = vmul.f32 %v685_v60, %v3438_v58 }
  0xf0   : > { %v578_v1 = vpop.permute.xlu1 %577  ;;  %v568_v2 = vpop.permute.xlu0 %567 }
  0xf1   : > { %580 = vst.msk [vmem:[#allocation5 + $0xe] sm:$0x1] %vm338_vm4, %v578_v1  ;;  %570 = vst.msk [vmem:[#allocation4 + $0xe] sm:$0x1] %vm338_vm4, %v568_v2  ;;  %v713_v1 = vstv %s3432_s25  ;;  %s2754_s25 = sld [smem:[#allocation6 + $0xf]] }
  0xf4   : > { %v599_v3 = vpop.permute.xlu1 %598  ;;  %v589_v4 = vpop.permute.xlu0 %588 }
  0xf5   : > { %601 = vst.msk [vmem:[#allocation5 + $0xf] sm:$0x1] %vm338_vm4, %v599_v3  ;;  %591 = vst.msk [vmem:[#allocation4 + $0xf] sm:$0x1] %vm338_vm4, %v589_v4 }
  0xf8   : > { %v620_v5 = vpop.permute.xlu1 %619  ;;  %v610_v7 = vpop.permute.xlu0 %609 }
  0xf9   : > { %622 = vst.msk [vmem:[#allocation5 + $0x10] sm:$0x1] %vm338_vm4, %v620_v5  ;;  %612 = vst.msk [vmem:[#allocation4 + $0x10] sm:$0x1] %vm338_vm4, %v610_v7  ;;  %v714_v5 = vmul.f32 %v713_v1, %v3438_v58 }
  0xfc   : > { %v3356_v9 = vld [vmem:[#allocation5 + $0x8] sm:$0xff]  ;;  %v641_v10 = vpop.permute.xlu1 %640  ;;  %v631_v14 = vpop.permute.xlu0 %630  ;;  %v3474_v19 = vld [vmem:[#allocation4 + $0x8] sm:$0xff] }
  0xfd   : > { %643 = vst.msk [vmem:[#allocation5 + $0x11] sm:$0x1] %vm338_vm4, %v641_v10  ;;  %v700_v12 = vmul.f32 %v698_v40, %v3356_v9  ;;  %v3365_v13 = vmul.f32 %v908_v6, %v3356_v9  ;;  %v3369_v15 = vmul.f32 %v3358_v11, %v3356_v9  ;;  %633 = vst.msk [vmem:[#allocation4 + $0x11] sm:$0x1] %vm338_vm4, %v631_v14 }
  0xfe   : > { %v728_v23 = vmul.f32 %v726_v45, %v3356_v9  ;;  %v3383_v26 = vmul.f32 %v992_v21, %v3356_v9  ;;  %v756_v30 = vmul.f32 %v754_v49, %v3356_v9  ;;  %v3395_v32 = vmul.f32 %v1034_v28, %v3356_v9 }
  0xff   : > { %705 = vrot.lane.b32.xlu1 %v700_v12, %s3080_s26  ;;  %v916_v17 = vrot.slane %v3365_v13, 1  ;;  %v958_v24 = vrot.slane %v3369_v15, 1  ;;  %v784_v37 = vmul.f32 %v782_v53, %v3356_v9  ;;  %v3406_v39 = vmul.f32 %v1076_v35, %v3356_v9 }
 0x100   : > { %v662_v20 = vpop.permute.xlu1 %661  ;;  %v652_v25 = vpop.permute.xlu0 %651  ;;  %v1000_v31 = vrot.slane %v3383_v26, 1  ;;  %v1042_v38 = vrot.slane %v3395_v32, 1  ;;  %v812_v46 = vmul.f32 %v810_v57, %v3356_v9  ;;  %v3419_v48 = vmul.f32 %v1118_v44, %v3356_v9 }
 0x101   : > { %664 = vst.msk [vmem:[#allocation5 + $0x12] sm:$0x1] %vm338_vm4, %v662_v20  ;;  %v917_v22 = vsel %vm860_vm5, %v915_v16, %v916_v17  ;;  %654 = vst.msk [vmem:[#allocation4 + $0x12] sm:$0x1] %vm338_vm4, %v652_v25  ;;  %v959_v29 = vsel %vm860_vm5, %v957_v27, %v958_v24  ;;  %v1084_v47 = vrot.slane %v3406_v39, 1  ;;  %v840_v53 = vmul.f32 %v838_v61, %v3356_v9 }
 0x102   : > { %920 = vrot.lane.b32.xlu0 %v917_v22, %s3080_s26  ;;  %v1001_v36 = vsel %vm860_vm5, %v999_v33, %v1000_v31  ;;  %v1043_v45 = vsel %vm860_vm5, %v1041_v42, %v1042_v38  ;;  %v1126_v54 = vrot.slane %v3419_v48, 1  ;;  %v1125_v57 = vrot.slane %v1119_v51, 1 }
 0x103   : > { %733 = vrot.lane.b32.xlu1 %v728_v23, %s3081_s30  ;;  %v1085_v52 = vsel %vm860_vm5, %v1083_v50, %v1084_v47  ;;  %v769_v12 = vstv %s3450_s29  ;;  %v888_v23 = vstv %s2740_s6  ;;  %v973_v42 = vmul.f32 %v3497_v34, %v3438_v58  ;;  %s2756_s29 = sld [smem:[#allocation6 + $0x10]] }
 0x104   : > { %v1127_v59 = vsel %vm860_vm5, %v1125_v57, %v1126_v54  ;;  %v770_v16 = vmul.f32 %v769_v12, %v3438_v58  ;;  %v3482_v25 = vmul.f32 %v888_v23, %v3474_v19  ;;  %v889_v27 = vmul.f32 %v888_v23, %v3438_v58  ;;  %s2758_s6 = sld [smem:[#allocation6 + $0x11]] }
 0x105   : > { %v979_v48 = vrot.slane %v973_v42, 1  ;;  %v3527_v50 = vstv %s2748_s18  ;;  %s2763_s18 = sld [smem:[#allocation6 + $0x44]] }
 0x106   : > { %962 = vrot.lane.b32.xlu0 %v959_v29, %s3081_s30  ;;  %v687_v29 = vmul.f32 %v685_v60, %v3474_v19  ;;  %v895_v32 = vrot.slane %v889_v27, 1  ;;  %v1057_v57 = vmul.f32 %v3527_v50, %v3438_v58 }
 0x107   : > { %761 = vrot.lane.b32.xlu1 %v756_v30, %s3082_s5  ;;  %v896_v30 = vrot.slane %v3482_v25, 1 }
 0x108   : > { %v3409_v40 = vld [vmem:[#allocation5 + $0x10] sm:$0x3f] }
 0x109   : > { %v911_v49 = vmul.f32 %v908_v6, %v3409_v40  ;;  %v953_v56 = vmul.f32 %v3358_v11, %v3409_v40  ;;  %v995_v63 = vmul.f32 %v992_v21, %v3409_v40  ;;  %v1037_v4 = vmul.f32 %v1034_v28, %v3409_v40 }
 0x10a   : > { %1004 = vrot.lane.b32.xlu0 %v1001_v36, %s3082_s5  ;;  %v741_v6 = vstv %s3442_s23  ;;  %v1079_v10 = vmul.f32 %v1076_v35, %v3409_v40  ;;  %v1121_v15 = vmul.f32 %v1118_v44, %v3409_v40  ;;  %v930_v28 = vstv %s2742_s8  ;;  %s2755_s23 = sld [smem:[#allocation6 + $0x40]] }
 0x10b   : > { %789 = vrot.lane.b32.xlu1 %v784_v37, %s3083_s17  ;;  %v918_v55 = vrot.slane %v911_v49, 1  ;;  %v960_v62 = vrot.slane %v953_v56, 1  ;;  %v1002_v3 = vrot.slane %v995_v63, 1  ;;  %v1044_v8 = vrot.slane %v1037_v4, 1  ;;  %s2760_s8 = sld [smem:[#allocation6 + $0x12]] }
 0x10c   : > { %v742_v11 = vmul.f32 %v741_v6, %v3438_v58  ;;  %v1086_v14 = vrot.slane %v1079_v10, 1  ;;  %v1128_v21 = vrot.slane %v1121_v15, 1  ;;  %v931_v33 = vmul.f32 %v930_v28, %v3438_v58 }
 0x10d   : > { %v919_v61 = vsel %vm860_vm5, %v916_v17, %v918_v55  ;;  %v961_v2 = vsel %vm860_vm5, %v958_v24, %v960_v62  ;;  %v1003_v7 = vsel %vm860_vm5, %v1000_v31, %v1002_v3  ;;  %v1045_v13 = vsel %vm860_vm5, %v1042_v38, %v1044_v8  ;;  %v3539_v55 = vld [vmem:[#allocation4 + $0x10] sm:$0x3f] }
 0x10e   : > { %1046 = vrot.lane.b32.xlu0 %v1043_v45, %s3083_s17  ;;  %v797_v17 = vstv %s3458_s3  ;;  %v1087_v20 = vsel %vm860_vm5, %v1084_v47, %v1086_v14  ;;  %v825_v24 = vstv %s3466_s7  ;;  %v1129_v26 = vsel %vm860_vm5, %v1126_v54, %v1128_v21  ;;  %s2757_s3 = sld [smem:[#allocation6 + $0x41]] }
 0x10f   : > { %817 = vrot.lane.b32.xlu1 %v812_v46, %s3084_s19  ;;  %v798_v22 = vmul.f32 %v797_v17, %v3438_v58  ;;  %v826_v18 = vmul.f32 %v825_v24, %v3438_v58  ;;  %v3492_v31 = vmul.f32 %v930_v28, %v3474_v19  ;;  %v897_v35 = vsel %vm860_vm5, %v895_v32, %v896_v30  ;;  %s2759_s7 = sld [smem:[#allocation6 + $0x42]] }
 0x110   : > { %v715_v36 = vmul.f32 %v713_v1, %v3474_v19  ;;  %v3506_v38 = vmul.f32 %v3497_v34, %v3474_v19  ;;  %v937_v39 = vrot.slane %v931_v33, 1  ;;  %v743_v45 = vmul.f32 %v741_v6, %v3474_v19 }
 0x111   : > { %v938_v37 = vrot.slane %v3492_v31, 1  ;;  %v3521_v47 = vmul.f32 %v3512_v43, %v3474_v19  ;;  %v1015_v49 = vmul.f32 %v3512_v43, %v3438_v58  ;;  %v3536_v54 = vmul.f32 %v3527_v50, %v3474_v19 }
 0x112   : > { %1088 = vrot.lane.b32.xlu0 %v1085_v52, %s3084_s19  ;;  %v980_v46 = vrot.slane %v3506_v38, 1  ;;  %v771_v52 = vmul.f32 %v769_v12, %v3474_v19  ;;  %v1063_v1 = vrot.slane %v1057_v57, 1  ;;  %v3560_v3 = vstv %s2754_s25  ;;  %s2765_s25 = sld [smem:[#allocation6 + $0x45]] }
 0x113   : > { %845 = vrot.lane.b32.xlu1 %v840_v53, %s3085_s21  ;;  %v939_v44 = vsel %vm860_vm5, %v937_v39, %v938_v37  ;;  %v1022_v53 = vrot.slane %v3521_v47, 1  ;;  %v1021_v56 = vrot.slane %v1015_v49, 1  ;;  %v1064_v62 = vrot.slane %v3536_v54, 1 }
 0x114   : > { %v981_v51 = vsel %vm860_vm5, %v979_v48, %v980_v46  ;;  %v933_v10 = vmul.f32 %v930_v28, %v3539_v55  ;;  %v1176_v12 = vmul.f32 %v3560_v3, %v3438_v58  ;;  %v975_v21 = vmul.f32 %v3497_v34, %v3539_v55 }
 0x115   : > { %v1023_v60 = vsel %vm860_vm5, %v1021_v56, %v1022_v53  ;;  %v1065_v4 = vsel %vm860_vm5, %v1063_v1, %v1064_v62  ;;  %v3614_v33 = vstv %s2757_s3  ;;  %v1059_v39 = vmul.f32 %v3527_v50, %v3539_v55  ;;  %s2770_s3 = sld [smem:[#allocation6 + $0x17]] }
 0x116   : > { %1130 = vrot.lane.b32.xlu0 %v1127_v59, %s3085_s21  ;;  %v3544_v59 = vstv %s2750_s24  ;;  %v982_v28 = vrot.slane %v975_v21, 1  ;;  %v3654_v57 = vstv %s2759_s7  ;;  %s2764_s24 = sld [smem:[#allocation6 + $0x14]] }
 0x117   : > { %922 = vrot.lane.b32.xlu1 %v919_v61, %s3080_s26  ;;  %v799_v61 = vmul.f32 %v797_v17, %v3474_v19  ;;  %v3553_v63 = vmul.f32 %v3544_v59, %v3474_v19  ;;  %v1066_v50 = vrot.slane %v1059_v39, 1  ;;  %v3736_v39 = vstv %s2763_s18  ;;  %s2772_s7 = sld [smem:[#allocation6 + $0x18]] }
 0x118   : > { %s2774_s18 = sld [smem:[#allocation6 + $0x19]] }
 0x119   : > { %v1106_v6 = vrot.slane %v3553_v63, 1 }
 0x11a   : > { %690 = vrot.lane.b32.xlu0 %v686_v0, %s3080_s26  ;;  %v891_v0 = vmul.f32 %v888_v23, %v3539_v55 }
 0x11b   : > { %964 = vrot.lane.b32.xlu1 %v961_v2, %s3081_s30  ;;  %v1099_v2 = vmul.f32 %v3544_v59, %v3438_v58 }
 0x11c   : > { %v898_v8 = vrot.slane %v891_v0, 1  ;;  %v1178_v0 = vmul.f32 %v3560_v3, %v3539_v55 }
 0x11e   : > { %718 = vrot.lane.b32.xlu0 %v714_v5, %s3081_s30  ;;  %v827_v5 = vmul.f32 %v825_v24, %v3474_v19  ;;  %v899_v17 = vsel %vm860_vm5, %v896_v30, %v898_v8  ;;  %v3595_v24 = vstv %s2756_s29  ;;  %s2769_s29 = sld [smem:[#allocation6 + $0x47]] }
 0x11f   : > { %1006 = vrot.lane.b32.xlu1 %v1003_v7, %s3082_s5  ;;  %v3569_v7 = vmul.f32 %v3560_v3, %v3474_v19  ;;  %v3603_v27 = vmul.f32 %v3595_v24, %v3474_v19  ;;  %v1218_v32 = vmul.f32 %v3595_v24, %v3438_v58 }
 0x121   : > { %v1183_v15 = vrot.slane %v3569_v7, 2  ;;  %v1225_v31 = vrot.slane %v3603_v27, 2  ;;  %v1224_v42 = vrot.slane %v1218_v32, 2  ;;  %v1240_v32 = vmul.f32 %v3614_v33, %v3409_v40 }
 0x122   : > { %746 = vrot.lane.b32.xlu0 %v742_v11, %s3082_s5  ;;  %v1105_v11 = vrot.slane %v1099_v2, 1  ;;  %v1280_v2 = vmul.f32 %v3654_v57, %v3300_v41 }
 0x123   : > { %1048 = vrot.lane.b32.xlu1 %v1045_v13, %s3083_s17  ;;  %v3576_v13 = vstv %s2755_s23  ;;  %s2768_s23 = sld [smem:[#allocation6 + $0x16]] }
 0x124   : > { %v1107_v14 = vsel %vm860_vm5, %v1105_v11, %v1106_v6  ;;  %v1196_v23 = vmul.f32 %v3576_v13, %v3300_v41  ;;  %v1198_v11 = vmul.f32 %v3576_v13, %v3409_v40 }
 0x126   : > { %774 = vrot.lane.b32.xlu0 %v770_v16, %s3083_s17  ;;  %v3584_v16 = vmul.f32 %v3576_v13, %v3356_v9  ;;  %v1202_v30 = vrot.slane %v1196_v23, 2  ;;  %v1220_v23 = vmul.f32 %v3595_v24, %v3539_v55 }
 0x127   : > { %1090 = vrot.lane.b32.xlu1 %v1087_v20, %s3084_s19  ;;  %v940_v20 = vrot.slane %v933_v10, 1  ;;  %v1185_v10 = vrot.slane %v1178_v0, 2 }
 0x129   : > { %v1186_v21 = vsel %vm1147_vm6, %v1183_v15, %v1185_v10 }
 0x12a   : > { %802 = vrot.lane.b32.xlu0 %v798_v22, %s3084_s19  ;;  %v1182_v22 = vrot.slane %v1176_v12, 2  ;;  %v1286_v12 = vrot.slane %v1280_v2, 2 }
 0x12b   : > { %1132 = vrot.lane.b32.xlu1 %v1129_v26, %s3085_s21  ;;  %v1203_v26 = vrot.slane %v3584_v16, 2 }
 0x12c   : > { %v1184_v25 = vsel %vm1147_vm6, %v1182_v22, %v1183_v15  ;;  %v1205_v22 = vrot.slane %v1198_v11, 2 }
 0x12d   : > { %v1204_v34 = vsel %vm1147_vm6, %v1202_v30, %v1203_v26  ;;  %v1227_v30 = vrot.slane %v1220_v23, 2 }
 0x12e   : > { %830 = vrot.lane.b32.xlu0 %v826_v18, %s3085_s21  ;;  %v941_v18 = vsel %vm860_vm5, %v938_v37, %v940_v20  ;;  %v1206_v24 = vsel %vm1147_vm6, %v1203_v26, %v1205_v22 }
 0x12f   : > { %692 = vrot.lane.b32.xlu1 %v687_v29, %s3080_s26  ;;  %v1017_v29 = vmul.f32 %v3512_v43, %v3539_v55  ;;  %v1238_v43 = vmul.f32 %v3614_v33, %v3300_v41 }
 0x131   : > { %v1024_v37 = vrot.slane %v1017_v29, 1 }
 0x132   : > { %900 = vrot.lane.b32.xlu0 %v897_v35, %s3080_s26  ;;  %v3622_v35 = vmul.f32 %v3614_v33, %v3356_v9  ;;  %v3744_v33 = vmul.f32 %v3736_v39, %v3356_v9 }
 0x133   : > { %720 = vrot.lane.b32.xlu1 %v715_v36, %s3081_s30  ;;  %v983_v36 = vsel %vm860_vm5, %v980_v46, %v982_v28  ;;  %v1025_v49 = vsel %vm860_vm5, %v1022_v53, %v1024_v37  ;;  %v3662_v53 = vmul.f32 %v3654_v57, %v3356_v9  ;;  %v3715_v28 = vstv %s2762_s16  ;;  %s3888_s16 = sld [smem:[#allocation6 + $0x31]] }
 0x134   : > { %v1245_v38 = vrot.slane %v3622_v35, 2  ;;  %v3723_v15 = vmul.f32 %v3715_v28, %v3474_v19  ;;  %v1371_v27 = vrot.slane %v3744_v33, 2 }
 0x136   : > { %942 = vrot.lane.b32.xlu0 %v939_v44, %s3081_s30  ;;  %v3633_v44 = vstv %s2758_s6  ;;  %v1351_v26 = vrot.slane %v3723_v15, 2  ;;  %s2771_s6 = sld [smem:[#allocation6 + $0x48]] }
 0x137   : > { %748 = vrot.lane.b32.xlu1 %v743_v45, %s3082_s5  ;;  %v1226_v45 = vsel %vm1147_vm6, %v1224_v42, %v1225_v31  ;;  %v3641_v46 = vmul.f32 %v3633_v44, %v3474_v19  ;;  %v1260_v56 = vmul.f32 %v3633_v44, %v3438_v58  ;;  %v1228_v42 = vsel %vm1147_vm6, %v1225_v31, %v1227_v30 }
 0x139   : > { %v1267_v47 = vrot.slane %v3641_v46, 2  ;;  %v1266_v1 = vrot.slane %v1260_v56, 2 }
 0x13a   : > { %984 = vrot.lane.b32.xlu0 %v981_v51, %s3082_s5  ;;  %v1101_v51 = vmul.f32 %v3544_v59, %v3539_v55  ;;  %v1067_v59 = vsel %vm860_vm5, %v1064_v62, %v1066_v50  ;;  %v1287_v62 = vrot.slane %v3662_v53, 2  ;;  %v1364_v50 = vmul.f32 %v3736_v39, %v3300_v41 }
 0x13b   : > { %776 = vrot.lane.b32.xlu1 %v771_v52, %s3083_s17  ;;  %v1244_v52 = vrot.slane %v1238_v43, 2  ;;  %v1268_v54 = vsel %vm1147_vm6, %v1266_v1, %v1267_v47  ;;  %v1247_v43 = vrot.slane %v1240_v32, 2  ;;  %v3776_v1 = vstv %s2765_s25  ;;  %s3951_s25 = sld [smem:[#allocation6 + $0x1a]] }
 0x13c   : > { %v1288_v20 = vsel %vm1147_vm6, %v1286_v12, %v1287_v62  ;;  %v1406_v11 = vmul.f32 %v3776_v1, %v3300_v41 }
 0x13d   : > { %v1248_v56 = vsel %vm1147_vm6, %v1245_v38, %v1247_v43 }
 0x13e   : > { %1026 = vrot.lane.b32.xlu0 %v1023_v60, %s3083_s17  ;;  %v1246_v60 = vsel %vm1147_vm6, %v1244_v52, %v1245_v38  ;;  %v3784_v38 = vmul.f32 %v3776_v1, %v3356_v9 }
 0x13f   : > { %804 = vrot.lane.b32.xlu1 %v799_v61, %s3084_s19  ;;  %v1108_v61 = vrot.slane %v1101_v51, 1  ;;  %v3755_v51 = vstv %s2764_s24  ;;  %s3922_s24 = sld [smem:[#allocation6 + $0x4a]] }
 0x140   : > { %v3763_v31 = vmul.f32 %v3755_v51, %v3474_v19  ;;  %v1386_v0 = vmul.f32 %v3755_v51, %v3438_v58 }
 0x141   : > { %v1109_v8 = vsel %vm860_vm5, %v1106_v6, %v1108_v61  ;;  %v1370_v61 = vrot.slane %v1364_v50, 2 }
 0x142   : > { %1068 = vrot.lane.b32.xlu0 %v1065_v4, %s3084_s19  ;;  %v1393_v35 = vrot.slane %v3763_v31, 2  ;;  %v1392_v10 = vrot.slane %v1386_v0, 2  ;;  %v3868_v0 = vstv %s2771_s6  ;;  %s4006_s6 = sld [smem:[#allocation6 + $0x7]] }
 0x143   : > { %832 = vrot.lane.b32.xlu1 %v827_v5, %s3085_s21  ;;  %v3675_v5 = vstv %s2760_s8  ;;  %v1372_v2 = vsel %vm1147_vm6, %v1370_v61, %v1371_v27  ;;  %s3864_s8 = sld [smem:[#allocation6 + $0x49]] }
 0x144   : > { %v3683_v3 = vmul.f32 %v3675_v5, %v3474_v19  ;;  %v1394_v46 = vsel %vm1147_vm6, %v1392_v10, %v1393_v35 }
 0x146   : > { %1110 = vrot.lane.b32.xlu0 %v1107_v14, %s3085_s21  ;;  %v1302_v14 = vmul.f32 %v3675_v5, %v3438_v58  ;;  %v1309_v63 = vrot.slane %v3683_v3, 2 }
 0x147   : > { %902 = vrot.lane.b32.xlu1 %v899_v17, %s3080_s26  ;;  %v3694_v17 = vstv %s2761_s15  ;;  %s3870_s15 = sld [smem:[#allocation6]] }
 0x148   : > { %v3702_v6 = vmul.f32 %v3694_v17, %v3356_v9  ;;  %v1324_v23 = vmul.f32 %v3694_v17, %v3409_v40 }
 0x14a   : > { %1187 = vrot.lane.b32.xlu0 %v1184_v25, %s3080_s26  ;;  %v1308_v25 = vrot.slane %v1302_v14, 2  ;;  %v1329_v7 = vrot.slane %v3702_v6, 2  ;;  %v3797_v14 = vstv %s2768_s23  ;;  %s3978_s23 = sld [smem:[#allocation6 + $0x4b]] }
 0x14b   : > { %944 = vrot.lane.b32.xlu1 %v941_v18, %s3081_s30  ;;  %v1322_v18 = vmul.f32 %v3694_v17, %v3300_v41 }
 0x14c   : > { %v1310_v29 = vsel %vm1147_vm6, %v1308_v25, %v1309_v63  ;;  %v1412_v25 = vrot.slane %v1406_v11, 2  ;;  %v1525_v11 = vmul.f32 %v3868_v0, %v3300_v41 }
 0x14d   : > { %v3643_v48 = vpop.permute.xlu0 %703 }
 0x14e   : > { %1207 = vrot.lane.b32.xlu0 %v1204_v34, %s3080_s26  ;;  %v1328_v34 = vrot.slane %v1322_v18, 2  ;;  %v1463_v18 = vmul.f32 %v3797_v14, %v3438_v58 }
 0x14f   : > { %986 = vrot.lane.b32.xlu1 %v983_v36, %s3082_s5  ;;  %v1344_v36 = vmul.f32 %v3715_v28, %v3438_v58 }
 0x150   : > { %v1330_v16 = vsel %vm1147_vm6, %v1328_v34, %v1329_v7  ;;  %v1331_v34 = vrot.slane %v1324_v23, 2 }
 0x151   : > { %v3673_v4 = vpop.permute.xlu0 %731 }
 0x152   : > { %1229 = vrot.lane.b32.xlu0 %v1226_v45, %s3081_s30  ;;  %v1262_v45 = vmul.f32 %v3633_v44, %v3539_v55  ;;  %v1332_v50 = vsel %vm1147_vm6, %v1329_v7, %v1331_v34 }
 0x153   : > { %1028 = vrot.lane.b32.xlu1 %v1025_v49, %s3083_s17  ;;  %v1350_v49 = vrot.slane %v1344_v36, 2  ;;  %v1346_v36 = vmul.f32 %v3715_v28, %v3539_v55 }
 0x155   : > { %v3704_v13 = vpop.permute.xlu0 %759  ;;  %v1352_v52 = vsel %vm1147_vm6, %v1350_v49, %v1351_v26 }
 0x156   : > { %1249 = vrot.lane.b32.xlu0 %v1246_v60, %s3081_s30  ;;  %v1269_v60 = vrot.slane %v1262_v45, 2  ;;  %v3843_v45 = vstv %s2770_s3  ;;  %s3998_s3 = sld [smem:[#allocation6 + $0x4c]] }
 0x157   : > { %1070 = vrot.lane.b32.xlu1 %v1067_v59, %s3084_s19  ;;  %v1282_v59 = vmul.f32 %v3654_v57, %v3409_v40  ;;  %v3853_v28 = vmul.f32 %v3843_v45, %v3474_v19 }
 0x158   : > { %v1270_v57 = vsel %vm1147_vm6, %v1267_v47, %v1269_v60  ;;  %v1413_v47 = vrot.slane %v3784_v38, 2 }
 0x159   : > { %v3734_v37 = vpop.permute.xlu0 %787 }
 0x15a   : > { %1271 = vrot.lane.b32.xlu0 %v1268_v54, %s3082_s5  ;;  %v1289_v54 = vrot.slane %v1282_v59, 2  ;;  %v1414_v53 = vsel %vm1147_vm6, %v1412_v25, %v1413_v47  ;;  %v1505_v59 = vmul.f32 %v3843_v45, %v3438_v58 }
 0x15b   : > { %1112 = vrot.lane.b32.xlu1 %v1109_v8, %s3085_s21  ;;  %v1304_v8 = vmul.f32 %v3675_v5, %v3539_v55  ;;  %v3807_v5 = vmul.f32 %v3797_v14, %v3474_v19 }
 0x15c   : > { %v1511_v10 = vrot.slane %v1505_v59, 3 }
 0x15d   : > { %v3765_v44 = vpop.permute.xlu0 %815  ;;  %v1311_v22 = vrot.slane %v1304_v8, 2  ;;  %v1388_v8 = vmul.f32 %v3755_v51, %v3539_v55 }
 0x15e   : > { %1291 = vrot.lane.b32.xlu0 %v1288_v20, %s3082_s5 }
 0x15f   : > { %1189 = vrot.lane.b32.xlu1 %v1186_v21, %s3080_s26  ;;  %v1290_v21 = vsel %vm1147_vm6, %v1287_v62, %v1289_v54  ;;  %v1470_v62 = vrot.slane %v3807_v5, 3  ;;  %v1312_v32 = vsel %vm1147_vm6, %v1309_v63, %v1311_v22  ;;  %v1395_v25 = vrot.slane %v1388_v8, 2 }
 0x161   : > { %v3795_v12 = vpop.permute.xlu0 %843 }
 0x162   : > { %1313 = vrot.lane.b32.xlu0 %v1310_v29, %s3083_s17 }
 0x163   : > { %1209 = vrot.lane.b32.xlu1 %v1206_v24, %s3080_s26  ;;  %v3820_v24 = vstv %s2769_s29  ;;  %s3990_s29 = sld [smem:[#allocation6 + $0x38]] }
 0x164   : > { %v3830_v17 = vmul.f32 %v3820_v24, %v3356_v9 }
 0x166   : > { %1333 = vrot.lane.b32.xlu0 %v1330_v16, %s3083_s17  ;;  %v1469_v16 = vrot.slane %v1463_v18, 3  ;;  %v1490_v63 = vrot.slane %v3830_v17, 3  ;;  %v1408_v18 = vmul.f32 %v3776_v1, %v3409_v40 }
 0x167   : > { %1231 = vrot.lane.b32.xlu1 %v1228_v42, %s3081_s30  ;;  %v1483_v42 = vmul.f32 %v3820_v24, %v3300_v41 }
 0x168   : > { %v1471_v3 = vsel %vm1434_vm7, %v1469_v16, %v1470_v62  ;;  %v3920_v16 = vstv %s3864_s8  ;;  %s4052_s8 = sld [smem:[#allocation6 + $0x1d]] }
 0x169   : > { %v1489_v60 = vrot.slane %v1483_v42, 3  ;;  %v3932_v42 = vmul.f32 %v3920_v16, %v3356_v9 }
 0x16a   : > { %1355 = vrot.lane.b32.xlu0 %v1352_v52, %s3084_s19  ;;  %v1353_v52 = vrot.slane %v1346_v36, 2  ;;  %v673_v36 = vstv %s3870_s15  ;;  %s4133_s15 = sld [smem:[#allocation6 + $0x4f]] }
 0x16b   : > { %1251 = vrot.lane.b32.xlu1 %v1248_v56, %s3081_s30  ;;  %v1366_v56 = vmul.f32 %v3736_v39, %v3409_v40  ;;  %v1491_v7 = vsel %vm1434_vm7, %v1489_v60, %v1490_v63  ;;  %v1512_v39 = vrot.slane %v3853_v28, 3  ;;  %v674_v59 = vmul.f32 %v673_v36, %v3438_v58 }
 0x16c   : > { %v1574_v8 = vrot.slane %v3932_v42, 3  ;;  %v4062_v28 = vstv %s4006_s6  ;;  %s4203_s6 = sld [smem:[#allocation6 + $0x20]] }
 0x16d   : > { %v1373_v54 = vrot.slane %v1366_v56, 2  ;;  %v1465_v56 = vmul.f32 %v3797_v14, %v3539_v55 }
 0x16e   : > { %1375 = vrot.lane.b32.xlu0 %v1372_v2, %s3084_s19  ;;  %v3880_v2 = vmul.f32 %v3868_v0, %v3356_v9 }
 0x16f   : > { %1273 = vrot.lane.b32.xlu1 %v1270_v57, %s3082_s5  ;;  %v1354_v57 = vsel %vm1147_vm6, %v1351_v26, %v1353_v52  ;;  %v1513_v26 = vsel %vm1434_vm7, %v1511_v10, %v1512_v39  ;;  %v1374_v23 = vsel %vm1147_vm6, %v1371_v27, %v1373_v54  ;;  %v678_v52 = vstv %s3888_s16  ;;  %s4137_s16 = sld [smem:[#allocation6 + $0x1e]] }
 0x170   : > { %v1532_v51 = vrot.slane %v3880_v2, 3  ;;  %v3949_v54 = vstv %s2774_s18  ;;  %v679_v14 = vmul.f32 %v678_v52, %v3300_v41  ;;  %s4108_s18 = sld [smem:[#allocation6 + $0x4e]] }
 0x171   : > { %v3799_v20 = vpop.permute.xlu1 %705  ;;  %v3964_v10 = vmul.f32 %v3949_v54, %v3474_v19 }
 0x172   : > { %1397 = vrot.lane.b32.xlu0 %v1394_v46, %s3085_s21 }
 0x173   : > { %1293 = vrot.lane.b32.xlu1 %v1290_v21, %s3082_s5  ;;  %v3895_v21 = vstv %s2772_s7  ;;  %s4011_s7 = sld [smem:[#allocation6 + $0x1b]] }
 0x174   : > { %v3818_v29 = vpop.permute.xlu0 %920  ;;  %v3905_v22 = vmul.f32 %v3895_v21, %v3474_v19 }
 0x175   : > { %v3822_v30 = vpop.permute.xlu1 %733 }
 0x176   : > { %1417 = vrot.lane.b32.xlu0 %v1414_v53, %s3085_s21  ;;  %v1531_v53 = vrot.slane %v1525_v11, 3  ;;  %v1554_v1 = vrot.slane %v3905_v22, 3 }
 0x177   : > { %1315 = vrot.lane.b32.xlu1 %v1312_v32, %s3083_s17  ;;  %v1547_v32 = vmul.f32 %v3895_v21, %v3438_v58 }
 0x178   : > { %v3841_v43 = vpop.permute.xlu0 %962  ;;  %v1533_v27 = vsel %vm1434_vm7, %v1531_v53, %v1532_v51 }
 0x179   : > { %v3845_v49 = vpop.permute.xlu1 %761  ;;  %v1553_v60 = vrot.slane %v1547_v32, 3  ;;  %v3976_v32 = vstv %s3922_s24  ;;  %s4147_s24 = sld [smem:[#allocation6 + $0x3f]] }
 0x17a   : > { %1474 = vrot.lane.b32.xlu0 %v1471_v3, %s3080_s26  ;;  %v1396_v3 = vsel %vm1147_vm6, %v1393_v35, %v1395_v25  ;;  %v681_v25 = vadd.f32 %v679_v14, %v674_v59 }
 0x17b   : > { %1335 = vrot.lane.b32.xlu1 %v1332_v50, %s3083_s17  ;;  %v1415_v50 = vrot.slane %v1408_v18, 2  ;;  %v1555_v35 = vsel %vm1434_vm7, %v1553_v60, %v1554_v1  ;;  %v1589_v18 = vmul.f32 %v3949_v54, %v3438_v58  ;;  %v1507_v60 = vmul.f32 %v3843_v45, %v3539_v55 }
 0x17c   : > { %v3866_v61 = vpop.permute.xlu0 %1004 }
 0x17d   : > { %v3872_v6 = vpop.permute.xlu1 %789  ;;  %v1416_v11 = vsel %vm1147_vm6, %v1413_v47, %v1415_v50 }
 0x17e   : > { %1494 = vrot.lane.b32.xlu0 %v1491_v7, %s3080_s26  ;;  %v1567_v7 = vmul.f32 %v3920_v16, %v3300_v41 }
 0x17f   : > { %1357 = vrot.lane.b32.xlu1 %v1354_v57, %s3084_s19 }
 0x180   : > { %v3893_v46 = vpop.permute.xlu0 %1046  ;;  %v1573_v41 = vrot.slane %v1567_v7, 3  ;;  %v1595_v7 = vrot.slane %v1589_v18, 3  ;;  %v1527_v18 = vmul.f32 %v3868_v0, %v3409_v40 }
 0x181   : > { %v3897_v15 = vpop.permute.xlu1 %817 }
 0x182   : > { %1516 = vrot.lane.b32.xlu0 %v1513_v26, %s3081_s30  ;;  %v1472_v26 = vrot.slane %v1465_v56, 3  ;;  %v1575_v47 = vsel %vm1434_vm7, %v1573_v41, %v1574_v8  ;;  %v1514_v41 = vrot.slane %v1507_v60, 3  ;;  %v1534_v60 = vrot.slane %v1527_v18, 3 }
 0x183   : > { %1377 = vrot.lane.b32.xlu1 %v1374_v23, %s3084_s19  ;;  %v1485_v23 = vmul.f32 %v3820_v24, %v3409_v40  ;;  %v1596_v24 = vrot.slane %v3964_v10, 3  ;;  %v4201_v10 = vstv %s4133_s15  ;;  %s4413_s15 = sld [smem:[#allocation6 + $0x53]] }
 0x184   : > { %v3916_v34 = vpop.permute.xlu0 %1088  ;;  %v1473_v50 = vsel %vm1434_vm7, %v1470_v62, %v1472_v26  ;;  %v4009_v62 = vstv %s3951_s25  ;;  %s4155_s25 = sld [smem:[#allocation6 + $0x50]] }
 0x185   : > { %v3924_v33 = vpop.permute.xlu1 %845  ;;  %v1492_v56 = vrot.slane %v1485_v23, 3  ;;  %v4021_v23 = vmul.f32 %v4009_v62, %v3474_v19 }
 0x186   : > { %1536 = vrot.lane.b32.xlu0 %v1533_v27, %s3081_s30 }
 0x187   : > { %1399 = vrot.lane.b32.xlu1 %v1396_v3, %s3085_s21  ;;  %v3988_v3 = vmul.f32 %v3976_v32, %v3356_v9 }
 0x188   : > { %v3947_v57 = vpop.permute.xlu0 %1130 }
 0x189   : > { %v3953_v31 = vpop.permute.xlu1 %922  ;;  %v5282_v26 = vrot.slane %v3988_v3, 3 }
 0x18a   : > { %1558 = vrot.lane.b32.xlu0 %v1555_v35, %s3082_s5  ;;  %v4002_v35 = vld [vmem:[#allocation5] sm:$0xff] }
 0x18b   : > { %1419 = vrot.lane.b32.xlu1 %v1416_v11, %s3085_s21  ;;  %v1609_v14 = vmul.f32 %v4002_v35, %v3976_v32 }
 0x18c   : > { %v691_v53 = vpop.permute.xlu0 %690 }
 0x18d   : > { %v696_v27 = vadd.f32 %v691_v53, %v681_v25  ;;  %v3980_v38 = vpop.permute.xlu1 %964  ;;  %v1493_v25 = vsel %vm1434_vm7, %v1490_v63, %v1492_v56  ;;  %v1515_v56 = vsel %vm1434_vm7, %v1512_v39, %v1514_v41  ;;  %v4065_v39 = vstv %s4011_s7  ;;  %s4327_s7 = sld [smem:[#allocation6 + $0x21]] }
 0x18e   : > { %1578 = vrot.lane.b32.xlu0 %v1575_v47, %s3082_s5  ;;  %v1631_v47 = vmul.f32 %v4009_v62, %v3438_v58  ;;  %v4068_v41 = vstv %s3998_s3  ;;  %v1673_v2 = vmul.f32 %v4065_v39, %v3438_v58  ;;  %s4194_s3 = sld [smem:[#allocation6 + $0x1f]] }
 0x18f   : > { %v709_v59 = vadd.f32 %v3643_v48, %v696_v27  ;;  %1476 = vrot.lane.b32.xlu1 %v1473_v50, %s3080_s26  ;;  %v1597_v48 = vsel %vm1434_vm7, %v1595_v7, %v1596_v24  ;;  %v1615_v27 = vrot.slane %v1609_v14, 3  ;;  %v1549_v14 = vmul.f32 %v3895_v21, %v3539_v55 }
 0x190   : > { %v719_v5 = vpop.permute.xlu0 %718 }
 0x191   : > { %v724_v45 = vadd.f32 %v719_v5, %v709_v59  ;;  %v4013_v11 = vpop.permute.xlu1 %1006  ;;  %v4034_v59 = vstv %s3978_s23  ;;  %v1617_v63 = vsel %vm1434_vm7, %v1615_v27, %v5282_v26  ;;  %v1679_v26 = vrot.slane %v1673_v2, 3  ;;  %s4161_s23 = sld [smem:[#allocation6 + $0x51]] }
 0x192   : > { %1600 = vrot.lane.b32.xlu0 %v1597_v48, %s3083_s17  ;;  %v4044_v0 = vmul.f32 %v4034_v59, %v3356_v9  ;;  %v1651_v48 = vmul.f32 %v4002_v35, %v4034_v59 }
 0x193   : > { %v737_v53 = vadd.f32 %v3673_v4, %v724_v45  ;;  %1496 = vrot.lane.b32.xlu1 %v1493_v25, %s3080_s26  ;;  %v5280_v4 = vrot.slane %v4021_v23, 3  ;;  %v1637_v45 = vrot.slane %v1631_v47, 3  ;;  %v4059_v25 = vstv %s3990_s29  ;;  %s4173_s29 = sld [smem:[#allocation6 + $0xe]] }
 0x194   : > { %v747_v50 = vpop.permute.xlu0 %746  ;;  %v5281_v27 = vrot.slane %v4044_v0, 3  ;;  %v4078_v47 = vmul.f32 %v4065_v39, %v3474_v19 }
 0x195   : > { %v752_v7 = vadd.f32 %v747_v50, %v737_v53  ;;  %v4036_v17 = vpop.permute.xlu1 %1048  ;;  %v1535_v50 = vsel %vm1434_vm7, %v1532_v51, %v1534_v60  ;;  %v4096_v60 = vmul.f32 %v4062_v28, %v3474_v19 }
 0x196   : > { %1620 = vrot.lane.b32.xlu0 %v1617_v63, %s3083_s17  ;;  %v871_v63 = vmul.f32 %v4002_v35, %v4059_v25 }
 0x197   : > { %v765_v5 = vadd.f32 %v3704_v13, %v752_v7  ;;  %1518 = vrot.lane.b32.xlu1 %v1515_v56, %s3081_s30  ;;  %v1639_v13 = vsel %vm1434_vm7, %v1637_v45, %v5280_v4  ;;  %v1556_v7 = vrot.slane %v1549_v14, 3  ;;  %v1569_v56 = vmul.f32 %v3920_v16, %v3409_v40 }
 0x198   : > { %v775_v53 = vpop.permute.xlu0 %774  ;;  %v1657_v45 = vrot.slane %v1651_v48, 3  ;;  %v4100_v16 = vmul.f32 %v4059_v25, %v3356_v9  ;;  %v675_v14 = vmul.f32 %v673_v36, %v3474_v19  ;;  %v4118_v4 = vmul.f32 %v4068_v41, %v3356_v9 }
 0x199   : > { %v780_v21 = vadd.f32 %v775_v53, %v765_v5  ;;  %v4070_v18 = vpop.permute.xlu1 %1090  ;;  %v854_v53 = vmul.f32 %v4062_v28, %v3438_v58  ;;  %v1557_v36 = vsel %vm1434_vm7, %v1554_v1, %v1556_v7  ;;  %v862_v1 = vrot.slane %v4096_v60, 1 }
 0x19a   : > { %1642 = vrot.lane.b32.xlu0 %v1639_v13, %s3084_s19  ;;  %v1659_v13 = vsel %vm1434_vm7, %v1657_v45, %v5281_v27  ;;  %v877_v27 = vrot.slane %v871_v63, 1  ;;  %v878_v7 = vrot.slane %v4100_v16, 1  ;;  %v1700_v2 = vrot.slane %v4118_v4, 3 }
 0x19b   : > { %v793_v5 = vadd.f32 %v3734_v37, %v780_v21  ;;  %1538 = vrot.lane.b32.xlu1 %v1535_v50, %s3081_s30  ;;  %v680_v37 = vmul.f32 %v678_v52, %v3356_v9  ;;  %v1680_v50 = vrot.slane %v4078_v47, 3  ;;  %v1576_v52 = vrot.slane %v1569_v56, 3 }
 0x19c   : > { %v803_v51 = vpop.permute.xlu0 %802  ;;  %v1693_v9 = vmul.f32 %v4002_v35, %v4068_v41  ;;  %v861_v22 = vrot.slane %v854_v53, 1 }
 0x19d   : > { %v808_v48 = vadd.f32 %v803_v51, %v793_v5  ;;  %v4110_v21 = vpop.permute.xlu1 %1132  ;;  %v1591_v5 = vmul.f32 %v3949_v54, %v3539_v55  ;;  %v4127_v51 = vstv %s4052_s8  ;;  %v682_v54 = vadd.f32 %v680_v37, %v675_v14  ;;  %s4354_s8 = sld [smem:[#allocation6 + $0x52]] }
 0x19e   : > { %1662 = vrot.lane.b32.xlu0 %v1659_v13, %s3084_s19  ;;  %v1681_v63 = vsel %vm1434_vm7, %v1679_v26, %v1680_v50  ;;  %v1577_v37 = vsel %vm1434_vm7, %v1574_v8, %v1576_v52  ;;  %v1611_v26 = vmul.f32 %v3976_v32, %v3409_v40  ;;  %v863_v42 = vsel %vm860_vm5, %v861_v22, %v862_v1  ;;  %v4179_v22 = vld [vmem:[#allocation5 + $0x8] sm:$0xff] }
 0x19f   : > { %v821_v45 = vadd.f32 %v3765_v44, %v808_v48  ;;  %1560 = vrot.lane.b32.xlu1 %v1557_v36, %s3082_s5  ;;  %v4145_v48 = vmul.f32 %v4127_v51, %v3474_v19  ;;  %v1598_v14 = vrot.slane %v1591_v5, 3  ;;  %v879_v40 = vsel %vm860_vm5, %v877_v27, %v878_v7 }
 0x1a0   : > { %v831_v56 = vpop.permute.xlu0 %830 }
 0x1a1   : > { %v836_v13 = vadd.f32 %v831_v56, %v821_v45  ;;  %v693_v44 = vpop.permute.xlu1 %692  ;;  %v1699_v45 = vrot.slane %v1693_v9, 3  ;;  %v1749_v56 = vmul.f32 %v4127_v51, %v3438_v58  ;;  %v5284_v9 = vrot.slane %v4145_v48, 4 }
 0x1a2   : > { %v697_v53 = vadd.f32 %v693_v44, %v682_v54  ;;  %1684 = vrot.lane.b32.xlu0 %v1681_v63, %s3085_s21  ;;  %v1599_v54 = vsel %vm1434_vm7, %v1596_v24, %v1598_v14  ;;  %v1633_v44 = vmul.f32 %v4009_v62, %v3539_v55 }
 0x1a3   : > { %v849_v36 = vadd.f32 %v3795_v12, %v836_v13  ;;  %1580 = vrot.lane.b32.xlu1 %v1577_v37, %s3082_s5  ;;  %v4171_v12 = vstv %s4108_s18  ;;  %v1701_v58 = vsel %vm1434_vm7, %v1699_v45, %v1700_v2  ;;  %v1618_v13 = vrot.slane %v1611_v26, 3  ;;  %s4388_s18 = sld [smem:[#allocation6 + $0x22]] }
 0x1a4   : > { %v710_v8 = vadd.f32 %v3799_v20, %v697_v53  ;;  %v901_v32 = vpop.permute.xlu0 %900  ;;  %v4183_v20 = vmul.f32 %v4179_v22, %v4171_v12  ;;  %v1755_v53 = vrot.slane %v1749_v56, 4  ;;  %v1769_v37 = vmul.f32 %v4002_v35, %v4171_v12 }
 0x1a5   : > { %v868_v52 = vadd.f32 %v863_v42, %v849_v36  ;;  %v721_v5 = vpop.permute.xlu1 %720  ;;  %v4198_v42 = vstv %s4137_s16  ;;  %s4438_s16 = sld [smem:[#allocation6 + $0x24]] }
 0x1a6   : > { %v725_v27 = vadd.f32 %v721_v5, %v710_v8  ;;  %1704 = vrot.lane.b32.xlu0 %v1701_v58, %s3085_s21  ;;  %v1757_v14 = vsel %vm192_vm0, %v1755_v53, %v5284_v9  ;;  %v5283_v26 = vrot.slane %v4183_v20, 4  ;;  %v4228_v53 = vstv %s4147_s24  ;;  %s4464_s24 = sld [smem:[#allocation6 + $0x55]] }
 0x1a7   : > { %v884_v63 = vadd.f32 %v879_v40, %v868_v52  ;;  %1602 = vrot.lane.b32.xlu1 %v1599_v54, %s3083_s17  ;;  %v5293_v40 = vrot.slane %v3988_v3, 3  ;;  %v4217_v52 = vld [vmem:[#allocation5 + $0x10] sm:$0x3f]  ;;  %v4223_v54 = vld [vmem:[#allocation4] sm:$0xff]  ;;  %v4259_v9 = vstv %s4194_s3  ;;  %s4548_s3 = sld [smem:[#allocation6 + $0x15]] }
 0x1a8   : > { %v738_v36 = vadd.f32 %v3822_v30, %v725_v27  ;;  %v943_v45 = vpop.permute.xlu0 %942  ;;  %v4211_v30 = vmul.f32 %v4198_v42, %v3474_v19  ;;  %v1653_v5 = vmul.f32 %v4217_v52, %v4034_v59  ;;  %v1775_v27 = vrot.slane %v1769_v37, 4 }
 0x1a9   : > { %v906_v24 = vadd.f32 %v901_v32, %v884_v63  ;;  %v749_v62 = vpop.permute.xlu1 %748  ;;  %v1619_v8 = vsel %vm1434_vm7, %v5293_v40, %v1618_v13  ;;  %v1640_v32 = vrot.slane %v1633_v44, 3  ;;  %v1791_v63 = vmul.f32 %v4223_v54, %v4198_v42 }
 0x1aa   : > { %v753_v56 = vadd.f32 %v749_v62, %v738_v36  ;;  %1760 = vrot.lane.b32.xlu0 %v1757_v14, %s3080_s26  ;;  %v4232_v44 = vstv %s4173_s29  ;;  %v4235_v36 = vstv %s4155_s25  ;;  %v4238_v59 = vstv %s4161_s23  ;;  %s4492_s25 = sld [smem:[#allocation6 + $0x25]] }
 0x1ab   : > { %v926_v58 = vadd.f32 %v3818_v29, %v906_v24  ;;  %1622 = vrot.lane.b32.xlu1 %v1619_v8, %s3083_s17  ;;  %v1777_v37 = vsel %vm192_vm0, %v1775_v27, %v5283_v26  ;;  %v1798_v62 = vrot.slane %v4211_v30, 4  ;;  %v1675_v8 = vmul.f32 %v4065_v39, %v3539_v55  ;;  %s4518_s23 = sld [smem:[#allocation6 + $0x56]] }
 0x1ac   : > { %v766_v3 = vadd.f32 %v3845_v49, %v753_v56  ;;  %v985_v13 = vpop.permute.xlu0 %984  ;;  %v4246_v49 = vmul.f32 %v4179_v22, %v4201_v10  ;;  %v5294_v56 = vrot.slane %v4021_v23, 3  ;;  %v1797_v27 = vrot.slane %v1791_v63, 4  ;;  %s4539_s29 = sld [smem:[#allocation6 + $0x46]] }
 0x1ad   : > { %v948_v29 = vadd.f32 %v943_v45, %v926_v58  ;;  %v777_v24 = vpop.permute.xlu1 %776  ;;  %v1660_v45 = vrot.slane %v1653_v5, 3  ;;  %v1811_v26 = vmul.f32 %v4002_v35, %v4201_v10  ;;  %v856_v23 = vmul.f32 %v4062_v28, %v3539_v55 }
 0x1ae   : > { %v781_v14 = vadd.f32 %v777_v24, %v766_v3  ;;  %1780 = vrot.lane.b32.xlu0 %v1777_v37, %s3080_s26  ;;  %v1641_v40 = vsel %vm1434_vm7, %v5294_v56, %v1640_v32  ;;  %v4266_v32 = vmul.f32 %v4002_v35, %v4228_v53  ;;  %v4269_v39 = vstv %s4203_s6  ;;  %s4553_s6 = sld [smem:[#allocation6 + $0x26]] }
 0x1af   : > { %v968_v58 = vadd.f32 %v3841_v43, %v948_v29  ;;  %1644 = vrot.lane.b32.xlu1 %v1641_v40, %s3084_s19  ;;  %v1799_v63 = vsel %vm192_vm0, %v1797_v27, %v1798_v62  ;;  %v1818_v29 = vrot.slane %v4246_v49, 4  ;;  %v5295_v28 = vrot.slane %v4044_v0, 3 }
 0x1b0   : > { %v794_v3 = vadd.f32 %v3872_v6, %v781_v14  ;;  %v1027_v24 = vpop.permute.xlu0 %1026  ;;  %v4277_v6 = vmul.f32 %v4259_v9, %v3474_v19  ;;  %v1682_v56 = vrot.slane %v1675_v8, 3  ;;  %v1817_v19 = vrot.slane %v1811_v26, 4 }
 0x1b1   : > { %v990_v43 = vadd.f32 %v985_v13, %v968_v58  ;;  %v805_v5 = vpop.permute.xlu1 %804  ;;  %v1661_v14 = vsel %vm1434_vm7, %v5295_v28, %v1660_v45  ;;  %v1695_v13 = vmul.f32 %v4217_v52, %v4068_v41  ;;  %v873_v58 = vmul.f32 %v4217_v52, %v4059_v25 }
 0x1b2   : > { %v809_v37 = vadd.f32 %v805_v5, %v794_v3  ;;  %1802 = vrot.lane.b32.xlu0 %v1799_v63, %s3081_s30  ;;  %v1833_v27 = vmul.f32 %v4223_v54, %v4259_v9  ;;  %v864_v5 = vrot.slane %v856_v23, 1  ;;  %v1164_v45 = vrot.slane %v4266_v32, 2 }
 0x1b3   : > { %v1010_v40 = vadd.f32 %v3866_v61, %v990_v43  ;;  %1664 = vrot.lane.b32.xlu1 %v1661_v14, %s3084_s19  ;;  %v1853_v41 = vmul.f32 %v4002_v35, %v4235_v36  ;;  %v1819_v43 = vsel %vm192_vm0, %v1817_v19, %v1818_v29  ;;  %v1840_v25 = vrot.slane %v4277_v6, 4 }
 0x1b4   : > { %v822_v3 = vadd.f32 %v3897_v15, %v809_v37  ;;  %v1069_v0 = vpop.permute.xlu0 %1068  ;;  %v4301_v26 = vmul.f32 %v4179_v22, %v4235_v36  ;;  %v1683_v23 = vsel %vm1434_vm7, %v1680_v50, %v1682_v56  ;;  %v1702_v32 = vrot.slane %v1695_v13, 3  ;;  %v4317_v50 = vld [vmem:[#allocation4 + $0x8] sm:$0xff] }
 0x1b5   : > { %v1032_v8 = vadd.f32 %v1027_v24, %v1010_v40  ;;  %v833_v61 = vpop.permute.xlu1 %832  ;;  %v1751_v24 = vmul.f32 %v4127_v51, %v3539_v55  ;;  %v880_v37 = vrot.slane %v873_v58, 1  ;;  %v1141_v28 = vmul.f32 %v4223_v54, %v4232_v44 }
 0x1b6   : > { %v837_v15 = vadd.f32 %v833_v61, %v822_v3  ;;  %1822 = vrot.lane.b32.xlu0 %v1819_v43, %s3081_s30  ;;  %v1839_v14 = vrot.slane %v1833_v27, 4  ;;  %v865_v47 = vsel %vm860_vm5, %v862_v1, %v864_v5  ;;  %v4321_v55 = vmul.f32 %v4317_v50, %v4232_v44 }
 0x1b7   : > { %v1052_v63 = vadd.f32 %v3893_v46, %v1032_v8  ;;  %1686 = vrot.lane.b32.xlu1 %v1683_v23, %s3085_s21  ;;  %v4325_v46 = vmul.f32 %v4179_v22, %v4228_v53  ;;  %v1860_v60 = vrot.slane %v4301_v26, 4  ;;  %v4335_v1 = vmul.f32 %v4317_v50, %v4269_v39 }
 0x1b8   : > { %v850_v40 = vadd.f32 %v3924_v33, %v837_v15  ;;  %v1111_v51 = vpop.permute.xlu0 %1110  ;;  %v1841_v33 = vsel %vm192_vm0, %v1839_v14, %v1840_v25  ;;  %v1703_v19 = vsel %vm1434_vm7, %v1700_v2, %v1702_v32  ;;  %v1758_v27 = vrot.slane %v1751_v24, 4 }
 0x1b9   : > { %v1074_v56 = vadd.f32 %v1069_v0, %v1052_v63  ;;  %v903_v13 = vpop.permute.xlu1 %902  ;;  %v1771_v3 = vmul.f32 %v4217_v52, %v4171_v12  ;;  %v881_v5 = vsel %vm860_vm5, %v878_v7, %v880_v37  ;;  %v1859_v8 = vrot.slane %v1853_v41, 4 }
 0x1ba   : > { %v869_v58 = vadd.f32 %v865_v47, %v850_v40  ;;  %1844 = vrot.lane.b32.xlu0 %v1841_v33, %s3082_s5  ;;  %v1875_v61 = vmul.f32 %v4223_v54, %v4269_v39  ;;  %v1148_v4 = vrot.slane %v1141_v28, 2  ;;  %v1149_v2 = vrot.slane %v4321_v55, 2  ;;  %v4368_v28 = vld [vmem:[#allocation4 + $0x10] sm:$0x3f] }
 0x1bb   : > { %v1094_v0 = vadd.f32 %v3916_v34, %v1074_v56  ;;  %1706 = vrot.lane.b32.xlu1 %v1703_v19, %s3085_s21  ;;  %v1165_v15 = vrot.slane %v4325_v46, 2  ;;  %v1861_v7 = vsel %vm192_vm0, %v1859_v8, %v1860_v60  ;;  %v1882_v12 = vrot.slane %v4335_v1, 4 }
 0x1bc   : > { %v885_v43 = vadd.f32 %v881_v5, %v869_v58  ;;  %v4352_v23 = vpop.permute.xlu0 %1187  ;;  %v4362_v41 = vmul.f32 %v4179_v22, %v4238_v59  ;;  %v5296_v24 = vrot.slane %v4145_v48, 4  ;;  %v1778_v37 = vrot.slane %v1771_v3, 4 }
 0x1bd   : > { %v1116_v34 = vadd.f32 %v1111_v51, %v1094_v0  ;;  %v945_v16 = vpop.permute.xlu1 %944  ;;  %v1793_v14 = vmul.f32 %v4368_v28, %v4198_v42  ;;  %v1881_v47 = vrot.slane %v1875_v61, 4  ;;  %v1895_v51 = vmul.f32 %v4002_v35, %v4238_v59 }
 0x1be   : > { %v907_v32 = vadd.f32 %v903_v13, %v885_v43  ;;  %1864 = vrot.lane.b32.xlu0 %v1861_v7, %s3082_s5  ;;  %v1759_v63 = vsel %vm192_vm0, %v5296_v24, %v1758_v27  ;;  %v1150_v48 = vsel %vm1147_vm6, %v1148_v4, %v1149_v2  ;;  %v1166_v56 = vsel %vm1147_vm6, %v1164_v45, %v1165_v15 }
 0x1bf   : > { %v1136_v40 = vadd.f32 %v3947_v57, %v1116_v34  ;;  %1762 = vrot.lane.b32.xlu1 %v1759_v63, %s3080_s26  ;;  %v4386_v42 = vstv %s4327_s7  ;;  %v1883_v19 = vsel %vm192_vm0, %v1881_v47, %v1882_v12  ;;  %v1902_v27 = vrot.slane %v4362_v41, 4  ;;  %s4575_s7 = sld [smem:[#allocation6 + $0x57]] }
 0x1c0   : > { %v927_v13 = vadd.f32 %v3953_v31, %v907_v32  ;;  %v4383_v33 = vpop.permute.xlu0 %1207  ;;  %v4396_v45 = vmul.f32 %v4317_v50, %v4386_v42  ;;  %v5297_v3 = vrot.slane %v4183_v20, 4  ;;  %v1800_v5 = vrot.slane %v1793_v14, 4 }
 0x1c1   : > { %v1155_v57 = vadd.f32 %v1150_v48, %v1136_v40  ;;  %v987_v58 = vpop.permute.xlu1 %986  ;;  %v1813_v8 = vmul.f32 %v4217_v52, %v4201_v10  ;;  %v1901_v43 = vrot.slane %v1895_v51, 4  ;;  %v1917_v4 = vmul.f32 %v4223_v54, %v4386_v42 }
 0x1c2   : > { %v949_v31 = vadd.f32 %v945_v16, %v927_v13  ;;  %1886 = vrot.lane.b32.xlu0 %v1883_v19, %s3083_s17  ;;  %v1779_v0 = vsel %vm192_vm0, %v5297_v3, %v1778_v37  ;;  %v4411_v7 = vstv %s4354_s8  ;;  %v1924_v32 = vrot.slane %v4396_v45, 4  ;;  %s4599_s8 = sld [smem:[#allocation6 + $0x27]] }
 0x1c3   : > { %v1171_v61 = vadd.f32 %v1166_v56, %v1155_v57  ;;  %1782 = vrot.lane.b32.xlu1 %v1779_v0, %s3080_s26  ;;  %v1903_v10 = vsel %vm192_vm0, %v1901_v43, %v1902_v27  ;;  %v4421_v24 = vmul.f32 %v4179_v22, %v4411_v7  ;;  %v1820_v37 = vrot.slane %v1813_v8, 4 }
 0x1c4   : > { %v969_v34 = vadd.f32 %v3980_v38, %v949_v31  ;;  %v4408_v16 = vpop.permute.xlu0 %1229  ;;  %v1801_v38 = vsel %vm192_vm0, %v1798_v62, %v1800_v5  ;;  %v1835_v14 = vmul.f32 %v4368_v28, %v4259_v9  ;;  %v1923_v40 = vrot.slane %v1917_v4, 4 }
 0x1c5   : > { %v1029_v20 = vpop.permute.xlu1 %1028  ;;  %v1937_v47 = vmul.f32 %v4002_v35, %v4411_v7  ;;  %v4436_v56 = vstv %s4388_s18  ;;  %v1944_v62 = vrot.slane %v4421_v24, 4  ;;  %v1855_v19 = vmul.f32 %v4217_v52, %v4235_v36  ;;  %s4646_s18 = sld [smem:[#allocation6 + $0x58]] }
 0x1c6   : > { %v991_v63 = vadd.f32 %v987_v58, %v969_v34  ;;  %1906 = vrot.lane.b32.xlu0 %v1903_v10, %s3083_s17  ;;  %v1925_v9 = vsel %vm192_vm0, %v1923_v40, %v1924_v32  ;;  %v4446_v13 = vmul.f32 %v4317_v50, %v4436_v56  ;;  %v1842_v58 = vrot.slane %v1835_v14, 4 }
 0x1c7   : > { %1804 = vrot.lane.b32.xlu1 %v1801_v38, %s3081_s30  ;;  %v1193_v31 = vadd.f32 %v4352_v23, %v1171_v61  ;;  %v1943_v3 = vrot.slane %v1937_v47, 4  ;;  %v1959_v0 = vmul.f32 %v4223_v54, %v4436_v56  ;;  %v4462_v43 = vstv %s4413_s15  ;;  %s4671_s15 = sld [smem:[#allocation6 + $0x28]] }
 0x1c8   : > { %v1011_v51 = vadd.f32 %v4013_v11, %v991_v63  ;;  %v4433_v48 = vpop.permute.xlu0 %1249  ;;  %v1821_v11 = vsel %vm192_vm0, %v1818_v29, %v1820_v37  ;;  %v1143_v49 = vmul.f32 %v4368_v28, %v4232_v44  ;;  %v1966_v23 = vrot.slane %v4446_v13, 4 }
 0x1c9   : > { %v1071_v30 = vpop.permute.xlu1 %1070  ;;  %v1945_v29 = vsel %vm192_vm0, %v1943_v3, %v1944_v62  ;;  %v1843_v4 = vsel %vm192_vm0, %v1840_v25, %v1842_v58  ;;  %v1862_v44 = vrot.slane %v1855_v19, 4  ;;  %v1877_v34 = vmul.f32 %v4368_v28, %v4269_v39 }
 0x1ca   : > { %v1033_v57 = vadd.f32 %v1029_v20, %v1011_v51  ;;  %1928 = vrot.lane.b32.xlu0 %v1925_v9, %s3084_s19  ;;  %v1213_v20 = vadd.f32 %v4383_v33, %v1193_v31  ;;  %v1160_v10 = vmul.f32 %v4217_v52, %v4228_v53  ;;  %v1965_v63 = vrot.slane %v1959_v0, 4 }
 0x1cb   : > { %1824 = vrot.lane.b32.xlu1 %v1821_v11, %s3081_s30  ;;  %v1979_v38 = vmul.f32 %v4002_v35, %v4462_v43  ;;  %v4490_v14 = vstv %s4438_s16  ;;  %v1151_v25 = vrot.slane %v1143_v49, 2  ;;  %v1863_v47 = vsel %vm192_vm0, %v1860_v60, %v1862_v44  ;;  %s4700_s16 = sld [smem:[#allocation6 + $0x59]] }
 0x1cc   : > { %v1053_v5 = vadd.f32 %v4036_v17, %v1033_v57  ;;  %v4459_v8 = vpop.permute.xlu0 %1271  ;;  %v4474_v17 = vmul.f32 %v4179_v22, %v4462_v43  ;;  %v1967_v53 = vsel %vm192_vm0, %v1965_v63, %v1966_v23  ;;  %v4502_v40 = vmul.f32 %v4317_v50, %v4490_v14 }
 0x1cd   : > { %v1113_v36 = vpop.permute.xlu1 %1112  ;;  %v1884_v51 = vrot.slane %v1877_v34, 4  ;;  %v1235_v9 = vadd.f32 %v4408_v16, %v1213_v20  ;;  %v1167_v57 = vrot.slane %v1160_v10, 2  ;;  %v1985_v11 = vrot.slane %v1979_v38, 4 }
 0x1ce   : > { %v1075_v61 = vadd.f32 %v1071_v30, %v1053_v5  ;;  %1948 = vrot.lane.b32.xlu0 %v1945_v29, %s3084_s19  ;;  %v1986_v33 = vrot.slane %v4474_v17, 4  ;;  %v1897_v30 = vmul.f32 %v4217_v52, %v4238_v59  ;;  %v2036_v58 = vmul.f32 %v4223_v54, %v4490_v14 }
 0x1cf   : > { %1846 = vrot.lane.b32.xlu1 %v1843_v4, %s3082_s5  ;;  %v4516_v26 = vstv %s4464_s24  ;;  %v1152_v59 = vsel %vm1147_vm6, %v1149_v2, %v1151_v25  ;;  %v2043_v3 = vrot.slane %v4502_v40, 5  ;;  %v1885_v55 = vsel %vm192_vm0, %v1882_v12, %v1884_v51  ;;  %s4723_s24 = sld [smem:[#allocation6 + $0x29]] }
 0x1d0   : > { %v1095_v37 = vadd.f32 %v4070_v18, %v1075_v61  ;;  %v1292_v6 = vpop.permute.xlu0 %1291  ;;  %v1987_v16 = vsel %vm192_vm0, %v1985_v11, %v1986_v33  ;;  %v1904_v2 = vrot.slane %v1897_v30, 4  ;;  %v1919_v5 = vmul.f32 %v4368_v28, %v4386_v42 }
 0x1d1   : > { %v4494_v39 = vpop.permute.xlu1 %1189  ;;  %v1255_v49 = vadd.f32 %v4433_v48, %v1235_v9  ;;  %v2042_v29 = vrot.slane %v2036_v58, 5  ;;  %v2056_v1 = vmul.f32 %v4002_v35, %v4516_v26  ;;  %v4551_v4 = vstv %s4492_s25  ;;  %s4745_s25 = sld [smem:[#allocation6 + $0x5a]] }
 0x1d2   : > { %v1117_v18 = vadd.f32 %v1113_v36, %v1095_v37  ;;  %1970 = vrot.lane.b32.xlu0 %v1967_v53, %s3085_s21  ;;  %v1168_v36 = vsel %vm1147_vm6, %v1165_v15, %v1167_v57  ;;  %v4563_v48 = vmul.f32 %v4317_v50, %v4551_v4  ;;  %v1905_v44 = vsel %vm192_vm0, %v1902_v27, %v1904_v2 }
 0x1d3   : > { %1866 = vrot.lane.b32.xlu1 %v1863_v47, %s3082_s5  ;;  %v2044_v46 = vsel %vm2007_vm8, %v2042_v29, %v2043_v3  ;;  %v1926_v34 = vrot.slane %v1919_v5, 4  ;;  %v1939_v20 = vmul.f32 %v4217_v52, %v4411_v7  ;;  %v1277_v10 = vadd.f32 %v4459_v8, %v1255_v49 }
 0x1d4   : > { %v1137_v19 = vadd.f32 %v4110_v21, %v1117_v18  ;;  %v1314_v31 = vpop.permute.xlu0 %1313  ;;  %v4531_v21 = vmul.f32 %v4179_v22, %v4516_v26  ;;  %v2062_v63 = vrot.slane %v2056_v1, 5  ;;  %v2078_v38 = vmul.f32 %v4223_v54, %v4551_v4 }
 0x1d5   : > { %v4523_v60 = vpop.permute.xlu1 %1209  ;;  %v4578_v25 = vstv %s4518_s23  ;;  %v1297_v41 = vadd.f32 %v1292_v6, %v1277_v10  ;;  %v2085_v8 = vrot.slane %v4563_v48, 5  ;;  %v1927_v6 = vsel %vm192_vm0, %v1924_v32, %v1926_v34  ;;  %s4771_s23 = sld [smem:[#allocation6 + $0x2b]] }
 0x1d6   : > { %v1156_v0 = vadd.f32 %v1152_v59, %v1137_v19  ;;  %1990 = vrot.lane.b32.xlu0 %v1987_v16, %s3085_s21  ;;  %v2063_v15 = vrot.slane %v4531_v21, 5  ;;  %v4588_v53 = vmul.f32 %v4179_v22, %v4578_v25  ;;  %v1946_v18 = vrot.slane %v1939_v20, 4 }
 0x1d7   : > { %1888 = vrot.lane.b32.xlu1 %v1885_v55, %s3083_s17  ;;  %v1961_v47 = vmul.f32 %v4368_v28, %v4436_v56  ;;  %v1319_v51 = vadd.f32 %v1314_v31, %v1297_v41  ;;  %v2084_v30 = vrot.slane %v2078_v38, 5  ;;  %v2098_v9 = vmul.f32 %v4002_v35, %v4578_v25 }
 0x1d8   : > { %v1172_v12 = vadd.f32 %v1168_v36, %v1156_v0  ;;  %v1334_v61 = vpop.permute.xlu0 %1333  ;;  %v2064_v7 = vsel %vm2007_vm8, %v2062_v63, %v2063_v15  ;;  %v4603_v58 = vstv %s4548_s3  ;;  %v4606_v45 = vstv %s4539_s29  ;;  %s4793_s29 = sld [smem:[#allocation6 + $0x5c]] }
 0x1d9   : > { %v4555_v42 = vpop.permute.xlu1 %1231  ;;  %v4609_v32 = vstv %s4553_s6  ;;  %v1339_v56 = vadd.f32 %v1334_v61, %v1319_v51  ;;  %v2086_v31 = vsel %vm2007_vm8, %v2084_v30, %v2085_v8  ;;  %v2105_v59 = vrot.slane %v4588_v53, 5  ;;  %s4823_s3 = sld [smem:[#allocation6 + $0x2c]] }
 0x1da   : > { %2047 = vrot.lane.b32.xlu0 %v2044_v46, %s3080_s26  ;;  %v1194_v57 = vadd.f32 %v4494_v39, %v1172_v12  ;;  %v4619_v39 = vmul.f32 %v4317_v50, %v4609_v32  ;;  %v1947_v16 = vsel %vm192_vm0, %v1944_v62, %v1946_v18  ;;  %v1968_v0 = vrot.slane %v1961_v47, 4  ;;  %s4845_s6 = sld [smem:[#allocation6 + $0x5d]] }
 0x1db   : > { %1908 = vrot.lane.b32.xlu1 %v1905_v44, %s3083_s17  ;;  %v4627_v55 = vmul.f32 %v4317_v50, %v4603_v58  ;;  %v1981_v2 = vmul.f32 %v4217_v52, %v4462_v43  ;;  %v2104_v49 = vrot.slane %v2098_v9, 5  ;;  %v2120_v36 = vmul.f32 %v4223_v54, %v4609_v32 }
 0x1dc   : > { %v1356_v37 = vpop.permute.xlu0 %1355  ;;  %v4635_v29 = vstv %s4575_s7  ;;  %v1214_v24 = vadd.f32 %v4523_v60, %v1194_v57  ;;  %v1428_v1 = vmul.f32 %v4223_v54, %v4603_v58  ;;  %v1445_v12 = vmul.f32 %v4002_v35, %v4606_v45  ;;  %s4867_s7 = sld [smem:[#allocation6 + $0x2d]] }
 0x1dd   : > { %v4580_v27 = vpop.permute.xlu1 %1251  ;;  %v1361_v5 = vadd.f32 %v1356_v37, %v1339_v56  ;;  %v4644_v43 = vmul.f32 %v4179_v22, %v4606_v45  ;;  %v2106_v60 = vsel %vm2007_vm8, %v2104_v49, %v2105_v59  ;;  %v2127_v44 = vrot.slane %v4619_v39, 5 }
 0x1de   : > { %2067 = vrot.lane.b32.xlu0 %v2064_v7, %s3080_s26  ;;  %v4654_v34 = vmul.f32 %v4179_v22, %v4635_v29  ;;  %v1969_v20 = vsel %vm192_vm0, %v1966_v23, %v1968_v0  ;;  %v1436_v10 = vrot.slane %v4627_v55, 3  ;;  %v1988_v63 = vrot.slane %v1981_v2, 4 }
 0x1df   : > { %1930 = vrot.lane.b32.xlu1 %v1927_v6, %s3084_s19  ;;  %v2038_v38 = vmul.f32 %v4368_v28, %v4490_v14  ;;  %v2126_v41 = vrot.slane %v2120_v36, 5  ;;  %v2140_v7 = vmul.f32 %v4002_v35, %v4635_v29  ;;  %v4667_v6 = vstv %s4599_s8  ;;  %s4889_s8 = sld [smem:[#allocation6 + $0x5e]] }
 0x1e0   : > { %v1376_v11 = vpop.permute.xlu0 %1375  ;;  %v1236_v18 = vadd.f32 %v4555_v42, %v1214_v24  ;;  %v1435_v13 = vrot.slane %v1428_v1, 3  ;;  %v1451_v47 = vrot.slane %v1445_v12, 3  ;;  %v1452_v23 = vrot.slane %v4644_v43, 3 }
 0x1e1   : > { %v4611_v19 = vpop.permute.xlu1 %1273  ;;  %v1381_v61 = vadd.f32 %v1376_v11, %v1361_v5  ;;  %v2128_v9 = vsel %vm2007_vm8, %v2126_v41, %v2127_v44  ;;  %v2147_v57 = vrot.slane %v4654_v34, 5  ;;  %v4679_v11 = vmul.f32 %v4317_v50, %v4667_v6 }
 0x1e2   : > { %2089 = vrot.lane.b32.xlu0 %v2086_v31, %s3081_s30  ;;  %v1437_v42 = vsel %vm1434_vm7, %v1435_v13, %v1436_v10  ;;  %v1989_v56 = vsel %vm192_vm0, %v1986_v33, %v1988_v63  ;;  %v2045_v31 = vrot.slane %v2038_v38, 5  ;;  %v2146_v2 = vrot.slane %v2140_v7, 5 }
 0x1e3   : > { %1950 = vrot.lane.b32.xlu1 %v1947_v16, %s3084_s19  ;;  %v2058_v16 = vmul.f32 %v4217_v52, %v4516_v26  ;;  %v2162_v5 = vmul.f32 %v4223_v54, %v4667_v6  ;;  %v1256_v49 = vadd.f32 %v4580_v27, %v1236_v18  ;;  %v1453_v36 = vsel %vm1434_vm7, %v1451_v47, %v1452_v23 }
 0x1e4   : > { %v1398_v62 = vpop.permute.xlu0 %1397  ;;  %v4698_v24 = vstv %s4646_s18  ;;  %v2169_v1 = vrot.slane %v4679_v11, 5  ;;  %v2046_v12 = vsel %vm2007_vm8, %v2043_v3, %v2045_v31  ;;  %v4721_v7 = vstv %s4671_s15  ;;  %s4911_s18 = sld [smem:[#allocation6 + $0x2e]] }
 0x1e5   : > { %v1294_v46 = vpop.permute.xlu1 %1293  ;;  %v1403_v37 = vadd.f32 %v1398_v62, %v1381_v61  ;;  %v2148_v62 = vsel %vm2007_vm8, %v2146_v2, %v2147_v57  ;;  %v4708_v27 = vmul.f32 %v4179_v22, %v4698_v24  ;;  %v2065_v61 = vrot.slane %v2058_v16, 5  ;;  %s4937_s15 = sld [smem:[#allocation6 + $0x5f]] }
 0x1e6   : > { %2109 = vrot.lane.b32.xlu0 %v2106_v60, %s3081_s30  ;;  %v2080_v60 = vmul.f32 %v4368_v28, %v4551_v4  ;;  %v2168_v63 = vrot.slane %v2162_v5, 5  ;;  %v2182_v38 = vmul.f32 %v4002_v35, %v4698_v24  ;;  %v4731_v13 = vmul.f32 %v4317_v50, %v4721_v7 }
 0x1e7   : > { %1972 = vrot.lane.b32.xlu1 %v1969_v20, %s3085_s21  ;;  %v2189_v18 = vrot.slane %v4708_v27, 5  ;;  %v4743_v16 = vstv %s4700_s16  ;;  %v1447_v48 = vmul.f32 %v4217_v52, %v4606_v45  ;;  %s4942_s16 = sld [smem:[#allocation6 + $0x1c]] }
 0x1e8   : > { %v1418_v51 = vpop.permute.xlu0 %1417  ;;  %v2170_v4 = vsel %vm2007_vm8, %v2168_v63, %v2169_v1  ;;  %v2142_v63 = vmul.f32 %v4217_v52, %v4635_v29 }
 0x1e9   : > { %v1423_v30 = vadd.f32 %v1418_v51, %v1403_v37  ;;  %v1316_v14 = vpop.permute.xlu1 %1315  ;;  %v1278_v37 = vadd.f32 %v4611_v19, %v1256_v49  ;;  %v2066_v19 = vsel %vm2007_vm8, %v2063_v15, %v2065_v61  ;;  %v2087_v51 = vrot.slane %v2080_v60, 5 }
 0x1ea   : > { %2131 = vrot.lane.b32.xlu0 %v2128_v9, %s3082_s5  ;;  %v2188_v9 = vrot.slane %v2182_v38, 5  ;;  %v2122_v49 = vmul.f32 %v4368_v28, %v4609_v32 }
 0x1eb   : > { %v1442_v0 = vadd.f32 %v1437_v42, %v1423_v30  ;;  %1992 = vrot.lane.b32.xlu1 %v1989_v56, %s3085_s21  ;;  %v1298_v47 = vadd.f32 %v1294_v46, %v1278_v37  ;;  %v2100_v30 = vmul.f32 %v4217_v52, %v4578_v25  ;;  %v2204_v42 = vmul.f32 %v4223_v54, %v4721_v7 }
 0x1ec   : > { %v1475_v17 = vpop.permute.xlu0 %1474  ;;  %v2190_v15 = vsel %vm2007_vm8, %v2188_v9, %v2189_v18  ;;  %v2211_v25 = vrot.slane %v4731_v13, 5 }
 0x1ed   : > { %v1458_v33 = vadd.f32 %v1453_v36, %v1442_v0  ;;  %v1336_v26 = vpop.permute.xlu1 %1335  ;;  %v1320_v56 = vadd.f32 %v1316_v14, %v1298_v47  ;;  %v4753_v0 = vmul.f32 %v4179_v22, %v4743_v16  ;;  %v2088_v14 = vsel %vm2007_vm8, %v2085_v8, %v2087_v51 }
 0x1ee   : > { %2151 = vrot.lane.b32.xlu0 %v2148_v62, %s3082_s5  ;;  %v2107_v5 = vrot.slane %v2100_v30, 5  ;;  %v2210_v36 = vrot.slane %v2204_v42, 5  ;;  %v4791_v47 = vstv %s4745_s25  ;;  %v2149_v42 = vrot.slane %v2142_v63, 5  ;;  %s4965_s25 = sld [smem:[#allocation6 + $0x2f]] }
 0x1ef   : > { %v1480_v20 = vadd.f32 %v1475_v17, %v1458_v33  ;;  %2049 = vrot.lane.b32.xlu1 %v2046_v12, %s3080_s26  ;;  %v1340_v2 = vadd.f32 %v1336_v26, %v1320_v56  ;;  %v1430_v17 = vmul.f32 %v4368_v28, %v4603_v58  ;;  %v2224_v33 = vmul.f32 %v4002_v35, %v4743_v16 }
 0x1f0   : > { %v1495_v41 = vpop.permute.xlu0 %1494  ;;  %v4769_v12 = vstv %s4723_s24  ;;  %v2212_v61 = vsel %vm2007_vm8, %v2210_v36, %v2211_v25  ;;  %v2231_v58 = vrot.slane %v4753_v0, 5  ;;  %v2108_v45 = vsel %vm2007_vm8, %v2105_v59, %v2107_v5  ;;  %s4958_s24 = sld [smem:[#allocation6 + $0x4d]] }
 0x1f1   : > { %v1500_v40 = vadd.f32 %v1495_v41, %v1480_v20  ;;  %v1358_v3 = vpop.permute.xlu1 %1357  ;;  %v4779_v35 = vmul.f32 %v4317_v50, %v4769_v12  ;;  %v2129_v20 = vrot.slane %v2122_v49, 5  ;;  %v1438_v38 = vrot.slane %v1430_v17, 3 }
 0x1f2   : > { %2173 = vrot.lane.b32.xlu0 %v2170_v4, %s3083_s17  ;;  %v1362_v26 = vadd.f32 %v1358_v3, %v1340_v2  ;;  %v2230_v37 = vrot.slane %v2224_v33, 5  ;;  %v2246_v41 = vmul.f32 %v4223_v54, %v4769_v12  ;;  %v1454_v4 = vrot.slane %v1447_v48, 3 }
 0x1f3   : > { %2069 = vrot.lane.b32.xlu1 %v2066_v19, %s3080_s26  ;;  %v2253_v19 = vrot.slane %v4779_v35, 5  ;;  %v4801_v51 = vmul.f32 %v4179_v22, %v4791_v47  ;;  %v2130_v9 = vsel %vm2007_vm8, %v2127_v44, %v2129_v20  ;;  %v2164_v56 = vmul.f32 %v4368_v28, %v4667_v6 }
 0x1f4   : > { %v1517_v31 = vpop.permute.xlu0 %1516  ;;  %v2232_v29 = vsel %vm2007_vm8, %v2230_v37, %v2231_v58  ;;  %v1455_v39 = vsel %vm1434_vm7, %v1452_v23, %v1454_v4  ;;  %v2150_v49 = vsel %vm2007_vm8, %v2147_v57, %v2149_v42  ;;  %v2184_v17 = vmul.f32 %v4217_v52, %v4698_v24 }
 0x1f5   : > { %v1522_v46 = vadd.f32 %v1517_v31, %v1500_v40  ;;  %v1378_v21 = vpop.permute.xlu1 %1377  ;;  %v1439_v31 = vsel %vm1434_vm7, %v1436_v10, %v1438_v38  ;;  %v2273_v5 = vrot.slane %v4801_v51, 5  ;;  %v2171_v36 = vrot.slane %v2164_v56, 5 }
 0x1f6   : > { %2193 = vrot.lane.b32.xlu0 %v2190_v15, %s3083_s17  ;;  %v1382_v60 = vadd.f32 %v1378_v21, %v1362_v26  ;;  %v4813_v21 = vld [vmem:[#allocation5] sm:$0xff]  ;;  %v2191_v20 = vrot.slane %v2184_v17, 5  ;;  %v2206_v63 = vmul.f32 %v4368_v28, %v4721_v7  ;;  %v4996_v51 = vstv %s4942_s16  ;;  %s2588_s16 = scalar_lea.sflag [#allocation8], %s3215_s27 }
 0x1f7   : > { %2091 = vrot.lane.b32.xlu1 %v2088_v14, %s3081_s30  ;;  %v2266_v15 = vmul.f32 %v4813_v21, %v4791_v47  ;;  %v4821_v14 = vstv %s4771_s23  ;;  %s4993_s23 = sld [smem:[#allocation6 + $0x60]] }
 0x1f8   : > { %v1537_v62 = vpop.permute.xlu0 %1536  ;;  %v4831_v43 = vmul.f32 %v4317_v50, %v4821_v14  ;;  %v2323_v26 = vmul.f32 %v4223_v54, %v4821_v14 }
 0x1f9   : > { %v1542_v8 = vadd.f32 %v1537_v62, %v1522_v46  ;;  %v1400_v32 = vpop.permute.xlu1 %1399  ;;  %v2252_v46 = vrot.slane %v2246_v41, 5  ;;  %v2272_v33 = vrot.slane %v2266_v15, 5 }
 0x1fa   : > { %2215 = vrot.lane.b32.xlu0 %v2212_v61, %s3084_s19  ;;  %v1404_v40 = vadd.f32 %v1400_v32, %v1382_v60  ;;  %v2330_v32 = vrot.slane %v4831_v43, 6  ;;  %v2329_v38 = vrot.slane %v2323_v26, 6  ;;  %v5022_v43 = vstv %s4958_s24 }
 0x1fb   : > { %2111 = vrot.lane.b32.xlu1 %v2108_v45, %s3081_s30  ;;  %v2254_v6 = vsel %vm2007_vm8, %v2252_v46, %v2253_v19  ;;  %v2274_v24 = vsel %vm2007_vm8, %v2272_v33, %v2273_v5  ;;  %v2172_v45 = vsel %vm2007_vm8, %v2169_v1, %v2171_v36 }
 0x1fc   : > { %v1559_v3 = vpop.permute.xlu0 %1558  ;;  %v2331_v1 = vsel %vm2294_vm9, %v2329_v38, %v2330_v32 }
 0x1fd   : > { %v1564_v53 = vadd.f32 %v1559_v3, %v1542_v8  ;;  %v1420_v59 = vpop.permute.xlu1 %1419  ;;  %v4843_v8 = vstv %s4793_s29  ;;  %s5029_s29 = sld [smem:[#allocation6 + $0x30]] }
 0x1fe   : > { %v1424_v30 = vadd.f32 %v1420_v59, %v1404_v40  ;;  %2235 = vrot.lane.b32.xlu0 %v2232_v29, %s3084_s19  ;;  %v4853_v61 = vmul.f32 %v4179_v22, %v4843_v8  ;;  %v2343_v37 = vmul.f32 %v4813_v21, %v4843_v8  ;;  %v4865_v40 = vstv %s4823_s3  ;;  %s5062_s3 = sld [smem:[#allocation6 + $0x61]] }
 0x1ff   : > { %2133 = vrot.lane.b32.xlu1 %v2130_v9, %s3082_s5  ;;  %v4875_v4 = vmul.f32 %v4317_v50, %v4865_v40  ;;  %v2192_v59 = vsel %vm2007_vm8, %v2189_v18, %v2191_v20  ;;  %v2213_v29 = vrot.slane %v2206_v63, 5  ;;  %v2365_v42 = vmul.f32 %v4223_v54, %v4865_v40 }
 0x200   : > { %v1443_v44 = vadd.f32 %v1439_v31, %v1424_v30  ;;  %v1579_v2 = vpop.permute.xlu0 %1578  ;;  %v2350_v7 = vrot.slane %v4853_v61, 6  ;;  %v2226_v30 = vmul.f32 %v4217_v52, %v4743_v16  ;;  %v2349_v9 = vrot.slane %v2343_v37, 6 }
 0x201   : > { %v1584_v55 = vadd.f32 %v1579_v2, %v1564_v53  ;;  %v1477_v10 = vpop.permute.xlu1 %1476  ;;  %v4887_v31 = vstv %s4845_s6  ;;  %v2372_v16 = vrot.slane %v4875_v4, 6  ;;  %v2325_v63 = vmul.f32 %v4368_v28, %v4821_v14  ;;  %s2830_s6 = sshll.u32 %s3058_s12, 8  ;;  %s3086_s12 = smov [#allocation11]  }
 0x202   : > { %v1459_v23 = vadd.f32 %v1455_v39, %v1443_v44  ;;  %2257 = vrot.lane.b32.xlu0 %v2254_v6, %s3085_s21  ;;  %v2351_v18 = vsel %vm2294_vm9, %v2349_v9, %v2350_v7  ;;  %v4897_v15 = vmul.f32 %v4179_v22, %v4887_v31  ;;  %v2214_v44 = vsel %vm2007_vm8, %v2211_v25, %v2213_v29  ;;  %v4979_v29 = vld [vmem:[#allocation5 + $0x10] sm:$0x3f] }
 0x203   : > { %2153 = vrot.lane.b32.xlu1 %v2150_v49, %s3082_s5  ;;  %v2233_v2 = vrot.slane %v2226_v30, 5  ;;  %v2385_v6 = vmul.f32 %v4813_v21, %v4887_v31  ;;  %v4909_v22 = vstv %s4867_s7  ;;  %v2345_v30 = vmul.f32 %v4979_v29, %v4843_v8 }
 0x204   : > { %v1481_v62 = vadd.f32 %v1477_v10, %v1459_v23  ;;  %v1601_v48 = vpop.permute.xlu0 %1600  ;;  %v2371_v10 = vrot.slane %v2365_v42, 6  ;;  %v4921_v36 = vmul.f32 %v4317_v50, %v4909_v22  ;;  %v4984_v42 = vld [vmem:[#allocation4] sm:$0xff]  ;;  %v5088_v4 = vstv %s5029_s29 }
 0x205   : > { %v1606_v34 = vadd.f32 %v1601_v48, %v1584_v55  ;;  %v1497_v57 = vpop.permute.xlu1 %1496  ;;  %v2248_v55 = vmul.f32 %v4368_v28, %v4769_v12  ;;  %v2392_v12 = vrot.slane %v4897_v15, 6  ;;  %v2234_v33 = vsel %vm2007_vm8, %v2231_v58, %v2233_v2  ;;  %v4945_v58 = vld [vmem:[#allocation5 + $0x8] sm:$0xff] }
 0x206   : > { %v1501_v60 = vadd.f32 %v1497_v57, %v1481_v62  ;;  %2277 = vrot.lane.b32.xlu0 %v2274_v24, %s3085_s21  ;;  %v2373_v25 = vsel %vm2294_vm9, %v2371_v10, %v2372_v16  ;;  %v2268_v62 = vmul.f32 %v4217_v52, %v4791_v47  ;;  %v2391_v48 = vrot.slane %v2385_v6, 6 }
 0x207   : > { %2175 = vrot.lane.b32.xlu1 %v2172_v45, %s3083_s17  ;;  %v2255_v26 = vrot.slane %v2248_v55, 5  ;;  %v4935_v24 = vstv %s4889_s8  ;;  %v2414_v52 = vrot.slane %v4921_v36, 6  ;;  %v2352_v55 = vrot.slane %v2345_v30, 6 }
 0x208   : > { %v1621_v41 = vpop.permute.xlu0 %1620  ;;  %v2393_v0 = vsel %vm2294_vm9, %v2391_v48, %v2392_v12  ;;  %v2275_v20 = vrot.slane %v2268_v62, 5  ;;  %v2427_v37 = vmul.f32 %v4813_v21, %v4935_v24  ;;  %v2367_v10 = vmul.f32 %v4368_v28, %v4865_v40 }
 0x209   : > { %v1626_v3 = vadd.f32 %v1621_v41, %v1606_v34  ;;  %v1519_v11 = vpop.permute.xlu1 %1518  ;;  %v2407_v34 = vmul.f32 %v4223_v54, %v4909_v22  ;;  %v4949_v54 = vmul.f32 %v4945_v58, %v4935_v24  ;;  %v2256_v45 = vsel %vm2007_vm8, %v2253_v19, %v2255_v26 }
 0x20a   : > { %v1523_v53 = vadd.f32 %v1519_v11, %v1501_v60  ;;  %2334 = vrot.lane.b32.xlu0 %v2331_v1, %s3080_s26  ;;  %v2433_v9 = vrot.slane %v2427_v37, 6 }
 0x20b   : > { %2195 = vrot.lane.b32.xlu1 %v2192_v59, %s3083_s17  ;;  %v2413_v38 = vrot.slane %v2407_v34, 6  ;;  %v2434_v14 = vrot.slane %v4949_v54, 6  ;;  %v2332_v59 = vrot.slane %v2325_v63, 6  ;;  %v2353_v34 = vsel %vm2294_vm9, %v2350_v7, %v2352_v55  ;;  %v5094_v55 = vld [vmem:[#allocation4 + $0x8] sm:$0xff] }
 0x20c   : > { %v1643_v56 = vpop.permute.xlu0 %1642  ;;  %v5055_v7 = vmul.f32 %v4945_v58, %v5022_v43 }
 0x20d   : > { %v1648_v46 = vadd.f32 %v1643_v56, %v1626_v3  ;;  %v1539_v27 = vpop.permute.xlu1 %1538  ;;  %v4963_v3 = vstv %s4911_s18  ;;  %v2415_v19 = vsel %vm2294_vm9, %v2413_v38, %v2414_v52  ;;  %v2435_v8 = vsel %vm2294_vm9, %v2433_v9, %v2434_v14 }
 0x20e   : > { %v1543_v39 = vadd.f32 %v1539_v27, %v1523_v53  ;;  %2354 = vrot.lane.b32.xlu0 %v2351_v18, %s3080_s26  ;;  %v4973_v11 = vmul.f32 %v4317_v50, %v4963_v3  ;;  %v2276_v53 = vsel %vm2007_vm8, %v2273_v5, %v2275_v20  ;;  %v2449_v56 = vmul.f32 %v4984_v42, %v4963_v3 }
 0x20f   : > { %2217 = vrot.lane.b32.xlu1 %v2214_v44, %s3084_s19  ;;  %v4991_v27 = vstv %s4937_s15  ;;  %v2333_v2 = vsel %vm2294_vm9, %v2330_v32, %v2332_v59  ;;  %v5060_v38 = vstv %s4993_s23  ;;  %v2409_v59 = vmul.f32 %v4368_v28, %v4909_v22  ;;  %s5226_s15 = scalar_lea.hbm %s5278_s2, %s2830_s6 }
 0x210   : > { %v1663_v23 = vpop.permute.xlu0 %1662  ;;  %v2456_v18 = vrot.slane %v4973_v11, 6  ;;  %v2455_v6 = vrot.slane %v2449_v56, 6  ;;  %v2511_v9 = vmul.f32 %v4813_v21, %v5060_v38 }
 0x211   : > { %v4913_v49 = vadd.f32 %v1663_v23, %v1648_v46  ;;  %v1561_v13 = vpop.permute.xlu1 %1560  ;;  %v2469_v23 = vmul.f32 %v4813_v21, %v4991_v27 }
 0x212   : > { %v1565_v17 = vadd.f32 %v1561_v13, %v1543_v39  ;;  %2376 = vrot.lane.b32.xlu0 %v2373_v25, %s3081_s30  ;;  %v5004_v39 = vmul.f32 %v4945_v58, %v4991_v27  ;;  %v1715_v13 = vmul.f32 %v4984_v42, %v4996_v51  ;;  %v5019_v25 = vmul.f32 %v4317_v50, %v4996_v51 }
 0x213   : > { %2237 = vrot.lane.b32.xlu1 %v2234_v33, %s3084_s19  ;;  %v2457_v33 = vsel %vm2294_vm9, %v2455_v6, %v2456_v18 }
 0x214   : > { %v4932_v57 = vpop.permute.xlu0 %1684  ;;  %v2476_v26 = vrot.slane %v5004_v39, 6  ;;  %v1721_v63 = vrot.slane %v1715_v13, 4  ;;  %v1722_v61 = vrot.slane %v5019_v25, 4  ;;  %v2416_v13 = vrot.slane %v2409_v59, 6 }
 0x215   : > { %v1581_v60 = vpop.permute.xlu1 %1580  ;;  %v2471_v59 = vmul.f32 %v4979_v29, %v4991_v27 }
 0x216   : > { %v1585_v47 = vadd.f32 %v1581_v60, %v1565_v17  ;;  %2396 = vrot.lane.b32.xlu0 %v2393_v0, %s3081_s30  ;;  %v5027_v17 = vstv %s4965_s25  ;;  %v2374_v60 = vrot.slane %v2367_v10, 6  ;;  %v2387_v0 = vmul.f32 %v4979_v29, %v4887_v31  ;;  %s2986_s25 = sshll.u32 %s3086_s12, 4  ;;  %s2987_s25 = int_to_ptr.vmem [resolvable:$false] %s2986_s25 }
 0x217   : > { %2259 = vrot.lane.b32.xlu1 %v2256_v45, %s3085_s21  ;;  %v5037_v62 = vmul.f32 %v4317_v50, %v5027_v17  ;;  %v1731_v45 = vmul.f32 %v4813_v21, %v5022_v43  ;;  %v2475_v50 = vrot.slane %v2469_v23, 6  ;;  %v2491_v20 = vmul.f32 %v4984_v42, %v5027_v17  ;;  %s2988_s23 = scalar_lea.vmem %s2987_s25, 512 }
 0x218   : > { %v1705_v41 = vpop.permute.xlu0 %1704  ;;  %v1723_v56 = vsel %vm192_vm0, %v1721_v63, %v1722_v61  ;;  %v5098_v10 = vmul.f32 %v5094_v55, %v5088_v4  ;;  %v2451_v63 = vmul.f32 %v4368_v28, %v4963_v3  ;;  %v2478_v27 = vrot.slane %v2471_v59, 6 }
 0x219   : > { %v1603_v35 = vpop.permute.xlu1 %1602  ;;  %v2477_v37 = vsel %vm2294_vm9, %v2475_v50, %v2476_v26  ;;  %v2497_v30 = vrot.slane %v2491_v20, 6  ;;  %v1737_v6 = vrot.slane %v1731_v45, 4  ;;  %v2417_v50 = vsel %vm2294_vm9, %v2414_v52, %v2416_v13 }
 0x21a   : > { %v1607_v1 = vadd.f32 %v1603_v35, %v1585_v47  ;;  %2418 = vrot.lane.b32.xlu0 %v2415_v19, %s3082_s5  ;;  %v1690_v47 = vadd.f32 %v4932_v57, %v4913_v49  ;;  %v2498_v35 = vrot.slane %v5037_v62, 6  ;;  %v5070_v19 = vmul.f32 %v4945_v58, %v5060_v38 }
 0x21b   : > { %2279 = vrot.lane.b32.xlu1 %v2276_v53, %s3085_s21  ;;  %v2394_v53 = vrot.slane %v2387_v0, 6  ;;  %v5113_v0 = vstv %s5062_s3  ;;  %v2458_v3 = vrot.slane %v2451_v63, 6 }
 0x21c   : > { %v4988_v46 = vpop.permute.xlu0 %1760  ;;  %v1710_v49 = vadd.f32 %v1705_v41, %v1690_v47  ;;  %v2375_v41 = vsel %vm2294_vm9, %v2372_v16, %v2374_v60  ;;  %v2499_v22 = vsel %vm2294_vm9, %v2497_v30, %v2498_v35  ;;  %v5121_v45 = vmul.f32 %v4945_v58, %v5113_v0 }
 0x21d   : > { %v1623_v5 = vpop.permute.xlu1 %1622  ;;  %v2395_v23 = vsel %vm2294_vm9, %v2392_v12, %v2394_v53 }
 0x21e   : > { %v1627_v44 = vadd.f32 %v1623_v5, %v1607_v1  ;;  %2438 = vrot.lane.b32.xlu0 %v2435_v8, %s3082_s5  ;;  %v1738_v5 = vrot.slane %v5055_v7, 4  ;;  %v1728_v16 = vadd.f32 %v1723_v56, %v1710_v49  ;;  %v2560_v52 = vrot.slane %v5121_v45, 6  ;;  %v5147_v56 = vld [vmem:[#allocation4 + $0x10] sm:$0x3f] }
 0x21f   : > { %2336 = vrot.lane.b32.xlu1 %v2333_v2, %s3080_s26  ;;  %v2518_v2 = vrot.slane %v5070_v19, 6 }
 0x220   : > { %v5024_v32 = vpop.permute.xlu0 %1780 }
 0x221   : > { %v1645_v40 = vpop.permute.xlu1 %1644 }
 0x222   : > { %v1649_v48 = vadd.f32 %v1645_v40, %v1627_v44  ;;  %2460 = vrot.lane.b32.xlu0 %v2457_v33, %s3083_s17  ;;  %v2429_v40 = vmul.f32 %v4979_v29, %v4935_v24  ;;  %v2517_v33 = vrot.slane %v2511_v9, 6  ;;  %v2540_v24 = vrot.slane %v5098_v10, 6 }
 0x223   : > { %2356 = vrot.lane.b32.xlu1 %v2353_v34, %s3080_s26  ;;  %v1739_v34 = vsel %vm192_vm0, %v1737_v6, %v1738_v5  ;;  %s2794_s26 = sld [smem:[#allocation6 + $0x23]] }
 0x224   : > { %v5057_v31 = vpop.permute.xlu0 %1802  ;;  %v1744_v15 = vadd.f32 %v1739_v34, %v1728_v16  ;;  %v2519_v12 = vsel %vm2294_vm9, %v2517_v33, %v2518_v2  ;;  %v2436_v20 = vrot.slane %v2429_v40, 6  ;;  %v1717_v16 = vmul.f32 %v5147_v56, %v4996_v51 }
 0x225   : > { %v1665_v57 = vpop.permute.xlu1 %1664  ;;  %v1733_v33 = vmul.f32 %v4979_v29, %v5022_v43 }
 0x226   : > { %v5072_v1 = vadd.f32 %v1665_v57, %v1649_v48  ;;  %2480 = vrot.lane.b32.xlu0 %v2477_v37, %s3083_s17  ;;  %v2533_v48 = vmul.f32 %v4984_v42, %v5088_v4  ;;  %v2553_v57 = vmul.f32 %v4813_v21, %v5113_v0  ;;  %v2437_v28 = vsel %vm2294_vm9, %v2434_v14, %v2436_v20 }
 0x227   : > { %2378 = vrot.lane.b32.xlu1 %v2375_v41, %s3081_s30  ;;  %v1766_v41 = vadd.f32 %v4988_v46, %v1744_v15  ;;  %v2459_v14 = vsel %vm2294_vm9, %v2456_v18, %v2458_v3  ;;  %v1724_v40 = vrot.slane %v1717_v16, 4  ;;  %v2479_v18 = vsel %vm2294_vm9, %v2476_v26, %v2478_v27 }
 0x228   : > { %v1823_v8 = vpop.permute.xlu0 %1822  ;;  %v2539_v49 = vrot.slane %v2533_v48, 6  ;;  %v2559_v46 = vrot.slane %v2553_v57, 6  ;;  %v1740_v43 = vrot.slane %v1733_v33, 4 }
 0x229   : > { %v1687_v44 = vpop.permute.xlu1 %1686  ;;  %v1786_v9 = vadd.f32 %v5024_v32, %v1766_v41  ;;  %v2493_v32 = vmul.f32 %v5147_v56, %v5027_v17 }
 0x22a   : > { %2502 = vrot.lane.b32.xlu0 %v2499_v22, %s3084_s19  ;;  %v2541_v36 = vsel %vm2294_vm9, %v2539_v49, %v2540_v24  ;;  %v2561_v54 = vsel %vm2294_vm9, %v2559_v46, %v2560_v52  ;;  %v1691_v51 = vadd.f32 %v1687_v44, %v5072_v1  ;;  %v1741_v25 = vsel %vm192_vm0, %v1738_v5, %v1740_v43 }
 0x22b   : > { %2398 = vrot.lane.b32.xlu1 %v2395_v23, %s3081_s30  ;;  %v1808_v6 = vadd.f32 %v5057_v31, %v1786_v9  ;;  %v2500_v17 = vrot.slane %v2493_v32, 6  ;;  %v2513_v31 = vmul.f32 %v4979_v29, %v5060_v38  ;;  %s2795_s30 = sld [smem:[#allocation6 + $0x54]]  ;;  %v2535_v38 = vmul.f32 %v5147_v56, %v5088_v4 }
 0x22c   : > { %v1845_v60 = vpop.permute.xlu0 %1844  ;;  %v2555_v4 = vmul.f32 %v4979_v29, %v5113_v0 }
 0x22d   : > { %v1707_v47 = vpop.permute.xlu1 %1706  ;;  %v1828_v13 = vadd.f32 %v1823_v8, %v1808_v6  ;;  %v1725_v8 = vsel %vm192_vm0, %v1722_v61, %v1724_v40  ;;  %v2501_v39 = vsel %vm2294_vm9, %v2498_v35, %v2500_v17  ;;  %v2520_v26 = vrot.slane %v2513_v31, 6 }
 0x22e   : > { %2522 = vrot.lane.b32.xlu0 %v2519_v12, %s3084_s19  ;;  %v1711_v48 = vadd.f32 %v1707_v47, %v1691_v51  ;;  %v2542_v49 = vrot.slane %v2535_v38, 6  ;;  %v2562_v59 = vrot.slane %v2555_v4, 6 }
 0x22f   : > { %2420 = vrot.lane.b32.xlu1 %v2417_v50, %s3082_s5  ;;  %v1850_v34 = vadd.f32 %v1845_v60, %v1828_v13  ;;  %v2000_v50 = vstv %s2794_s26  ;;  %v2521_v35 = vsel %vm2294_vm9, %v2518_v2, %v2520_v26 }
 0x230   : > { %v1865_v37 = vpop.permute.xlu0 %1864  ;;  %v1729_v47 = vadd.f32 %v1725_v8, %v1711_v48  ;;  %v2002_v63 = vmul.f32 %v5094_v55, %v2000_v50  ;;  %v2001_v5 = vmul.f32 %v4984_v42, %v2000_v50  ;;  %v2543_v2 = vsel %vm2294_vm9, %v2540_v24, %v2542_v49 }
 0x231   : > { %v5133_v53 = vpop.permute.xlu1 %1762  ;;  %v1870_v44 = vadd.f32 %v1865_v37, %v1850_v34  ;;  %v2017_v37 = vstv %s2795_s30  ;;  %v2563_v10 = vsel %vm2294_vm9, %v2560_v52, %v2562_v59  ;;  %v2003_v52 = vmul.f32 %v5147_v56, %v2000_v50 }
 0x232   : > { %2544 = vrot.lane.b32.xlu0 %v2541_v36, %s3085_s21  ;;  %v1745_v62 = vadd.f32 %v1741_v25, %v1729_v47  ;;  %v2019_v41 = vmul.f32 %v4945_v58, %v2017_v37  ;;  %v2009_v3 = vrot.slane %v2002_v63, 5  ;;  %v2018_v0 = vmul.f32 %v4813_v21, %v2017_v37 }
 0x233   : > { %2440 = vrot.lane.b32.xlu1 %v2437_v28, %s3082_s5  ;;  %s2808_s5 = sld [smem:[#allocation6 + $0x2a]] }
 0x234   : > { %v1887_v30 = vpop.permute.xlu0 %1886  ;;  %v1767_v19 = vadd.f32 %v5133_v53, %v1745_v62  ;;  %v2025_v16 = vrot.slane %v2019_v41, 5  ;;  %v2024_v24 = vrot.slane %v2018_v0, 5 }
 0x235   : > { %v5151_v22 = vpop.permute.xlu1 %1782  ;;  %v1892_v60 = vadd.f32 %v1887_v30, %v1870_v44  ;;  %v2008_v30 = vrot.slane %v2001_v5, 5 }
 0x236   : > { %2564 = vrot.lane.b32.xlu0 %v2561_v54, %s3085_s21  ;;  %v1787_v27 = vadd.f32 %v5151_v22, %v1767_v19  ;;  %v2026_v51 = vsel %vm2007_vm8, %v2024_v24, %v2025_v16 }
 0x237   : > { %2462 = vrot.lane.b32.xlu1 %v2459_v14, %s3083_s17  ;;  %v2010_v32 = vsel %vm2007_vm8, %v2008_v30, %v2009_v3 }
 0x238   : > { %v1907_v23 = vpop.permute.xlu0 %1906 }
 0x239   : > { %v1805_v11 = vpop.permute.xlu1 %1804  ;;  %v1912_v61 = vadd.f32 %v1907_v23, %v1892_v60  ;;  %v2287_v30 = vstv %s2808_s5 }
 0x23a   : > { %v1809_v6 = vadd.f32 %v1805_v11, %v1787_v27  ;;  %v2020_v11 = vmul.f32 %v4979_v29, %v2017_v37  ;;  %v2288_v27 = vmul.f32 %v4984_v42, %v2287_v30 }
 0x23b   : > { %2482 = vrot.lane.b32.xlu1 %v2479_v18, %s3083_s17  ;;  %s2809_s17 = sld [smem:[#allocation6 + $0x5b]] }
 0x23c   : > { %v1929_v1 = vpop.permute.xlu0 %1928  ;;  %v2027_v60 = vrot.slane %v2020_v11, 5 }
 0x23d   : > { %v1825_v15 = vpop.permute.xlu1 %1824  ;;  %v1934_v57 = vadd.f32 %v1929_v1, %v1912_v61 }
 0x23e   : > { %v1829_v33 = vadd.f32 %v1825_v15, %v1809_v6  ;;  %v2028_v62 = vsel %vm2007_vm8, %v2025_v16, %v2027_v60 }
 0x23f   : > { %2504 = vrot.lane.b32.xlu1 %v2501_v39, %s3084_s19  ;;  %v2011_v39 = vrot.slane %v2003_v52, 5 }
 0x240   : > { %v1949_v12 = vpop.permute.xlu0 %1948 }
 0x241   : > { %v1847_v20 = vpop.permute.xlu1 %1846  ;;  %v1954_v36 = vadd.f32 %v1949_v12, %v1934_v57  ;;  %v2012_v25 = vsel %vm2007_vm8, %v2009_v3, %v2011_v39 }
 0x242   : > { %v1851_v48 = vadd.f32 %v1847_v20, %v1829_v33 }
 0x243   : > { %2524 = vrot.lane.b32.xlu1 %v2521_v35, %s3084_s19  ;;  %s2708_s19 = sshll.u32 %s3215_s27, 4 }
 0x244   : > { %v1971_v7 = vpop.permute.xlu0 %1970 }
 0x245   : > { %v1867_v28 = vpop.permute.xlu1 %1866  ;;  %v1976_v46 = vadd.f32 %v1971_v7, %v1954_v36 }
 0x246   : > { %v1871_v17 = vadd.f32 %v1867_v28, %v1851_v48 }
 0x247   : > { %2546 = vrot.lane.b32.xlu1 %v2543_v2, %s3085_s21 }
 0x248   : > { %v1991_v9 = vpop.permute.xlu0 %1990 }
 0x249   : > { %v1996_v54 = vadd.f32 %v1991_v9, %v1976_v46  ;;  %v1889_v14 = vpop.permute.xlu1 %1888  ;;  %v2289_v9 = vmul.f32 %v5094_v55, %v2287_v30 }
 0x24a   : > { %v1893_v31 = vadd.f32 %v1889_v14, %v1871_v17 }
 0x24b   : > { %v2015_v53 = vadd.f32 %v2010_v32, %v1996_v54  ;;  %2566 = vrot.lane.b32.xlu1 %v2563_v10, %s3085_s21  ;;  %v2304_v54 = vstv %s2809_s17  ;;  %v2296_v6 = vrot.slane %v2289_v9, 6  ;;  %s187_s21 = scalar_lea.vmem [#allocation11], %s2708_s19 }
 0x24c   : > { %v2048_v23 = vpop.permute.xlu0 %2047  ;;  %v2306_v32 = vmul.f32 %v4945_v58, %v2304_v54  ;;  %s2601_s7 = sshll.u32 %s187_s21, 4  ;;  %s5228_s7 = int_to_ptr.vmem [resolvable:$true] %s2601_s7 }
 0x24d   : > { %v2031_v13 = vadd.f32 %v2026_v51, %v2015_v53  ;;  %v1909_v40 = vpop.permute.xlu1 %1908  ;;  %v2305_v51 = vmul.f32 %v4813_v21, %v2304_v54  ;;  %s2982_s24 = scalar_lea.vmem %s5228_s7, 256  ;;  %p2989_p9 = scmp.lt.s32.totalorder %s5228_s7, %s2987_s25 }
 0x24e   : > { %v1913_v1 = vadd.f32 %v1909_v40, %v1893_v31  ;;  %v2312_v33 = vrot.slane %v2306_v32, 6  ;;  %p2983_p1 = scmp.ne.s32.totalorder %s5228_s7, %s2982_s24  ;;  %p2990_p3 = scmp.lt.s32.totalorder %s2988_s23, %s2982_s24 }
 0x24f   : > { %v2053_v63 = vadd.f32 %v2048_v23, %v2031_v13  ;;  %v2295_v13 = vrot.slane %v2288_v27, 6  ;;  %v2311_v17 = vrot.slane %v2305_v51, 6 }
 0x250   : > { %v2068_v18 = vpop.permute.xlu0 %2067  ;;  %p2984_p6 = pnand %p2983_p1, %p5298_p4  ;;  %p2991_p5 = por %p2990_p3, %p2989_p9 }
 0x251   : > { %v1931_v22 = vpop.permute.xlu1 %1930  ;;  %v2073_v4 = vadd.f32 %v2068_v18, %v2053_v63  ;;  %v2313_v58 = vsel %vm2294_vm9, %v2311_v17, %v2312_v33 }
 0x252   : > { %v1935_v8 = vadd.f32 %v1931_v22, %v1913_v1  ;;  %v2297_v22 = vsel %vm2294_vm9, %v2295_v13, %v2296_v6  ;;  %p2985_p8 = pneg %p2984_p6 }
 0x254   : > { %v2090_v34 = vpop.permute.xlu0 %2089  ;;  %p2992_p7 = pnand %p2991_p5, %p2985_p8 }
 0x255   : > { %v1951_v45 = vpop.permute.xlu1 %1950  ;;  %v2095_v37 = vadd.f32 %v2090_v34, %v2073_v4 }
 0x256   : > { %v1955_v47 = vadd.f32 %v1951_v45, %v1935_v8 }
 0x258   : > { %v2110_v43 = vpop.permute.xlu0 %2109 }
 0x259   : > { %v1973_v44 = vpop.permute.xlu1 %1972  ;;  %v2115_v5 = vadd.f32 %v2110_v43, %v2095_v37 }
 0x25a   : > { %v1977_v26 = vadd.f32 %v1973_v44, %v1955_v47 }
 0x25c   : > { %v2132_v38 = vpop.permute.xlu0 %2131 }
 0x25d   : > { %v1993_v15 = vpop.permute.xlu1 %1992  ;;  %v2137_v36 = vadd.f32 %v2132_v38, %v2115_v5  ;;  %v2290_v38 = vmul.f32 %v5147_v56, %v2287_v30 }
 0x25e   : > { %v1997_v12 = vadd.f32 %v1993_v15, %v1977_v26 }
 0x260   : > { %v2016_v61 = vadd.f32 %v2012_v25, %v1997_v12  ;;  %v2152_v20 = vpop.permute.xlu0 %2151  ;;  %v2307_v25 = vmul.f32 %v4979_v29, %v2304_v54 }
 0x261   : > { %v2050_v50 = vpop.permute.xlu1 %2049  ;;  %v2157_v19 = vadd.f32 %v2152_v20, %v2137_v36  ;;  %v2298_v20 = vrot.slane %v2290_v38, 6 }
 0x262   : > { %v2032_v35 = vadd.f32 %v2028_v62, %v2016_v61 }
 0x263   : > { %v2299_v4 = vsel %vm2294_vm9, %v2296_v6, %v2298_v20 }
 0x264   : > { %v2174_v49 = vpop.permute.xlu0 %2173  ;;  %v2054_v53 = vadd.f32 %v2050_v50, %v2032_v35  ;;  %v2314_v35 = vrot.slane %v2307_v25, 6 }
 0x265   : > { %v2070_v57 = vpop.permute.xlu1 %2069  ;;  %v2179_v2 = vadd.f32 %v2174_v49, %v2157_v19 }
 0x266   : > { %v2074_v55 = vadd.f32 %v2070_v57, %v2054_v53  ;;  %v2315_v5 = vsel %vm2294_vm9, %v2312_v33, %v2314_v35 }
 0x268   : > { %v2194_v7 = vpop.permute.xlu0 %2193 }
 0x269   : > { %v2092_v41 = vpop.permute.xlu1 %2091  ;;  %v2199_v0 = vadd.f32 %v2194_v7, %v2179_v2 }
 0x26a   : > { %v2096_v42 = vadd.f32 %v2092_v41, %v2074_v55 }
 0x26c   : > { %v2216_v28 = vpop.permute.xlu0 %2215 }
 0x26d   : > { %v2112_v3 = vpop.permute.xlu1 %2111  ;;  %v2221_v16 = vadd.f32 %v2216_v28, %v2199_v0 }
 0x26e   : > { %v2116_v52 = vadd.f32 %v2112_v3, %v2096_v42 }
 0x270   : > { %v2236_v59 = vpop.permute.xlu0 %2235 }
 0x271   : > { %v2134_v46 = vpop.permute.xlu1 %2133  ;;  %v2241_v10 = vadd.f32 %v2236_v59, %v2221_v16 }
 0x272   : > { %v2138_v8 = vadd.f32 %v2134_v46, %v2116_v52 }
 0x274   : > { %v2258_v14 = vpop.permute.xlu0 %2257 }
 0x275   : > { %v2154_v24 = vpop.permute.xlu1 %2153  ;;  %v2263_v23 = vadd.f32 %v2258_v14, %v2241_v10 }
 0x276   : > { %v2158_v44 = vadd.f32 %v2154_v24, %v2138_v8 }
 0x278   : > { %v2278_v40 = vpop.permute.xlu0 %2277 }
 0x279   : > { %v2283_v48 = vadd.f32 %v2278_v40, %v2263_v23  ;;  %v2176_v18 = vpop.permute.xlu1 %2175 }
 0x27a   : > { %v2180_v11 = vadd.f32 %v2176_v18, %v2158_v44 }
 0x27b   : > { %v2302_v31 = vadd.f32 %v2297_v22, %v2283_v48 }
 0x27c   : > { %v2335_v34 = vpop.permute.xlu0 %2334 }
 0x27d   : > { %v2318_v45 = vadd.f32 %v2313_v58, %v2302_v31  ;;  %v2196_v1 = vpop.permute.xlu1 %2195 }
 0x27e   : > { %v2200_v26 = vadd.f32 %v2196_v1, %v2180_v11 }
 0x27f   : > { %v2340_v7 = vadd.f32 %v2335_v34, %v2318_v45 }
 0x280   : > { %v2355_v21 = vpop.permute.xlu0 %2354 }
 0x281   : > { %v2218_v43 = vpop.permute.xlu1 %2217  ;;  %v2360_v28 = vadd.f32 %v2355_v21, %v2340_v7 }
 0x282   : > { %v2222_v15 = vadd.f32 %v2218_v43, %v2200_v26 }
 0x284   : > { %v2377_v47 = vpop.permute.xlu0 %2376 }
 0x285   : > { %v2238_v39 = vpop.permute.xlu1 %2237  ;;  %v2382_v29 = vadd.f32 %v2377_v47, %v2360_v28 }
 0x286   : > { %v2242_v61 = vadd.f32 %v2238_v39, %v2222_v15 }
 0x288   : > { %v2397_v60 = vpop.permute.xlu0 %2396 }
 0x289   : > { %v2260_v12 = vpop.permute.xlu1 %2259  ;;  %v2402_v2 = vadd.f32 %v2397_v60, %v2382_v29 }
 0x28a   : > { %v2264_v63 = vadd.f32 %v2260_v12, %v2242_v61 }
 0x28c   : > { %v2419_v62 = vpop.permute.xlu0 %2418 }
 0x28d   : > { %v2280_v50 = vpop.permute.xlu1 %2279  ;;  %v2424_v0 = vadd.f32 %v2419_v62, %v2402_v2 }
 0x28e   : > { %v2284_v49 = vadd.f32 %v2280_v50, %v2264_v63 }
 0x290   : > { %v2303_v57 = vadd.f32 %v2299_v4, %v2284_v49  ;;  %v2439_v37 = vpop.permute.xlu0 %2438 }
 0x291   : > { %v2337_v56 = vpop.permute.xlu1 %2336  ;;  %v2444_v30 = vadd.f32 %v2439_v37, %v2424_v0 }
 0x292   : > { %v2319_v41 = vadd.f32 %v2315_v5, %v2303_v57 }
 0x294   : > { %v2461_v36 = vpop.permute.xlu0 %2460  ;;  %v2341_v6 = vadd.f32 %v2337_v56, %v2319_v41 }
 0x295   : > { %v2357_v19 = vpop.permute.xlu1 %2356  ;;  %v2466_v16 = vadd.f32 %v2461_v36, %v2444_v30 }
 0x296   : > { %v2361_v33 = vadd.f32 %v2357_v19, %v2341_v6 }
 0x298   : > { %v2481_v3 = vpop.permute.xlu0 %2480 }
 0x299   : > { %v2379_v59 = vpop.permute.xlu1 %2378  ;;  %v2486_v14 = vadd.f32 %v2481_v3, %v2466_v16 }
 0x29a   : > { %v2383_v18 = vadd.f32 %v2379_v59, %v2361_v33 }
 0x29c   : > { %v2503_v46 = vpop.permute.xlu0 %2502 }
 0x29d   : > { %v2399_v9 = vpop.permute.xlu1 %2398  ;;  %v2508_v32 = vadd.f32 %v2503_v46, %v2486_v14 }
 0x29e   : > { %v2403_v22 = vadd.f32 %v2399_v9, %v2383_v18 }
 0x2a0   : > { %v2523_v54 = vpop.permute.xlu0 %2522 }
 0x2a1   : > { %v2421_v27 = vpop.permute.xlu1 %2420  ;;  %v2528_v24 = vadd.f32 %v2523_v54, %v2508_v32 }
 0x2a2   : > { %v2425_v17 = vadd.f32 %v2421_v27, %v2403_v22 }
 0x2a4   : > { %v2545_v10 = vpop.permute.xlu0 %2544 }
 0x2a5   : > { %v2441_v53 = vpop.permute.xlu1 %2440  ;;  %v2550_v51 = vadd.f32 %v2545_v10, %v2528_v24 }
 0x2a6   : > { %v2445_v42 = vadd.f32 %v2441_v53, %v2425_v17 }
 0x2a8   : > { %v2565_v23 = vpop.permute.xlu0 %2564 }
 0x2a9   : > { %v2570_v13 = vadd.f32 %v2565_v23, %v2550_v51  ;;  %v2463_v40 = vpop.permute.xlu1 %2462 }
 0x2aa   : > { %v2467_v58 = vadd.f32 %v2463_v40, %v2445_v42 }
 0x2ab   : > { %v2822_v48 = vmul.f32 -1.442695, %v2570_v13 }
 0x2ad   : > { %2923 = vpow2.f32 %v2822_v48  ;;  %v2483_v55 = vpop.permute.xlu1 %2482 }
 0x2ae   : > { %v2487_v45 = vadd.f32 %v2483_v55, %v2467_v58 }
 0x2b1   : > { %v2505_v31 = vpop.permute.xlu1 %2504 }
 0x2b2   : > { %v2509_v1 = vadd.f32 %v2505_v31, %v2487_v45 }
 0x2b5   : > { %v2525_v34 = vpop.permute.xlu1 %2524 }
 0x2b6   : > { %v2529_v21 = vadd.f32 %v2525_v34, %v2509_v1 }
 0x2b9   : > { %v2547_v52 = vpop.permute.xlu1 %2546 }
 0x2ba   : > { %v2924_v8 = vpop.eup %2923  ;;  %v2551_v44 = vadd.f32 %v2547_v52, %v2529_v21 }
 0x2bb   : > { %v2578_v43 = vadd.f32 1.0, %v2924_v8 }
 0x2bd   : > { %2925 = vrcp.f32 %v2578_v43  ;;  %v2567_v11 = vpop.permute.xlu1 %2566 }
 0x2be   : > { %v2571_v47 = vadd.f32 %v2567_v11, %v2551_v44 }
 0x2c0   : > { %v2823_v39 = vmul.f32 -1.442695, %v2571_v47 }
 0x2c2   : > { %2927 = vpow2.f32 %v2823_v39 }
 0x2ca   : > { %v2926_v26 = vpop.eup %2925 }
 0x2cb   : > { %2585 = vst.msk [vmem:[%s187_s21] sm:$0xff] %vm2584_vm10, %v2926_v26 }
 0x2cf   : > { %v2928_v38 = vpop.eup %2927 }
 0x2d0   : > { %v2579_v15 = vadd.f32 1.0, %v2928_v38 }
 0x2d2   : > { %2929 = vrcp.f32 %v2579_v15 }
 0x2df   : > { %v2930_v60 = vpop.eup %2929 }
 0x2e0   : > { %2586 = vst.msk [vmem:[%s187_s21 + $0x8] sm:$0xff] %vm2584_vm10, %v2930_v60 }
 0x2e1   : > { %2995 = shalt.err (!%p2992_p7)
}
 0x2e2   : > { %s2996_s29 = scalar_lea.hbm %s5226_s15, 256  ;;  %s3000_s30 = scalar_lea.hbm %s5278_s2, 512 }
 0x2e3   : > { %p2997_p2 = scmp.ne.s32.totalorder %s5226_s15, %s2996_s29  ;;  %p3001_p13 = scmp.lt.s32.totalorder %s5226_s15, %s5278_s2 }
 0x2e4   : > { %p3002_p0 = scmp.lt.s32.totalorder %s3000_s30, %s2996_s29 }
 0x2e5   : > { %p2998_p11 = pnand %p2997_p2, %p5298_p4 }
 0x2e6   : > { %p3003_p10 = por %p3002_p0, %p3001_p13 }
 0x2e7   : > { %p2999_p12 = pneg %p2998_p11 }
 0x2e9   : > { %p3004_p1 = pnand %p3003_p10, %p2999_p12 }
 0x2eb   : > { %3007 = shalt.err (!%p3004_p1)
}
 0x2ec   : > { %s3087_s19 = smov 128   ;;  %s3088_s21 = smov 8  }
 0x2ed   : > { %2837 = dma.vmem_to_hbm [thread:$0]  (%p5298_p4), %s5228_s7, 256, %s5226_s15, %s2588_s16, %s3087_s19, %s3087_s19, %s3088_s21  }
 0x2ee PF: > { %s2616_s6 = sand.u32 1, %s3046_s9   ;;  %p5299_p6 = scmp.ne.s32.totalorder %s5288_s20, 0 }
 0x2ef   : > { %p5300_p8 = scmp.ge.s32.totalorder %s3066_s14, 2  ;;  %s2617_s8 = scalar_lea.sflag [#allocation8], %s2616_s6 }
 0x2f1   : > { %p2848_p9 = pnand %p5300_p8, %p5299_p6 }
 0x2f3   : > { %p2849_p3 = pneg %p2848_p9 }
 0x2f5   : > { %3041 = dma.done.wait (%p2849_p3), %s2617_s8, 256  }
 0x2f6   : > { %3043 = vsyncadd (%p2849_p3), %s2617_s8, 4294967040  ;;  %s19_s14 = sadd.s32 1, %s3066_s14   ;;  %s5301_s9 = smov %s3050_s10 }
 0x2f7   : > { %p16_p5 = scmp.ge.s32.totalorder %s19_s14, 4   ;;  %s5302_s10 = smov %s3054_s11 }
 0x2f8   : > { %s5303_s11 = smov %s3192_s4  ;;  %s5304_s12 = smov %s3062_s13 }
 0x2f9   : > { %s5305_s13 = smov %s5307_s22  ;;  %18 = sbr.rel (!%p16_p5) target bundleno = 7 (0x7), region = 90 }
 0x2fe   :  { %2622 = vsyncpa [#allocation7], 1 }
 0x2ff   :  { %2624 = vsyncpa [#allocation7 + $0x1], 1 }
 0x300   :  { %2625 = vsyncpa [#allocation8], 1 }
 0x301   :  { %2627 = vsyncpa [#allocation8 + $0x1], 1 }
 0x302   :  { %2628 = vsyncpa [#allocation9], 1 }
 0x303   :  { %2630 = vsyncpa [#allocation9 + $0x1], 1 }

</bundles_post_ra>
